<compile_context>
chip_gen: v7x
topology: tpu7x:2x2x1
jax: 0.10.0
libtpu: 0.0.40
codegen_flags: <defaults>
</compile_context>

<pallas_src>
import jax
import jax.numpy as jnp
from jax import lax
from jax.experimental import pallas as pl
from jax.experimental.pallas import tpu as pltpu  # noqa: F401  (kept for TPU backend)

# ----------------------- small synthetic configuration -----------------------
B = 2            # batch
S = 8            # news token sequence length
T = 8            # price sequence length
F_PRICE = 4      # input_size (price features)
D = 32           # BERT hidden size (stand-in for 768)
H_HEADS = 2      # attention heads
DH = D // H_HEADS
N_BERT_LAYERS = 2
D_FF = 64        # BERT intermediate size
VOCAB = 100
MAX_POS = 16
H_LSTM = 16      # hidden_size
N_LSTM_LAYERS = 2

_F32 = jnp.float32
_BF16 = jnp.bfloat16


# ------------------------------- small helpers --------------------------------
def _full_spec(shape):
    """BlockSpec covering the whole array, for grid=(1,)."""
    n = len(shape)
    return pl.BlockSpec(shape, lambda i, _n=n: (0,) * _n)


def _mm(a, b):
    """MXU matmul: bf16 operands, f32 accumulation."""
    return jnp.dot(a.astype(_BF16), b.astype(_BF16), preferred_element_type=_F32)


def _ln(x, g, b, eps=1e-12):
    mu = jnp.mean(x, axis=-1, keepdims=True)
    var = jnp.mean((x - mu) ** 2, axis=-1, keepdims=True)
    return (x - mu) * lax.rsqrt(var + eps) * g + b


def _gelu(x):
    # TODO(synk): HF BERT default is exact erf-GELU; tanh approximation used here.
    c = 0.7978845608028654  # sqrt(2/pi)
    return 0.5 * x * (1.0 + jnp.tanh(c * (x + 0.044715 * x * x * x)))


def _lstm_cell(gates, c_prev):
    """PyTorch gate order: i, f, g, o."""
    i = jax.nn.sigmoid(gates[:, 0 * H_LSTM:1 * H_LSTM])
    f = jax.nn.sigmoid(gates[:, 1 * H_LSTM:2 * H_LSTM])
    g = jnp.tanh(gates[:, 2 * H_LSTM:3 * H_LSTM])
    o = jax.nn.sigmoid(gates[:, 3 * H_LSTM:4 * H_LSTM])
    c_new = f * c_prev + i * g
    h_new = o * jnp.tanh(c_new)
    return h_new, c_new


# ------------------------------ fused Pallas kernel ----------------------------
def fused_forward_kernel(
        emb_ref, bias_ref, eln_g_ref, eln_b_ref,
        wqkv_ref, bqkv_ref, wo_ref, bo_ref, ln1g_ref, ln1b_ref,
        wi_ref, bi_ref, wo2_ref, bo2_ref, ln2g_ref, ln2b_ref,
        price_ref,
        wihp0_ref, wihc0_ref, whh0_ref, b0_ref,
        wih1_ref, whh1_ref, b1_ref,
        fcw_ref, fcb_ref,
        out_ref):
    # ---------------- BERT encoder ----------------
    x = _ln(emb_ref[...], eln_g_ref[...], eln_b_ref[...])        # (B*S, D) f32
    bias = bias_ref[...]                                          # (B, 1, S)
    scale = 1.0 / (DH ** 0.5)

    for l in range(N_BERT_LAYERS):                                # static, 2 layers
        qkv = _mm(x, wqkv_ref[l]) + bqkv_ref[l]                   # (B*S, 3D)
        q3 = qkv[:, 0 * D:1 * D].reshape(B, S, D)
        k3 = qkv[:, 1 * D:2 * D].reshape(B, S, D)
        v3 = qkv[:, 2 * D:3 * D].reshape(B, S, D)
        wo_l = wo_ref[l]                                          # (D, D)

        attn = jnp.zeros((B * S, D), _F32)
        for h in range(H_HEADS):                                  # static, 2 heads
            qh = q3[:, :, h * DH:(h + 1) * DH]
            kh = k3[:, :, h * DH:(h + 1) * DH]
            vh = v3[:, :, h * DH:(h + 1) * DH]
            s = jnp.einsum('bqd,bkd->bqk', qh.astype(_BF16), kh.astype(_BF16),
                           preferred_element_type=_F32) * scale + bias
            s = s - jnp.max(s, axis=-1, keepdims=True)
            p = jnp.exp(s)
            p = p / jnp.sum(p, axis=-1, keepdims=True)
            ctx = jnp.einsum('bqk,bkd->bqd', p.astype(_BF16), vh.astype(_BF16),
                             preferred_element_type=_F32)         # (B, S, DH)
            # fold the per-head output directly into the Wo projection
            attn = attn + _mm(ctx.reshape(B * S, DH),
                              wo_l[h * DH:(h + 1) * DH, :])
        attn = attn + bo_ref[l]

        h1 = _ln(x + attn, ln1g_ref[l], ln1b_ref[l])
        ff = _gelu(_mm(h1, wi_ref[l]) + bi_ref[l])
        ff = _mm(ff, wo2_ref[l]) + bo2_ref[l]
        x = _ln(h1 + ff, ln2g_ref[l], ln2b_ref[l])

    # ---------------- CLS embedding (token 0 of every batch row) ----------------
    cls = jnp.concatenate([x[b * S:b * S + 1, :] for b in range(B)], axis=0)  # (B, D)

    # ---------------- 2-layer LSTM over price + constant CLS features ------------
    # CLS contribution to layer-0 gates is time-invariant -> compute once.
    cls_b0 = _mm(cls, wihc0_ref[...]) + b0_ref[...]               # (B, 4H)
    wihp0 = wihp0_ref[...].astype(_BF16)
    whh0 = whh0_ref[...].astype(_BF16)
    wih1 = wih1_ref[...].astype(_BF16)
    whh1 = whh1_ref[...].astype(_BF16)
    b1 = b1_ref[...]                                              # (1, 4H)

    def step(t, carry):
        h1_, c1_, h2_, c2_ = carry
        p_t = price_ref[t]                                        # (B, F_PRICE)
        g0 = _mm(p_t, wihp0) + cls_b0 + _mm(h1_, whh0)
        h1n, c1n = _lstm_cell(g0, c1_)
        # TODO(synk): inter-layer LSTM dropout (p=0.2) omitted — identity in eval.
        g1 = _mm(h1n, wih1) + _mm(h2_, whh1) + b1
        h2n, c2n = _lstm_cell(g1, c2_)
        return (h1n, c1n, h2n, c2n)

    zeros = jnp.zeros((B, H_LSTM), _F32)
    _, _, h2_last, _ = lax.fori_loop(0, T, step, (zeros, zeros, zeros, zeros),
                                     unroll=True)

    # ---------------- dropout (identity in eval) -> Linear(hidden, 1) ------------
    out_ref[...] = _mm(h2_last, fcw_ref[...]) + fcb_ref[...]      # (B, 1)


# ---------------------------- parameter construction ---------------------------
def init_params(seed=0):
    keys = iter(jax.random.split(jax.random.PRNGKey(seed), 128))

    def w(shape, scale=0.02):
        return (scale * jax.random.normal(next(keys), shape)).astype(_F32)

    L = N_BERT_LAYERS
    p = {
        "word_emb": w((VOCAB, D)),
        "pos_emb": w((MAX_POS, D)),
        "type_emb": w((2, D)),
        "emb_ln_g": jnp.ones((1, D), _F32),
        "emb_ln_b": jnp.zeros((1, D), _F32),
        # stacked BERT layer weights (leading layer dim -> one kernel arg each)
        "wqkv": jnp.stack([w((D, 3 * D)) for _ in range(L)]),      # fused Q|K|V
        "bqkv": jnp.zeros((L, 1, 3 * D), _F32),
        "wo": jnp.stack([w((D, D)) for _ in range(L)]),
        "bo": jnp.zeros((L, 1, D), _F32),
        "ln1g": jnp.ones((L, 1, D), _F32),
        "ln1b": jnp.zeros((L, 1, D), _F32),
        "wi": jnp.stack([w((D, D_FF)) for _ in range(L)]),
        "bi": jnp.zeros((L, 1, D_FF), _F32),
        "wo2": jnp.stack([w((D_FF, D)) for _ in range(L)]),
        "bo2": jnp.zeros((L, 1, D), _F32),
        "ln2g": jnp.ones((L, 1, D), _F32),
        "ln2b": jnp.zeros((L, 1, D), _F32),
        # LSTM layer 0: input = [price, CLS]; W_ih^T split into price / CLS parts
        "wihp0": w((F_PRICE, 4 * H_LSTM), 0.1),
        "wihc0": w((D, 4 * H_LSTM), 0.1),
        "whh0": w((H_LSTM, 4 * H_LSTM), 0.1),
        "b0": jnp.zeros((1, 4 * H_LSTM), _F32),                    # b_ih0 + b_hh0
        # LSTM layer 1
        "wih1": w((H_LSTM, 4 * H_LSTM), 0.1),
        "whh1": w((H_LSTM, 4 * H_LSTM), 0.1),
        "b1": jnp.zeros((1, 4 * H_LSTM), _F32),                    # b_ih1 + b_hh1
        # FC head
        "fcw": w((H_LSTM, 1), 0.1),
        "fcb": jnp.zeros((1, 1), _F32),
    }
    return p


# --------------------------------- forward ------------------------------------
@jax.jit
def finbert_lsimf_forward(params, price, news_input_ids, news_attention_mask):
    # Embedding gathers (glue); the embedding LayerNorm runs inside the kernel.
    pos_ids = jnp.arange(S)
    emb = (params["word_emb"][news_input_ids]
           + params["pos_emb"][pos_ids][None, :, :]
           + params["type_emb"][0][None, None, :])
    emb = emb.reshape(B * S, D).astype(_F32)                       # (B*S, D)

    # additive attention-mask bias: 0 where attended, -1e9 where masked
    mask_bias = ((1.0 - news_attention_mask.astype(_F32)) * -1e9).reshape(B, 1, S)

    # time-major price for the in-kernel LSTM loop
    price_tm = jnp.transpose(price.astype(_F32), (1, 0, 2))        # (T, B, F_PRICE)

    args = (emb, mask_bias, params["emb_ln_g"], params["emb_ln_b"],
            params["wqkv"], params["bqkv"], params["wo"], params["bo"],
            params["ln1g"], params["ln1b"], params["wi"], params["bi"],
            params["wo2"], params["bo2"], params["ln2g"], params["ln2b"],
            price_tm,
            params["wihp0"], params["wihc0"], params["whh0"], params["b0"],
            params["wih1"], params["whh1"], params["b1"],
            params["fcw"], params["fcb"])

    out = pl.pallas_call(
        fused_forward_kernel,
        out_shape=jax.ShapeDtypeStruct((B, 1), _F32),
        grid=(1,),
        in_specs=[_full_spec(a.shape) for a in args],
        out_specs=_full_spec((B, 1)),
    )(*args)
    return jnp.squeeze(out, axis=-1)                               # (B,)


# ----------------------------------- main --------------------------------------
if __name__ == "__main__":
    params = init_params(seed=0)

    key = jax.random.PRNGKey(0)
    k_price, k_ids = jax.random.split(key)
    price = jax.random.normal(k_price, (B, T, F_PRICE), dtype=_F32)
    news_input_ids = jax.random.randint(k_ids, (B, S), 0, VOCAB, dtype=jnp.int32)
    news_attention_mask = jnp.ones((B, S), dtype=jnp.int32)

    out = finbert_lsimf_forward(params, price, news_input_ids, news_attention_mask)
    out = jax.block_until_ready(out)
    assert out.shape == (B,)
    print("KERNEL_OK")
</pallas_src>

<mosaic_0001>
module attributes {stable_mosaic.version = 11 : i64} {
  func.func @fused_forward_kernel(%arg0: i32, %arg1: memref<16x32xf32, #tpu.memory_space<vmem>>, %arg2: memref<2x1x8xf32, #tpu.memory_space<vmem>>, %arg3: memref<1x32xf32, #tpu.memory_space<vmem>>, %arg4: memref<1x32xf32, #tpu.memory_space<vmem>>, %arg5: memref<2x32x96xf32, #tpu.memory_space<vmem>>, %arg6: memref<2x1x96xf32, #tpu.memory_space<vmem>>, %arg7: memref<2x32x32xf32, #tpu.memory_space<vmem>>, %arg8: memref<2x1x32xf32, #tpu.memory_space<vmem>>, %arg9: memref<2x1x32xf32, #tpu.memory_space<vmem>>, %arg10: memref<2x1x32xf32, #tpu.memory_space<vmem>>, %arg11: memref<2x32x64xf32, #tpu.memory_space<vmem>>, %arg12: memref<2x1x64xf32, #tpu.memory_space<vmem>>, %arg13: memref<2x64x32xf32, #tpu.memory_space<vmem>>, %arg14: memref<2x1x32xf32, #tpu.memory_space<vmem>>, %arg15: memref<2x1x32xf32, #tpu.memory_space<vmem>>, %arg16: memref<2x1x32xf32, #tpu.memory_space<vmem>>, %arg17: memref<8x2x4xf32, #tpu.memory_space<vmem>>, %arg18: memref<4x64xf32, #tpu.memory_space<vmem>>, %arg19: memref<32x64xf32, #tpu.memory_space<vmem>>, %arg20: memref<16x64xf32, #tpu.memory_space<vmem>>, %arg21: memref<1x64xf32, #tpu.memory_space<vmem>>, %arg22: memref<16x64xf32, #tpu.memory_space<vmem>>, %arg23: memref<16x64xf32, #tpu.memory_space<vmem>>, %arg24: memref<1x64xf32, #tpu.memory_space<vmem>>, %arg25: memref<16x1xf32, #tpu.memory_space<vmem>>, %arg26: memref<1x1xf32, #tpu.memory_space<vmem>>, %arg27: memref<2x1xf32, #tpu.memory_space<vmem>>) attributes {dimension_semantics = [#tpu.dimension_semantics<arbitrary>], iteration_bounds = array<i64: 1>, scalar_prefetch = 0 : i64, scratch_operands = 0 : i64, tpu.core_type = #tpu.core_type<tc>, window_params = [{pipeline_mode = #tpu.pipeline_mode<synchronous>, transform_indices = @transform_0, window_bounds = array<i64: 16, 32>}, {pipeline_mode = #tpu.pipeline_mode<synchronous>, transform_indices = @transform_1, window_bounds = array<i64: 2, 1, 8>}, {pipeline_mode = #tpu.pipeline_mode<synchronous>, transform_indices = @transform_2, window_bounds = array<i64: 1, 32>}, {pipeline_mode = #tpu.pipeline_mode<synchronous>, transform_indices = @transform_3, window_bounds = array<i64: 1, 32>}, {pipeline_mode = #tpu.pipeline_mode<synchronous>, transform_indices = @transform_4, window_bounds = array<i64: 2, 32, 96>}, {pipeline_mode = #tpu.pipeline_mode<synchronous>, transform_indices = @transform_5, window_bounds = array<i64: 2, 1, 96>}, {pipeline_mode = #tpu.pipeline_mode<synchronous>, transform_indices = @transform_6, window_bounds = array<i64: 2, 32, 32>}, {pipeline_mode = #tpu.pipeline_mode<synchronous>, transform_indices = @transform_7, window_bounds = array<i64: 2, 1, 32>}, {pipeline_mode = #tpu.pipeline_mode<synchronous>, transform_indices = @transform_8, window_bounds = array<i64: 2, 1, 32>}, {pipeline_mode = #tpu.pipeline_mode<synchronous>, transform_indices = @transform_9, window_bounds = array<i64: 2, 1, 32>}, {pipeline_mode = #tpu.pipeline_mode<synchronous>, transform_indices = @transform_10, window_bounds = array<i64: 2, 32, 64>}, {pipeline_mode = #tpu.pipeline_mode<synchronous>, transform_indices = @transform_11, window_bounds = array<i64: 2, 1, 64>}, {pipeline_mode = #tpu.pipeline_mode<synchronous>, transform_indices = @transform_12, window_bounds = array<i64: 2, 64, 32>}, {pipeline_mode = #tpu.pipeline_mode<synchronous>, transform_indices = @transform_13, window_bounds = array<i64: 2, 1, 32>}, {pipeline_mode = #tpu.pipeline_mode<synchronous>, transform_indices = @transform_14, window_bounds = array<i64: 2, 1, 32>}, {pipeline_mode = #tpu.pipeline_mode<synchronous>, transform_indices = @transform_15, window_bounds = array<i64: 2, 1, 32>}, {pipeline_mode = #tpu.pipeline_mode<synchronous>, transform_indices = @transform_16, window_bounds = array<i64: 8, 2, 4>}, {pipeline_mode = #tpu.pipeline_mode<synchronous>, transform_indices = @transform_17, window_bounds = array<i64: 4, 64>}, {pipeline_mode = #tpu.pipeline_mode<synchronous>, transform_indices = @transform_18, window_bounds = array<i64: 32, 64>}, {pipeline_mode = #tpu.pipeline_mode<synchronous>, transform_indices = @transform_19, window_bounds = array<i64: 16, 64>}, {pipeline_mode = #tpu.pipeline_mode<synchronous>, transform_indices = @transform_20, window_bounds = array<i64: 1, 64>}, {pipeline_mode = #tpu.pipeline_mode<synchronous>, transform_indices = @transform_21, window_bounds = array<i64: 16, 64>}, {pipeline_mode = #tpu.pipeline_mode<synchronous>, transform_indices = @transform_22, window_bounds = array<i64: 16, 64>}, {pipeline_mode = #tpu.pipeline_mode<synchronous>, transform_indices = @transform_23, window_bounds = array<i64: 1, 64>}, {pipeline_mode = #tpu.pipeline_mode<synchronous>, transform_indices = @transform_24, window_bounds = array<i64: 16, 1>}, {pipeline_mode = #tpu.pipeline_mode<synchronous>, transform_indices = @transform_25, window_bounds = array<i64: 1, 1>}, {pipeline_mode = #tpu.pipeline_mode<synchronous>, transform_indices = @transform_26, window_bounds = array<i64: 2, 1>}]} {
    %c0 = arith.constant 0 : index
    %c0_0 = arith.constant 0 : index
    %0 = vector.load %arg1[%c0, %c0_0] : memref<16x32xf32, #tpu.memory_space<vmem>>, vector<16x32xf32>
    %c0_1 = arith.constant 0 : index
    %c0_2 = arith.constant 0 : index
    %1 = vector.load %arg3[%c0_1, %c0_2] : memref<1x32xf32, #tpu.memory_space<vmem>>, vector<1x32xf32>
    %c0_3 = arith.constant 0 : index
    %c0_4 = arith.constant 0 : index
    %2 = vector.load %arg4[%c0_3, %c0_4] : memref<1x32xf32, #tpu.memory_space<vmem>>, vector<1x32xf32>
    %cst = arith.constant dense<0.000000e+00> : vector<16xf32>
    %3 = vector.multi_reduction <add>, %0, %cst [1] : vector<16x32xf32> to vector<16xf32>
    %4 = vector.shape_cast %3 : vector<16xf32> to vector<16x1xf32>
    %cst_5 = arith.constant 3.200000e+01 : f32
    %5 = vector.broadcast %cst_5 : f32 to vector<16x1xf32>
    %6 = arith.divf %4, %5 : vector<16x1xf32>
    %7 = vector.broadcast %6 : vector<16x1xf32> to vector<16x32xf32>
    %8 = arith.subf %0, %7 : vector<16x32xf32>
    %9 = arith.mulf %8, %8 : vector<16x32xf32>
    %cst_6 = arith.constant dense<0.000000e+00> : vector<16xf32>
    %10 = vector.multi_reduction <add>, %9, %cst_6 [1] : vector<16x32xf32> to vector<16xf32>
    %11 = vector.shape_cast %10 : vector<16xf32> to vector<16x1xf32>
    %cst_7 = arith.constant 3.200000e+01 : f32
    %12 = vector.broadcast %cst_7 : f32 to vector<16x1xf32>
    %13 = arith.divf %11, %12 : vector<16x1xf32>
    %14 = vector.broadcast %6 : vector<16x1xf32> to vector<16x32xf32>
    %15 = arith.subf %0, %14 : vector<16x32xf32>
    %cst_8 = arith.constant 9.99999996E-13 : f32
    %16 = vector.broadcast %cst_8 : f32 to vector<16x1xf32>
    %17 = arith.addf %13, %16 : vector<16x1xf32>
    %18 = math.rsqrt %17 : vector<16x1xf32>
    %19 = vector.broadcast %18 : vector<16x1xf32> to vector<16x32xf32>
    %20 = arith.mulf %15, %19 : vector<16x32xf32>
    %21 = vector.broadcast %1 : vector<1x32xf32> to vector<16x32xf32>
    %22 = arith.mulf %20, %21 : vector<16x32xf32>
    %23 = vector.broadcast %2 : vector<1x32xf32> to vector<16x32xf32>
    %24 = arith.addf %22, %23 : vector<16x32xf32>
    %c0_9 = arith.constant 0 : index
    %c0_10 = arith.constant 0 : index
    %c0_11 = arith.constant 0 : index
    %25 = vector.load %arg2[%c0_9, %c0_10, %c0_11] : memref<2x1x8xf32, #tpu.memory_space<vmem>>, vector<2x1x8xf32>
    %c0_12 = arith.constant 0 : index
    %c0_13 = arith.constant 0 : index
    %c0_14 = arith.constant 0 : index
    %26 = vector.load %arg5[%c0_12, %c0_13, %c0_14] : memref<2x32x96xf32, #tpu.memory_space<vmem>>, vector<1x32x96xf32>
    %27 = vector.shape_cast %26 : vector<1x32x96xf32> to vector<32x96xf32>
    %28 = arith.truncf %24 : vector<16x32xf32> to vector<16x32xbf16>
    %29 = arith.truncf %27 : vector<32x96xf32> to vector<32x96xbf16>
    %cst_15 = arith.constant dense<0.000000e+00> : vector<16x96xf32>
    %30 = tpu.matmul %28, %29, %cst_15 {dimension_numbers = #tpu.dot_dimension_numbers<[1], [0], [0], [1], [0, 0, 1, 1], [], []>} : vector<16x32xbf16>, vector<32x96xbf16>, vector<16x96xf32> -> vector<16x96xf32>
    %c0_16 = arith.constant 0 : index
    %c0_17 = arith.constant 0 : index
    %c0_18 = arith.constant 0 : index
    %31 = vector.load %arg6[%c0_16, %c0_17, %c0_18] : memref<2x1x96xf32, #tpu.memory_space<vmem>>, vector<1x1x96xf32>
    %32 = vector.shape_cast %31 : vector<1x1x96xf32> to vector<1x96xf32>
    %33 = vector.broadcast %32 : vector<1x96xf32> to vector<16x96xf32>
    %34 = arith.addf %30, %33 : vector<16x96xf32>
    %35 = vector.extract_strided_slice %34 {offsets = [0, 0], sizes = [16, 32], strides = [1, 1]} : vector<16x96xf32> to vector<16x32xf32>
    %36 = vector.shape_cast %35 : vector<16x32xf32> to vector<2x8x32xf32>
    %37 = vector.extract_strided_slice %34 {offsets = [0, 32], sizes = [16, 32], strides = [1, 1]} : vector<16x96xf32> to vector<16x32xf32>
    %38 = vector.shape_cast %37 : vector<16x32xf32> to vector<2x8x32xf32>
    %39 = vector.extract_strided_slice %34 {offsets = [0, 64], sizes = [16, 32], strides = [1, 1]} : vector<16x96xf32> to vector<16x32xf32>
    %40 = vector.shape_cast %39 : vector<16x32xf32> to vector<2x8x32xf32>
    %c0_19 = arith.constant 0 : index
    %c0_20 = arith.constant 0 : index
    %c0_21 = arith.constant 0 : index
    %41 = vector.load %arg7[%c0_19, %c0_20, %c0_21] : memref<2x32x32xf32, #tpu.memory_space<vmem>>, vector<1x32x32xf32>
    %42 = vector.shape_cast %41 : vector<1x32x32xf32> to vector<32x32xf32>
    %cst_22 = arith.constant 0.000000e+00 : f32
    %43 = vector.broadcast %cst_22 : f32 to vector<16x32xf32>
    %44 = vector.extract_strided_slice %36 {offsets = [0, 0, 0], sizes = [2, 8, 16], strides = [1, 1, 1]} : vector<2x8x32xf32> to vector<2x8x16xf32>
    %45 = vector.extract_strided_slice %38 {offsets = [0, 0, 0], sizes = [2, 8, 16], strides = [1, 1, 1]} : vector<2x8x32xf32> to vector<2x8x16xf32>
    %46 = vector.extract_strided_slice %40 {offsets = [0, 0, 0], sizes = [2, 8, 16], strides = [1, 1, 1]} : vector<2x8x32xf32> to vector<2x8x16xf32>
    %47 = arith.truncf %44 : vector<2x8x16xf32> to vector<2x8x16xbf16>
    %48 = arith.truncf %45 : vector<2x8x16xf32> to vector<2x8x16xbf16>
    "tpu.trace_start"() <{level = 10 : i32, message = "bqd,bkd->bqk"}> : () -> ()
    %cst_23 = arith.constant dense<0.000000e+00> : vector<2x8x8xf32>
    %49 = tpu.matmul %47, %48, %cst_23 {dimension_numbers = #tpu.dot_dimension_numbers<[2], [2], [1], [1], [0, 0, 0, 1, 1, 1], [0], [0]>} : vector<2x8x16xbf16>, vector<2x8x16xbf16>, vector<2x8x8xf32> -> vector<2x8x8xf32>
    "tpu.trace_stop"() : () -> ()
    %cst_24 = arith.constant 2.500000e-01 : f32
    %50 = vector.broadcast %cst_24 : f32 to vector<2x8x8xf32>
    %51 = arith.mulf %49, %50 : vector<2x8x8xf32>
    %52 = vector.broadcast %25 : vector<2x1x8xf32> to vector<2x8x8xf32>
    %53 = arith.addf %51, %52 : vector<2x8x8xf32>
    %cst_25 = arith.constant dense<0xFF800000> : vector<2x8xf32>
    %54 = vector.multi_reduction <maximumf>, %53, %cst_25 [2] : vector<2x8x8xf32> to vector<2x8xf32>
    %55 = vector.shape_cast %54 : vector<2x8xf32> to vector<2x8x1xf32>
    %56 = vector.broadcast %55 : vector<2x8x1xf32> to vector<2x8x8xf32>
    %57 = arith.subf %53, %56 : vector<2x8x8xf32>
    %58 = math.exp %57 : vector<2x8x8xf32>
    %cst_26 = arith.constant dense<0.000000e+00> : vector<2x8xf32>
    %59 = vector.multi_reduction <add>, %58, %cst_26 [2] : vector<2x8x8xf32> to vector<2x8xf32>
    %60 = vector.shape_cast %59 : vector<2x8xf32> to vector<2x8x1xf32>
    %61 = vector.broadcast %60 : vector<2x8x1xf32> to vector<2x8x8xf32>
    %62 = arith.divf %58, %61 : vector<2x8x8xf32>
    %63 = arith.truncf %62 : vector<2x8x8xf32> to vector<2x8x8xbf16>
    %64 = arith.truncf %46 : vector<2x8x16xf32> to vector<2x8x16xbf16>
    "tpu.trace_start"() <{level = 10 : i32, message = "bqk,bkd->bqd"}> : () -> ()
    %cst_27 = arith.constant dense<0.000000e+00> : vector<2x8x16xf32>
    %65 = tpu.matmul %63, %64, %cst_27 {dimension_numbers = #tpu.dot_dimension_numbers<[2], [1], [1], [2], [0, 0, 0, 1, 1, 2], [0], [0]>} : vector<2x8x8xbf16>, vector<2x8x16xbf16>, vector<2x8x16xf32> -> vector<2x8x16xf32>
    "tpu.trace_stop"() : () -> ()
    %66 = vector.shape_cast %65 : vector<2x8x16xf32> to vector<16x16xf32>
    %67 = vector.extract_strided_slice %42 {offsets = [0, 0], sizes = [16, 32], strides = [1, 1]} : vector<32x32xf32> to vector<16x32xf32>
    %68 = arith.truncf %66 : vector<16x16xf32> to vector<16x16xbf16>
    %69 = arith.truncf %67 : vector<16x32xf32> to vector<16x32xbf16>
    %cst_28 = arith.constant dense<0.000000e+00> : vector<16x32xf32>
    %70 = tpu.matmul %68, %69, %cst_28 {dimension_numbers = #tpu.dot_dimension_numbers<[1], [0], [0], [1], [0, 0, 1, 1], [], []>} : vector<16x16xbf16>, vector<16x32xbf16>, vector<16x32xf32> -> vector<16x32xf32>
    %71 = arith.addf %43, %70 : vector<16x32xf32>
    %72 = vector.extract_strided_slice %36 {offsets = [0, 0, 16], sizes = [2, 8, 16], strides = [1, 1, 1]} : vector<2x8x32xf32> to vector<2x8x16xf32>
    %73 = vector.extract_strided_slice %38 {offsets = [0, 0, 16], sizes = [2, 8, 16], strides = [1, 1, 1]} : vector<2x8x32xf32> to vector<2x8x16xf32>
    %74 = vector.extract_strided_slice %40 {offsets = [0, 0, 16], sizes = [2, 8, 16], strides = [1, 1, 1]} : vector<2x8x32xf32> to vector<2x8x16xf32>
    %75 = arith.truncf %72 : vector<2x8x16xf32> to vector<2x8x16xbf16>
    %76 = arith.truncf %73 : vector<2x8x16xf32> to vector<2x8x16xbf16>
    "tpu.trace_start"() <{level = 10 : i32, message = "bqd,bkd->bqk"}> : () -> ()
    %cst_29 = arith.constant dense<0.000000e+00> : vector<2x8x8xf32>
    %77 = tpu.matmul %75, %76, %cst_29 {dimension_numbers = #tpu.dot_dimension_numbers<[2], [2], [1], [1], [0, 0, 0, 1, 1, 1], [0], [0]>} : vector<2x8x16xbf16>, vector<2x8x16xbf16>, vector<2x8x8xf32> -> vector<2x8x8xf32>
    "tpu.trace_stop"() : () -> ()
    %cst_30 = arith.constant 2.500000e-01 : f32
    %78 = vector.broadcast %cst_30 : f32 to vector<2x8x8xf32>
    %79 = arith.mulf %77, %78 : vector<2x8x8xf32>
    %80 = vector.broadcast %25 : vector<2x1x8xf32> to vector<2x8x8xf32>
    %81 = arith.addf %79, %80 : vector<2x8x8xf32>
    %cst_31 = arith.constant dense<0xFF800000> : vector<2x8xf32>
    %82 = vector.multi_reduction <maximumf>, %81, %cst_31 [2] : vector<2x8x8xf32> to vector<2x8xf32>
    %83 = vector.shape_cast %82 : vector<2x8xf32> to vector<2x8x1xf32>
    %84 = vector.broadcast %83 : vector<2x8x1xf32> to vector<2x8x8xf32>
    %85 = arith.subf %81, %84 : vector<2x8x8xf32>
    %86 = math.exp %85 : vector<2x8x8xf32>
    %cst_32 = arith.constant dense<0.000000e+00> : vector<2x8xf32>
    %87 = vector.multi_reduction <add>, %86, %cst_32 [2] : vector<2x8x8xf32> to vector<2x8xf32>
    %88 = vector.shape_cast %87 : vector<2x8xf32> to vector<2x8x1xf32>
    %89 = vector.broadcast %88 : vector<2x8x1xf32> to vector<2x8x8xf32>
    %90 = arith.divf %86, %89 : vector<2x8x8xf32>
    %91 = arith.truncf %90 : vector<2x8x8xf32> to vector<2x8x8xbf16>
    %92 = arith.truncf %74 : vector<2x8x16xf32> to vector<2x8x16xbf16>
    "tpu.trace_start"() <{level = 10 : i32, message = "bqk,bkd->bqd"}> : () -> ()
    %cst_33 = arith.constant dense<0.000000e+00> : vector<2x8x16xf32>
    %93 = tpu.matmul %91, %92, %cst_33 {dimension_numbers = #tpu.dot_dimension_numbers<[2], [1], [1], [2], [0, 0, 0, 1, 1, 2], [0], [0]>} : vector<2x8x8xbf16>, vector<2x8x16xbf16>, vector<2x8x16xf32> -> vector<2x8x16xf32>
    "tpu.trace_stop"() : () -> ()
    %94 = vector.shape_cast %93 : vector<2x8x16xf32> to vector<16x16xf32>
    %95 = vector.extract_strided_slice %42 {offsets = [16, 0], sizes = [16, 32], strides = [1, 1]} : vector<32x32xf32> to vector<16x32xf32>
    %96 = arith.truncf %94 : vector<16x16xf32> to vector<16x16xbf16>
    %97 = arith.truncf %95 : vector<16x32xf32> to vector<16x32xbf16>
    %cst_34 = arith.constant dense<0.000000e+00> : vector<16x32xf32>
    %98 = tpu.matmul %96, %97, %cst_34 {dimension_numbers = #tpu.dot_dimension_numbers<[1], [0], [0], [1], [0, 0, 1, 1], [], []>} : vector<16x16xbf16>, vector<16x32xbf16>, vector<16x32xf32> -> vector<16x32xf32>
    %99 = arith.addf %71, %98 : vector<16x32xf32>
    %c0_35 = arith.constant 0 : index
    %c0_36 = arith.constant 0 : index
    %c0_37 = arith.constant 0 : index
    %100 = vector.load %arg8[%c0_35, %c0_36, %c0_37] : memref<2x1x32xf32, #tpu.memory_space<vmem>>, vector<1x1x32xf32>
    %101 = vector.shape_cast %100 : vector<1x1x32xf32> to vector<1x32xf32>
    %102 = vector.broadcast %101 : vector<1x32xf32> to vector<16x32xf32>
    %103 = arith.addf %99, %102 : vector<16x32xf32>
    %104 = arith.addf %24, %103 : vector<16x32xf32>
    %c0_38 = arith.constant 0 : index
    %c0_39 = arith.constant 0 : index
    %c0_40 = arith.constant 0 : index
    %105 = vector.load %arg9[%c0_38, %c0_39, %c0_40] : memref<2x1x32xf32, #tpu.memory_space<vmem>>, vector<1x1x32xf32>
    %106 = vector.shape_cast %105 : vector<1x1x32xf32> to vector<1x32xf32>
    %c0_41 = arith.constant 0 : index
    %c0_42 = arith.constant 0 : index
    %c0_43 = arith.constant 0 : index
    %107 = vector.load %arg10[%c0_41, %c0_42, %c0_43] : memref<2x1x32xf32, #tpu.memory_space<vmem>>, vector<1x1x32xf32>
    %108 = vector.shape_cast %107 : vector<1x1x32xf32> to vector<1x32xf32>
    %cst_44 = arith.constant dense<0.000000e+00> : vector<16xf32>
    %109 = vector.multi_reduction <add>, %104, %cst_44 [1] : vector<16x32xf32> to vector<16xf32>
    %110 = vector.shape_cast %109 : vector<16xf32> to vector<16x1xf32>
    %cst_45 = arith.constant 3.200000e+01 : f32
    %111 = vector.broadcast %cst_45 : f32 to vector<16x1xf32>
    %112 = arith.divf %110, %111 : vector<16x1xf32>
    %113 = vector.broadcast %112 : vector<16x1xf32> to vector<16x32xf32>
    %114 = arith.subf %104, %113 : vector<16x32xf32>
    %115 = arith.mulf %114, %114 : vector<16x32xf32>
    %cst_46 = arith.constant dense<0.000000e+00> : vector<16xf32>
    %116 = vector.multi_reduction <add>, %115, %cst_46 [1] : vector<16x32xf32> to vector<16xf32>
    %117 = vector.shape_cast %116 : vector<16xf32> to vector<16x1xf32>
    %cst_47 = arith.constant 3.200000e+01 : f32
    %118 = vector.broadcast %cst_47 : f32 to vector<16x1xf32>
    %119 = arith.divf %117, %118 : vector<16x1xf32>
    %120 = vector.broadcast %112 : vector<16x1xf32> to vector<16x32xf32>
    %121 = arith.subf %104, %120 : vector<16x32xf32>
    %cst_48 = arith.constant 9.99999996E-13 : f32
    %122 = vector.broadcast %cst_48 : f32 to vector<16x1xf32>
    %123 = arith.addf %119, %122 : vector<16x1xf32>
    %124 = math.rsqrt %123 : vector<16x1xf32>
    %125 = vector.broadcast %124 : vector<16x1xf32> to vector<16x32xf32>
    %126 = arith.mulf %121, %125 : vector<16x32xf32>
    %127 = vector.broadcast %106 : vector<1x32xf32> to vector<16x32xf32>
    %128 = arith.mulf %126, %127 : vector<16x32xf32>
    %129 = vector.broadcast %108 : vector<1x32xf32> to vector<16x32xf32>
    %130 = arith.addf %128, %129 : vector<16x32xf32>
    %c0_49 = arith.constant 0 : index
    %c0_50 = arith.constant 0 : index
    %c0_51 = arith.constant 0 : index
    %131 = vector.load %arg11[%c0_49, %c0_50, %c0_51] : memref<2x32x64xf32, #tpu.memory_space<vmem>>, vector<1x32x64xf32>
    %132 = vector.shape_cast %131 : vector<1x32x64xf32> to vector<32x64xf32>
    %133 = arith.truncf %130 : vector<16x32xf32> to vector<16x32xbf16>
    %134 = arith.truncf %132 : vector<32x64xf32> to vector<32x64xbf16>
    %cst_52 = arith.constant dense<0.000000e+00> : vector<16x64xf32>
    %135 = tpu.matmul %133, %134, %cst_52 {dimension_numbers = #tpu.dot_dimension_numbers<[1], [0], [0], [1], [0, 0, 1, 1], [], []>} : vector<16x32xbf16>, vector<32x64xbf16>, vector<16x64xf32> -> vector<16x64xf32>
    %c0_53 = arith.constant 0 : index
    %c0_54 = arith.constant 0 : index
    %c0_55 = arith.constant 0 : index
    %136 = vector.load %arg12[%c0_53, %c0_54, %c0_55] : memref<2x1x64xf32, #tpu.memory_space<vmem>>, vector<1x1x64xf32>
    %137 = vector.shape_cast %136 : vector<1x1x64xf32> to vector<1x64xf32>
    %138 = vector.broadcast %137 : vector<1x64xf32> to vector<16x64xf32>
    %139 = arith.addf %135, %138 : vector<16x64xf32>
    %cst_56 = arith.constant 5.000000e-01 : f32
    %140 = vector.broadcast %cst_56 : f32 to vector<16x64xf32>
    %141 = arith.mulf %140, %139 : vector<16x64xf32>
    %cst_57 = arith.constant 4.471500e-02 : f32
    %142 = vector.broadcast %cst_57 : f32 to vector<16x64xf32>
    %143 = arith.mulf %142, %139 : vector<16x64xf32>
    %144 = arith.mulf %143, %139 : vector<16x64xf32>
    %145 = arith.mulf %144, %139 : vector<16x64xf32>
    %146 = arith.addf %139, %145 : vector<16x64xf32>
    %cst_58 = arith.constant 0.797884583 : f32
    %147 = vector.broadcast %cst_58 : f32 to vector<16x64xf32>
    %148 = arith.mulf %147, %146 : vector<16x64xf32>
    %149 = math.tanh %148 : vector<16x64xf32>
    %cst_59 = arith.constant 1.000000e+00 : f32
    %150 = vector.broadcast %cst_59 : f32 to vector<16x64xf32>
    %151 = arith.addf %150, %149 : vector<16x64xf32>
    %152 = arith.mulf %141, %151 : vector<16x64xf32>
    %c0_60 = arith.constant 0 : index
    %c0_61 = arith.constant 0 : index
    %c0_62 = arith.constant 0 : index
    %153 = vector.load %arg13[%c0_60, %c0_61, %c0_62] : memref<2x64x32xf32, #tpu.memory_space<vmem>>, vector<1x64x32xf32>
    %154 = vector.shape_cast %153 : vector<1x64x32xf32> to vector<64x32xf32>
    %155 = arith.truncf %152 : vector<16x64xf32> to vector<16x64xbf16>
    %156 = arith.truncf %154 : vector<64x32xf32> to vector<64x32xbf16>
    %cst_63 = arith.constant dense<0.000000e+00> : vector<16x32xf32>
    %157 = tpu.matmul %155, %156, %cst_63 {dimension_numbers = #tpu.dot_dimension_numbers<[1], [0], [0], [1], [0, 0, 1, 1], [], []>} : vector<16x64xbf16>, vector<64x32xbf16>, vector<16x32xf32> -> vector<16x32xf32>
    %c0_64 = arith.constant 0 : index
    %c0_65 = arith.constant 0 : index
    %c0_66 = arith.constant 0 : index
    %158 = vector.load %arg14[%c0_64, %c0_65, %c0_66] : memref<2x1x32xf32, #tpu.memory_space<vmem>>, vector<1x1x32xf32>
    %159 = vector.shape_cast %158 : vector<1x1x32xf32> to vector<1x32xf32>
    %160 = vector.broadcast %159 : vector<1x32xf32> to vector<16x32xf32>
    %161 = arith.addf %157, %160 : vector<16x32xf32>
    %162 = arith.addf %130, %161 : vector<16x32xf32>
    %c0_67 = arith.constant 0 : index
    %c0_68 = arith.constant 0 : index
    %c0_69 = arith.constant 0 : index
    %163 = vector.load %arg15[%c0_67, %c0_68, %c0_69] : memref<2x1x32xf32, #tpu.memory_space<vmem>>, vector<1x1x32xf32>
    %164 = vector.shape_cast %163 : vector<1x1x32xf32> to vector<1x32xf32>
    %c0_70 = arith.constant 0 : index
    %c0_71 = arith.constant 0 : index
    %c0_72 = arith.constant 0 : index
    %165 = vector.load %arg16[%c0_70, %c0_71, %c0_72] : memref<2x1x32xf32, #tpu.memory_space<vmem>>, vector<1x1x32xf32>
    %166 = vector.shape_cast %165 : vector<1x1x32xf32> to vector<1x32xf32>
    %cst_73 = arith.constant dense<0.000000e+00> : vector<16xf32>
    %167 = vector.multi_reduction <add>, %162, %cst_73 [1] : vector<16x32xf32> to vector<16xf32>
    %168 = vector.shape_cast %167 : vector<16xf32> to vector<16x1xf32>
    %cst_74 = arith.constant 3.200000e+01 : f32
    %169 = vector.broadcast %cst_74 : f32 to vector<16x1xf32>
    %170 = arith.divf %168, %169 : vector<16x1xf32>
    %171 = vector.broadcast %170 : vector<16x1xf32> to vector<16x32xf32>
    %172 = arith.subf %162, %171 : vector<16x32xf32>
    %173 = arith.mulf %172, %172 : vector<16x32xf32>
    %cst_75 = arith.constant dense<0.000000e+00> : vector<16xf32>
    %174 = vector.multi_reduction <add>, %173, %cst_75 [1] : vector<16x32xf32> to vector<16xf32>
    %175 = vector.shape_cast %174 : vector<16xf32> to vector<16x1xf32>
    %cst_76 = arith.constant 3.200000e+01 : f32
    %176 = vector.broadcast %cst_76 : f32 to vector<16x1xf32>
    %177 = arith.divf %175, %176 : vector<16x1xf32>
    %178 = vector.broadcast %170 : vector<16x1xf32> to vector<16x32xf32>
    %179 = arith.subf %162, %178 : vector<16x32xf32>
    %cst_77 = arith.constant 9.99999996E-13 : f32
    %180 = vector.broadcast %cst_77 : f32 to vector<16x1xf32>
    %181 = arith.addf %177, %180 : vector<16x1xf32>
    %182 = math.rsqrt %181 : vector<16x1xf32>
    %183 = vector.broadcast %182 : vector<16x1xf32> to vector<16x32xf32>
    %184 = arith.mulf %179, %183 : vector<16x32xf32>
    %185 = vector.broadcast %164 : vector<1x32xf32> to vector<16x32xf32>
    %186 = arith.mulf %184, %185 : vector<16x32xf32>
    %187 = vector.broadcast %166 : vector<1x32xf32> to vector<16x32xf32>
    %188 = arith.addf %186, %187 : vector<16x32xf32>
    %c1 = arith.constant 1 : index
    %c0_78 = arith.constant 0 : index
    %c0_79 = arith.constant 0 : index
    %189 = vector.load %arg5[%c1, %c0_78, %c0_79] : memref<2x32x96xf32, #tpu.memory_space<vmem>>, vector<1x32x96xf32>
    %190 = vector.shape_cast %189 : vector<1x32x96xf32> to vector<32x96xf32>
    %191 = arith.truncf %188 : vector<16x32xf32> to vector<16x32xbf16>
    %192 = arith.truncf %190 : vector<32x96xf32> to vector<32x96xbf16>
    %cst_80 = arith.constant dense<0.000000e+00> : vector<16x96xf32>
    %193 = tpu.matmul %191, %192, %cst_80 {dimension_numbers = #tpu.dot_dimension_numbers<[1], [0], [0], [1], [0, 0, 1, 1], [], []>} : vector<16x32xbf16>, vector<32x96xbf16>, vector<16x96xf32> -> vector<16x96xf32>
    %c1_81 = arith.constant 1 : index
    %c0_82 = arith.constant 0 : index
    %c0_83 = arith.constant 0 : index
    %194 = vector.load %arg6[%c1_81, %c0_82, %c0_83] : memref<2x1x96xf32, #tpu.memory_space<vmem>>, vector<1x1x96xf32>
    %195 = vector.shape_cast %194 : vector<1x1x96xf32> to vector<1x96xf32>
    %196 = vector.broadcast %195 : vector<1x96xf32> to vector<16x96xf32>
    %197 = arith.addf %193, %196 : vector<16x96xf32>
    %198 = vector.extract_strided_slice %197 {offsets = [0, 0], sizes = [16, 32], strides = [1, 1]} : vector<16x96xf32> to vector<16x32xf32>
    %199 = vector.shape_cast %198 : vector<16x32xf32> to vector<2x8x32xf32>
    %200 = vector.extract_strided_slice %197 {offsets = [0, 32], sizes = [16, 32], strides = [1, 1]} : vector<16x96xf32> to vector<16x32xf32>
    %201 = vector.shape_cast %200 : vector<16x32xf32> to vector<2x8x32xf32>
    %202 = vector.extract_strided_slice %197 {offsets = [0, 64], sizes = [16, 32], strides = [1, 1]} : vector<16x96xf32> to vector<16x32xf32>
    %203 = vector.shape_cast %202 : vector<16x32xf32> to vector<2x8x32xf32>
    %c1_84 = arith.constant 1 : index
    %c0_85 = arith.constant 0 : index
    %c0_86 = arith.constant 0 : index
    %204 = vector.load %arg7[%c1_84, %c0_85, %c0_86] : memref<2x32x32xf32, #tpu.memory_space<vmem>>, vector<1x32x32xf32>
    %205 = vector.shape_cast %204 : vector<1x32x32xf32> to vector<32x32xf32>
    %cst_87 = arith.constant 0.000000e+00 : f32
    %206 = vector.broadcast %cst_87 : f32 to vector<16x32xf32>
    %207 = vector.extract_strided_slice %199 {offsets = [0, 0, 0], sizes = [2, 8, 16], strides = [1, 1, 1]} : vector<2x8x32xf32> to vector<2x8x16xf32>
    %208 = vector.extract_strided_slice %201 {offsets = [0, 0, 0], sizes = [2, 8, 16], strides = [1, 1, 1]} : vector<2x8x32xf32> to vector<2x8x16xf32>
    %209 = vector.extract_strided_slice %203 {offsets = [0, 0, 0], sizes = [2, 8, 16], strides = [1, 1, 1]} : vector<2x8x32xf32> to vector<2x8x16xf32>
    %210 = arith.truncf %207 : vector<2x8x16xf32> to vector<2x8x16xbf16>
    %211 = arith.truncf %208 : vector<2x8x16xf32> to vector<2x8x16xbf16>
    "tpu.trace_start"() <{level = 10 : i32, message = "bqd,bkd->bqk"}> : () -> ()
    %cst_88 = arith.constant dense<0.000000e+00> : vector<2x8x8xf32>
    %212 = tpu.matmul %210, %211, %cst_88 {dimension_numbers = #tpu.dot_dimension_numbers<[2], [2], [1], [1], [0, 0, 0, 1, 1, 1], [0], [0]>} : vector<2x8x16xbf16>, vector<2x8x16xbf16>, vector<2x8x8xf32> -> vector<2x8x8xf32>
    "tpu.trace_stop"() : () -> ()
    %cst_89 = arith.constant 2.500000e-01 : f32
    %213 = vector.broadcast %cst_89 : f32 to vector<2x8x8xf32>
    %214 = arith.mulf %212, %213 : vector<2x8x8xf32>
    %215 = vector.broadcast %25 : vector<2x1x8xf32> to vector<2x8x8xf32>
    %216 = arith.addf %214, %215 : vector<2x8x8xf32>
    %cst_90 = arith.constant dense<0xFF800000> : vector<2x8xf32>
    %217 = vector.multi_reduction <maximumf>, %216, %cst_90 [2] : vector<2x8x8xf32> to vector<2x8xf32>
    %218 = vector.shape_cast %217 : vector<2x8xf32> to vector<2x8x1xf32>
    %219 = vector.broadcast %218 : vector<2x8x1xf32> to vector<2x8x8xf32>
    %220 = arith.subf %216, %219 : vector<2x8x8xf32>
    %221 = math.exp %220 : vector<2x8x8xf32>
    %cst_91 = arith.constant dense<0.000000e+00> : vector<2x8xf32>
    %222 = vector.multi_reduction <add>, %221, %cst_91 [2] : vector<2x8x8xf32> to vector<2x8xf32>
    %223 = vector.shape_cast %222 : vector<2x8xf32> to vector<2x8x1xf32>
    %224 = vector.broadcast %223 : vector<2x8x1xf32> to vector<2x8x8xf32>
    %225 = arith.divf %221, %224 : vector<2x8x8xf32>
    %226 = arith.truncf %225 : vector<2x8x8xf32> to vector<2x8x8xbf16>
    %227 = arith.truncf %209 : vector<2x8x16xf32> to vector<2x8x16xbf16>
    "tpu.trace_start"() <{level = 10 : i32, message = "bqk,bkd->bqd"}> : () -> ()
    %cst_92 = arith.constant dense<0.000000e+00> : vector<2x8x16xf32>
    %228 = tpu.matmul %226, %227, %cst_92 {dimension_numbers = #tpu.dot_dimension_numbers<[2], [1], [1], [2], [0, 0, 0, 1, 1, 2], [0], [0]>} : vector<2x8x8xbf16>, vector<2x8x16xbf16>, vector<2x8x16xf32> -> vector<2x8x16xf32>
    "tpu.trace_stop"() : () -> ()
    %229 = vector.shape_cast %228 : vector<2x8x16xf32> to vector<16x16xf32>
    %230 = vector.extract_strided_slice %205 {offsets = [0, 0], sizes = [16, 32], strides = [1, 1]} : vector<32x32xf32> to vector<16x32xf32>
    %231 = arith.truncf %229 : vector<16x16xf32> to vector<16x16xbf16>
    %232 = arith.truncf %230 : vector<16x32xf32> to vector<16x32xbf16>
    %cst_93 = arith.constant dense<0.000000e+00> : vector<16x32xf32>
    %233 = tpu.matmul %231, %232, %cst_93 {dimension_numbers = #tpu.dot_dimension_numbers<[1], [0], [0], [1], [0, 0, 1, 1], [], []>} : vector<16x16xbf16>, vector<16x32xbf16>, vector<16x32xf32> -> vector<16x32xf32>
    %234 = arith.addf %206, %233 : vector<16x32xf32>
    %235 = vector.extract_strided_slice %199 {offsets = [0, 0, 16], sizes = [2, 8, 16], strides = [1, 1, 1]} : vector<2x8x32xf32> to vector<2x8x16xf32>
    %236 = vector.extract_strided_slice %201 {offsets = [0, 0, 16], sizes = [2, 8, 16], strides = [1, 1, 1]} : vector<2x8x32xf32> to vector<2x8x16xf32>
    %237 = vector.extract_strided_slice %203 {offsets = [0, 0, 16], sizes = [2, 8, 16], strides = [1, 1, 1]} : vector<2x8x32xf32> to vector<2x8x16xf32>
    %238 = arith.truncf %235 : vector<2x8x16xf32> to vector<2x8x16xbf16>
    %239 = arith.truncf %236 : vector<2x8x16xf32> to vector<2x8x16xbf16>
    "tpu.trace_start"() <{level = 10 : i32, message = "bqd,bkd->bqk"}> : () -> ()
    %cst_94 = arith.constant dense<0.000000e+00> : vector<2x8x8xf32>
    %240 = tpu.matmul %238, %239, %cst_94 {dimension_numbers = #tpu.dot_dimension_numbers<[2], [2], [1], [1], [0, 0, 0, 1, 1, 1], [0], [0]>} : vector<2x8x16xbf16>, vector<2x8x16xbf16>, vector<2x8x8xf32> -> vector<2x8x8xf32>
    "tpu.trace_stop"() : () -> ()
    %cst_95 = arith.constant 2.500000e-01 : f32
    %241 = vector.broadcast %cst_95 : f32 to vector<2x8x8xf32>
    %242 = arith.mulf %240, %241 : vector<2x8x8xf32>
    %243 = vector.broadcast %25 : vector<2x1x8xf32> to vector<2x8x8xf32>
    %244 = arith.addf %242, %243 : vector<2x8x8xf32>
    %cst_96 = arith.constant dense<0xFF800000> : vector<2x8xf32>
    %245 = vector.multi_reduction <maximumf>, %244, %cst_96 [2] : vector<2x8x8xf32> to vector<2x8xf32>
    %246 = vector.shape_cast %245 : vector<2x8xf32> to vector<2x8x1xf32>
    %247 = vector.broadcast %246 : vector<2x8x1xf32> to vector<2x8x8xf32>
    %248 = arith.subf %244, %247 : vector<2x8x8xf32>
    %249 = math.exp %248 : vector<2x8x8xf32>
    %cst_97 = arith.constant dense<0.000000e+00> : vector<2x8xf32>
    %250 = vector.multi_reduction <add>, %249, %cst_97 [2] : vector<2x8x8xf32> to vector<2x8xf32>
    %251 = vector.shape_cast %250 : vector<2x8xf32> to vector<2x8x1xf32>
    %252 = vector.broadcast %251 : vector<2x8x1xf32> to vector<2x8x8xf32>
    %253 = arith.divf %249, %252 : vector<2x8x8xf32>
    %254 = arith.truncf %253 : vector<2x8x8xf32> to vector<2x8x8xbf16>
    %255 = arith.truncf %237 : vector<2x8x16xf32> to vector<2x8x16xbf16>
    "tpu.trace_start"() <{level = 10 : i32, message = "bqk,bkd->bqd"}> : () -> ()
    %cst_98 = arith.constant dense<0.000000e+00> : vector<2x8x16xf32>
    %256 = tpu.matmul %254, %255, %cst_98 {dimension_numbers = #tpu.dot_dimension_numbers<[2], [1], [1], [2], [0, 0, 0, 1, 1, 2], [0], [0]>} : vector<2x8x8xbf16>, vector<2x8x16xbf16>, vector<2x8x16xf32> -> vector<2x8x16xf32>
    "tpu.trace_stop"() : () -> ()
    %257 = vector.shape_cast %256 : vector<2x8x16xf32> to vector<16x16xf32>
    %258 = vector.extract_strided_slice %205 {offsets = [16, 0], sizes = [16, 32], strides = [1, 1]} : vector<32x32xf32> to vector<16x32xf32>
    %259 = arith.truncf %257 : vector<16x16xf32> to vector<16x16xbf16>
    %260 = arith.truncf %258 : vector<16x32xf32> to vector<16x32xbf16>
    %cst_99 = arith.constant dense<0.000000e+00> : vector<16x32xf32>
    %261 = tpu.matmul %259, %260, %cst_99 {dimension_numbers = #tpu.dot_dimension_numbers<[1], [0], [0], [1], [0, 0, 1, 1], [], []>} : vector<16x16xbf16>, vector<16x32xbf16>, vector<16x32xf32> -> vector<16x32xf32>
    %262 = arith.addf %234, %261 : vector<16x32xf32>
    %c1_100 = arith.constant 1 : index
    %c0_101 = arith.constant 0 : index
    %c0_102 = arith.constant 0 : index
    %263 = vector.load %arg8[%c1_100, %c0_101, %c0_102] : memref<2x1x32xf32, #tpu.memory_space<vmem>>, vector<1x1x32xf32>
    %264 = vector.shape_cast %263 : vector<1x1x32xf32> to vector<1x32xf32>
    %265 = vector.broadcast %264 : vector<1x32xf32> to vector<16x32xf32>
    %266 = arith.addf %262, %265 : vector<16x32xf32>
    %267 = arith.addf %188, %266 : vector<16x32xf32>
    %c1_103 = arith.constant 1 : index
    %c0_104 = arith.constant 0 : index
    %c0_105 = arith.constant 0 : index
    %268 = vector.load %arg9[%c1_103, %c0_104, %c0_105] : memref<2x1x32xf32, #tpu.memory_space<vmem>>, vector<1x1x32xf32>
    %269 = vector.shape_cast %268 : vector<1x1x32xf32> to vector<1x32xf32>
    %c1_106 = arith.constant 1 : index
    %c0_107 = arith.constant 0 : index
    %c0_108 = arith.constant 0 : index
    %270 = vector.load %arg10[%c1_106, %c0_107, %c0_108] : memref<2x1x32xf32, #tpu.memory_space<vmem>>, vector<1x1x32xf32>
    %271 = vector.shape_cast %270 : vector<1x1x32xf32> to vector<1x32xf32>
    %cst_109 = arith.constant dense<0.000000e+00> : vector<16xf32>
    %272 = vector.multi_reduction <add>, %267, %cst_109 [1] : vector<16x32xf32> to vector<16xf32>
    %273 = vector.shape_cast %272 : vector<16xf32> to vector<16x1xf32>
    %cst_110 = arith.constant 3.200000e+01 : f32
    %274 = vector.broadcast %cst_110 : f32 to vector<16x1xf32>
    %275 = arith.divf %273, %274 : vector<16x1xf32>
    %276 = vector.broadcast %275 : vector<16x1xf32> to vector<16x32xf32>
    %277 = arith.subf %267, %276 : vector<16x32xf32>
    %278 = arith.mulf %277, %277 : vector<16x32xf32>
    %cst_111 = arith.constant dense<0.000000e+00> : vector<16xf32>
    %279 = vector.multi_reduction <add>, %278, %cst_111 [1] : vector<16x32xf32> to vector<16xf32>
    %280 = vector.shape_cast %279 : vector<16xf32> to vector<16x1xf32>
    %cst_112 = arith.constant 3.200000e+01 : f32
    %281 = vector.broadcast %cst_112 : f32 to vector<16x1xf32>
    %282 = arith.divf %280, %281 : vector<16x1xf32>
    %283 = vector.broadcast %275 : vector<16x1xf32> to vector<16x32xf32>
    %284 = arith.subf %267, %283 : vector<16x32xf32>
    %cst_113 = arith.constant 9.99999996E-13 : f32
    %285 = vector.broadcast %cst_113 : f32 to vector<16x1xf32>
    %286 = arith.addf %282, %285 : vector<16x1xf32>
    %287 = math.rsqrt %286 : vector<16x1xf32>
    %288 = vector.broadcast %287 : vector<16x1xf32> to vector<16x32xf32>
    %289 = arith.mulf %284, %288 : vector<16x32xf32>
    %290 = vector.broadcast %269 : vector<1x32xf32> to vector<16x32xf32>
    %291 = arith.mulf %289, %290 : vector<16x32xf32>
    %292 = vector.broadcast %271 : vector<1x32xf32> to vector<16x32xf32>
    %293 = arith.addf %291, %292 : vector<16x32xf32>
    %c1_114 = arith.constant 1 : index
    %c0_115 = arith.constant 0 : index
    %c0_116 = arith.constant 0 : index
    %294 = vector.load %arg11[%c1_114, %c0_115, %c0_116] : memref<2x32x64xf32, #tpu.memory_space<vmem>>, vector<1x32x64xf32>
    %295 = vector.shape_cast %294 : vector<1x32x64xf32> to vector<32x64xf32>
    %296 = arith.truncf %293 : vector<16x32xf32> to vector<16x32xbf16>
    %297 = arith.truncf %295 : vector<32x64xf32> to vector<32x64xbf16>
    %cst_117 = arith.constant dense<0.000000e+00> : vector<16x64xf32>
    %298 = tpu.matmul %296, %297, %cst_117 {dimension_numbers = #tpu.dot_dimension_numbers<[1], [0], [0], [1], [0, 0, 1, 1], [], []>} : vector<16x32xbf16>, vector<32x64xbf16>, vector<16x64xf32> -> vector<16x64xf32>
    %c1_118 = arith.constant 1 : index
    %c0_119 = arith.constant 0 : index
    %c0_120 = arith.constant 0 : index
    %299 = vector.load %arg12[%c1_118, %c0_119, %c0_120] : memref<2x1x64xf32, #tpu.memory_space<vmem>>, vector<1x1x64xf32>
    %300 = vector.shape_cast %299 : vector<1x1x64xf32> to vector<1x64xf32>
    %301 = vector.broadcast %300 : vector<1x64xf32> to vector<16x64xf32>
    %302 = arith.addf %298, %301 : vector<16x64xf32>
    %cst_121 = arith.constant 5.000000e-01 : f32
    %303 = vector.broadcast %cst_121 : f32 to vector<16x64xf32>
    %304 = arith.mulf %303, %302 : vector<16x64xf32>
    %cst_122 = arith.constant 4.471500e-02 : f32
    %305 = vector.broadcast %cst_122 : f32 to vector<16x64xf32>
    %306 = arith.mulf %305, %302 : vector<16x64xf32>
    %307 = arith.mulf %306, %302 : vector<16x64xf32>
    %308 = arith.mulf %307, %302 : vector<16x64xf32>
    %309 = arith.addf %302, %308 : vector<16x64xf32>
    %cst_123 = arith.constant 0.797884583 : f32
    %310 = vector.broadcast %cst_123 : f32 to vector<16x64xf32>
    %311 = arith.mulf %310, %309 : vector<16x64xf32>
    %312 = math.tanh %311 : vector<16x64xf32>
    %cst_124 = arith.constant 1.000000e+00 : f32
    %313 = vector.broadcast %cst_124 : f32 to vector<16x64xf32>
    %314 = arith.addf %313, %312 : vector<16x64xf32>
    %315 = arith.mulf %304, %314 : vector<16x64xf32>
    %c1_125 = arith.constant 1 : index
    %c0_126 = arith.constant 0 : index
    %c0_127 = arith.constant 0 : index
    %316 = vector.load %arg13[%c1_125, %c0_126, %c0_127] : memref<2x64x32xf32, #tpu.memory_space<vmem>>, vector<1x64x32xf32>
    %317 = vector.shape_cast %316 : vector<1x64x32xf32> to vector<64x32xf32>
    %318 = arith.truncf %315 : vector<16x64xf32> to vector<16x64xbf16>
    %319 = arith.truncf %317 : vector<64x32xf32> to vector<64x32xbf16>
    %cst_128 = arith.constant dense<0.000000e+00> : vector<16x32xf32>
    %320 = tpu.matmul %318, %319, %cst_128 {dimension_numbers = #tpu.dot_dimension_numbers<[1], [0], [0], [1], [0, 0, 1, 1], [], []>} : vector<16x64xbf16>, vector<64x32xbf16>, vector<16x32xf32> -> vector<16x32xf32>
    %c1_129 = arith.constant 1 : index
    %c0_130 = arith.constant 0 : index
    %c0_131 = arith.constant 0 : index
    %321 = vector.load %arg14[%c1_129, %c0_130, %c0_131] : memref<2x1x32xf32, #tpu.memory_space<vmem>>, vector<1x1x32xf32>
    %322 = vector.shape_cast %321 : vector<1x1x32xf32> to vector<1x32xf32>
    %323 = vector.broadcast %322 : vector<1x32xf32> to vector<16x32xf32>
    %324 = arith.addf %320, %323 : vector<16x32xf32>
    %325 = arith.addf %293, %324 : vector<16x32xf32>
    %c1_132 = arith.constant 1 : index
    %c0_133 = arith.constant 0 : index
    %c0_134 = arith.constant 0 : index
    %326 = vector.load %arg15[%c1_132, %c0_133, %c0_134] : memref<2x1x32xf32, #tpu.memory_space<vmem>>, vector<1x1x32xf32>
    %327 = vector.shape_cast %326 : vector<1x1x32xf32> to vector<1x32xf32>
    %c1_135 = arith.constant 1 : index
    %c0_136 = arith.constant 0 : index
    %c0_137 = arith.constant 0 : index
    %328 = vector.load %arg16[%c1_135, %c0_136, %c0_137] : memref<2x1x32xf32, #tpu.memory_space<vmem>>, vector<1x1x32xf32>
    %329 = vector.shape_cast %328 : vector<1x1x32xf32> to vector<1x32xf32>
    %cst_138 = arith.constant dense<0.000000e+00> : vector<16xf32>
    %330 = vector.multi_reduction <add>, %325, %cst_138 [1] : vector<16x32xf32> to vector<16xf32>
    %331 = vector.shape_cast %330 : vector<16xf32> to vector<16x1xf32>
    %cst_139 = arith.constant 3.200000e+01 : f32
    %332 = vector.broadcast %cst_139 : f32 to vector<16x1xf32>
    %333 = arith.divf %331, %332 : vector<16x1xf32>
    %334 = vector.broadcast %333 : vector<16x1xf32> to vector<16x32xf32>
    %335 = arith.subf %325, %334 : vector<16x32xf32>
    %336 = arith.mulf %335, %335 : vector<16x32xf32>
    %cst_140 = arith.constant dense<0.000000e+00> : vector<16xf32>
    %337 = vector.multi_reduction <add>, %336, %cst_140 [1] : vector<16x32xf32> to vector<16xf32>
    %338 = vector.shape_cast %337 : vector<16xf32> to vector<16x1xf32>
    %cst_141 = arith.constant 3.200000e+01 : f32
    %339 = vector.broadcast %cst_141 : f32 to vector<16x1xf32>
    %340 = arith.divf %338, %339 : vector<16x1xf32>
    %341 = vector.broadcast %333 : vector<16x1xf32> to vector<16x32xf32>
    %342 = arith.subf %325, %341 : vector<16x32xf32>
    %cst_142 = arith.constant 9.99999996E-13 : f32
    %343 = vector.broadcast %cst_142 : f32 to vector<16x1xf32>
    %344 = arith.addf %340, %343 : vector<16x1xf32>
    %345 = math.rsqrt %344 : vector<16x1xf32>
    %346 = vector.broadcast %345 : vector<16x1xf32> to vector<16x32xf32>
    %347 = arith.mulf %342, %346 : vector<16x32xf32>
    %348 = vector.broadcast %327 : vector<1x32xf32> to vector<16x32xf32>
    %349 = arith.mulf %347, %348 : vector<16x32xf32>
    %350 = vector.broadcast %329 : vector<1x32xf32> to vector<16x32xf32>
    %351 = arith.addf %349, %350 : vector<16x32xf32>
    %352 = vector.extract_strided_slice %351 {offsets = [0, 0], sizes = [1, 32], strides = [1, 1]} : vector<16x32xf32> to vector<1x32xf32>
    %353 = vector.extract_strided_slice %351 {offsets = [8, 0], sizes = [1, 32], strides = [1, 1]} : vector<16x32xf32> to vector<1x32xf32>
    %354 = tpu.concatenate %352, %353 in 0 : vector<1x32xf32>, vector<1x32xf32> -> vector<2x32xf32>
    %c0_143 = arith.constant 0 : index
    %c0_144 = arith.constant 0 : index
    %355 = vector.load %arg19[%c0_143, %c0_144] : memref<32x64xf32, #tpu.memory_space<vmem>>, vector<32x64xf32>
    %356 = arith.truncf %354 : vector<2x32xf32> to vector<2x32xbf16>
    %357 = arith.truncf %355 : vector<32x64xf32> to vector<32x64xbf16>
    %cst_145 = arith.constant dense<0.000000e+00> : vector<2x64xf32>
    %358 = tpu.matmul %356, %357, %cst_145 {dimension_numbers = #tpu.dot_dimension_numbers<[1], [0], [0], [1], [0, 0, 1, 1], [], []>} : vector<2x32xbf16>, vector<32x64xbf16>, vector<2x64xf32> -> vector<2x64xf32>
    %c0_146 = arith.constant 0 : index
    %c0_147 = arith.constant 0 : index
    %359 = vector.load %arg21[%c0_146, %c0_147] : memref<1x64xf32, #tpu.memory_space<vmem>>, vector<1x64xf32>
    %360 = vector.broadcast %359 : vector<1x64xf32> to vector<2x64xf32>
    %361 = arith.addf %358, %360 : vector<2x64xf32>
    %c0_148 = arith.constant 0 : index
    %c0_149 = arith.constant 0 : index
    %362 = vector.load %arg18[%c0_148, %c0_149] : memref<4x64xf32, #tpu.memory_space<vmem>>, vector<4x64xf32>
    %363 = arith.truncf %362 : vector<4x64xf32> to vector<4x64xbf16>
    %c0_150 = arith.constant 0 : index
    %c0_151 = arith.constant 0 : index
    %364 = vector.load %arg20[%c0_150, %c0_151] : memref<16x64xf32, #tpu.memory_space<vmem>>, vector<16x64xf32>
    %365 = arith.truncf %364 : vector<16x64xf32> to vector<16x64xbf16>
    %c0_152 = arith.constant 0 : index
    %c0_153 = arith.constant 0 : index
    %366 = vector.load %arg22[%c0_152, %c0_153] : memref<16x64xf32, #tpu.memory_space<vmem>>, vector<16x64xf32>
    %367 = arith.truncf %366 : vector<16x64xf32> to vector<16x64xbf16>
    %c0_154 = arith.constant 0 : index
    %c0_155 = arith.constant 0 : index
    %368 = vector.load %arg23[%c0_154, %c0_155] : memref<16x64xf32, #tpu.memory_space<vmem>>, vector<16x64xf32>
    %369 = arith.truncf %368 : vector<16x64xf32> to vector<16x64xbf16>
    %c0_156 = arith.constant 0 : index
    %c0_157 = arith.constant 0 : index
    %370 = vector.load %arg24[%c0_156, %c0_157] : memref<1x64xf32, #tpu.memory_space<vmem>>, vector<1x64xf32>
    %cst_158 = arith.constant 0.000000e+00 : f32
    %371 = vector.broadcast %cst_158 : f32 to vector<2x16xf32>
    %c0_i32 = arith.constant 0 : i32
    %372 = arith.index_cast %c0_i32 : i32 to index
    %c0_159 = arith.constant 0 : index
    %c0_160 = arith.constant 0 : index
    %373 = vector.load %arg17[%372, %c0_159, %c0_160] : memref<8x2x4xf32, #tpu.memory_space<vmem>>, vector<1x2x4xf32>
    %374 = vector.shape_cast %373 : vector<1x2x4xf32> to vector<2x4xf32>
    %375 = arith.truncf %374 : vector<2x4xf32> to vector<2x4xbf16>
    %cst_161 = arith.constant dense<0.000000e+00> : vector<2x64xf32>
    %376 = tpu.matmul %375, %363, %cst_161 {dimension_numbers = #tpu.dot_dimension_numbers<[1], [0], [0], [1], [0, 0, 1, 1], [], []>} : vector<2x4xbf16>, vector<4x64xbf16>, vector<2x64xf32> -> vector<2x64xf32>
    %377 = arith.addf %376, %361 : vector<2x64xf32>
    %378 = arith.truncf %371 : vector<2x16xf32> to vector<2x16xbf16>
    %cst_162 = arith.constant dense<0.000000e+00> : vector<2x64xf32>
    %379 = tpu.matmul %378, %365, %cst_162 {dimension_numbers = #tpu.dot_dimension_numbers<[1], [0], [0], [1], [0, 0, 1, 1], [], []>} : vector<2x16xbf16>, vector<16x64xbf16>, vector<2x64xf32> -> vector<2x64xf32>
    %380 = arith.addf %377, %379 : vector<2x64xf32>
    %381 = vector.extract_strided_slice %380 {offsets = [0, 0], sizes = [2, 16], strides = [1, 1]} : vector<2x64xf32> to vector<2x16xf32>
    %382 = arith.negf %381 : vector<2x16xf32>
    %383 = math.exp %382 : vector<2x16xf32>
    %cst_163 = arith.constant 1.000000e+00 : f32
    %384 = vector.broadcast %cst_163 : f32 to vector<2x16xf32>
    %385 = arith.addf %384, %383 : vector<2x16xf32>
    %386 = arith.divf %384, %385 : vector<2x16xf32>
    %387 = vector.extract_strided_slice %380 {offsets = [0, 16], sizes = [2, 16], strides = [1, 1]} : vector<2x64xf32> to vector<2x16xf32>
    %388 = arith.negf %387 : vector<2x16xf32>
    %389 = math.exp %388 : vector<2x16xf32>
    %cst_164 = arith.constant 1.000000e+00 : f32
    %390 = vector.broadcast %cst_164 : f32 to vector<2x16xf32>
    %391 = arith.addf %390, %389 : vector<2x16xf32>
    %392 = arith.divf %390, %391 : vector<2x16xf32>
    %393 = vector.extract_strided_slice %380 {offsets = [0, 32], sizes = [2, 16], strides = [1, 1]} : vector<2x64xf32> to vector<2x16xf32>
    %394 = math.tanh %393 : vector<2x16xf32>
    %395 = vector.extract_strided_slice %380 {offsets = [0, 48], sizes = [2, 16], strides = [1, 1]} : vector<2x64xf32> to vector<2x16xf32>
    %396 = arith.negf %395 : vector<2x16xf32>
    %397 = math.exp %396 : vector<2x16xf32>
    %cst_165 = arith.constant 1.000000e+00 : f32
    %398 = vector.broadcast %cst_165 : f32 to vector<2x16xf32>
    %399 = arith.addf %398, %397 : vector<2x16xf32>
    %400 = arith.divf %398, %399 : vector<2x16xf32>
    %401 = arith.mulf %392, %371 : vector<2x16xf32>
    %402 = arith.mulf %386, %394 : vector<2x16xf32>
    %403 = arith.addf %401, %402 : vector<2x16xf32>
    %404 = math.tanh %403 : vector<2x16xf32>
    %405 = arith.mulf %400, %404 : vector<2x16xf32>
    %406 = arith.truncf %405 : vector<2x16xf32> to vector<2x16xbf16>
    %cst_166 = arith.constant dense<0.000000e+00> : vector<2x64xf32>
    %407 = tpu.matmul %406, %367, %cst_166 {dimension_numbers = #tpu.dot_dimension_numbers<[1], [0], [0], [1], [0, 0, 1, 1], [], []>} : vector<2x16xbf16>, vector<16x64xbf16>, vector<2x64xf32> -> vector<2x64xf32>
    %408 = arith.truncf %371 : vector<2x16xf32> to vector<2x16xbf16>
    %cst_167 = arith.constant dense<0.000000e+00> : vector<2x64xf32>
    %409 = tpu.matmul %408, %369, %cst_167 {dimension_numbers = #tpu.dot_dimension_numbers<[1], [0], [0], [1], [0, 0, 1, 1], [], []>} : vector<2x16xbf16>, vector<16x64xbf16>, vector<2x64xf32> -> vector<2x64xf32>
    %410 = arith.addf %407, %409 : vector<2x64xf32>
    %411 = vector.broadcast %370 : vector<1x64xf32> to vector<2x64xf32>
    %412 = arith.addf %410, %411 : vector<2x64xf32>
    %413 = vector.extract_strided_slice %412 {offsets = [0, 0], sizes = [2, 16], strides = [1, 1]} : vector<2x64xf32> to vector<2x16xf32>
    %414 = arith.negf %413 : vector<2x16xf32>
    %415 = math.exp %414 : vector<2x16xf32>
    %cst_168 = arith.constant 1.000000e+00 : f32
    %416 = vector.broadcast %cst_168 : f32 to vector<2x16xf32>
    %417 = arith.addf %416, %415 : vector<2x16xf32>
    %418 = arith.divf %416, %417 : vector<2x16xf32>
    %419 = vector.extract_strided_slice %412 {offsets = [0, 16], sizes = [2, 16], strides = [1, 1]} : vector<2x64xf32> to vector<2x16xf32>
    %420 = arith.negf %419 : vector<2x16xf32>
    %421 = math.exp %420 : vector<2x16xf32>
    %cst_169 = arith.constant 1.000000e+00 : f32
    %422 = vector.broadcast %cst_169 : f32 to vector<2x16xf32>
    %423 = arith.addf %422, %421 : vector<2x16xf32>
    %424 = arith.divf %422, %423 : vector<2x16xf32>
    %425 = vector.extract_strided_slice %412 {offsets = [0, 32], sizes = [2, 16], strides = [1, 1]} : vector<2x64xf32> to vector<2x16xf32>
    %426 = math.tanh %425 : vector<2x16xf32>
    %427 = vector.extract_strided_slice %412 {offsets = [0, 48], sizes = [2, 16], strides = [1, 1]} : vector<2x64xf32> to vector<2x16xf32>
    %428 = arith.negf %427 : vector<2x16xf32>
    %429 = math.exp %428 : vector<2x16xf32>
    %cst_170 = arith.constant 1.000000e+00 : f32
    %430 = vector.broadcast %cst_170 : f32 to vector<2x16xf32>
    %431 = arith.addf %430, %429 : vector<2x16xf32>
    %432 = arith.divf %430, %431 : vector<2x16xf32>
    %433 = arith.mulf %424, %371 : vector<2x16xf32>
    %434 = arith.mulf %418, %426 : vector<2x16xf32>
    %435 = arith.addf %433, %434 : vector<2x16xf32>
    %436 = math.tanh %435 : vector<2x16xf32>
    %437 = arith.mulf %432, %436 : vector<2x16xf32>
    %c1_i32 = arith.constant 1 : i32
    %438 = arith.index_cast %c1_i32 : i32 to index
    %c0_171 = arith.constant 0 : index
    %c0_172 = arith.constant 0 : index
    %439 = vector.load %arg17[%438, %c0_171, %c0_172] : memref<8x2x4xf32, #tpu.memory_space<vmem>>, vector<1x2x4xf32>
    %440 = vector.shape_cast %439 : vector<1x2x4xf32> to vector<2x4xf32>
    %441 = arith.truncf %440 : vector<2x4xf32> to vector<2x4xbf16>
    %cst_173 = arith.constant dense<0.000000e+00> : vector<2x64xf32>
    %442 = tpu.matmul %441, %363, %cst_173 {dimension_numbers = #tpu.dot_dimension_numbers<[1], [0], [0], [1], [0, 0, 1, 1], [], []>} : vector<2x4xbf16>, vector<4x64xbf16>, vector<2x64xf32> -> vector<2x64xf32>
    %443 = arith.addf %442, %361 : vector<2x64xf32>
    %444 = arith.truncf %405 : vector<2x16xf32> to vector<2x16xbf16>
    %cst_174 = arith.constant dense<0.000000e+00> : vector<2x64xf32>
    %445 = tpu.matmul %444, %365, %cst_174 {dimension_numbers = #tpu.dot_dimension_numbers<[1], [0], [0], [1], [0, 0, 1, 1], [], []>} : vector<2x16xbf16>, vector<16x64xbf16>, vector<2x64xf32> -> vector<2x64xf32>
    %446 = arith.addf %443, %445 : vector<2x64xf32>
    %447 = vector.extract_strided_slice %446 {offsets = [0, 0], sizes = [2, 16], strides = [1, 1]} : vector<2x64xf32> to vector<2x16xf32>
    %448 = arith.negf %447 : vector<2x16xf32>
    %449 = math.exp %448 : vector<2x16xf32>
    %cst_175 = arith.constant 1.000000e+00 : f32
    %450 = vector.broadcast %cst_175 : f32 to vector<2x16xf32>
    %451 = arith.addf %450, %449 : vector<2x16xf32>
    %452 = arith.divf %450, %451 : vector<2x16xf32>
    %453 = vector.extract_strided_slice %446 {offsets = [0, 16], sizes = [2, 16], strides = [1, 1]} : vector<2x64xf32> to vector<2x16xf32>
    %454 = arith.negf %453 : vector<2x16xf32>
    %455 = math.exp %454 : vector<2x16xf32>
    %cst_176 = arith.constant 1.000000e+00 : f32
    %456 = vector.broadcast %cst_176 : f32 to vector<2x16xf32>
    %457 = arith.addf %456, %455 : vector<2x16xf32>
    %458 = arith.divf %456, %457 : vector<2x16xf32>
    %459 = vector.extract_strided_slice %446 {offsets = [0, 32], sizes = [2, 16], strides = [1, 1]} : vector<2x64xf32> to vector<2x16xf32>
    %460 = math.tanh %459 : vector<2x16xf32>
    %461 = vector.extract_strided_slice %446 {offsets = [0, 48], sizes = [2, 16], strides = [1, 1]} : vector<2x64xf32> to vector<2x16xf32>
    %462 = arith.negf %461 : vector<2x16xf32>
    %463 = math.exp %462 : vector<2x16xf32>
    %cst_177 = arith.constant 1.000000e+00 : f32
    %464 = vector.broadcast %cst_177 : f32 to vector<2x16xf32>
    %465 = arith.addf %464, %463 : vector<2x16xf32>
    %466 = arith.divf %464, %465 : vector<2x16xf32>
    %467 = arith.mulf %458, %403 : vector<2x16xf32>
    %468 = arith.mulf %452, %460 : vector<2x16xf32>
    %469 = arith.addf %467, %468 : vector<2x16xf32>
    %470 = math.tanh %469 : vector<2x16xf32>
    %471 = arith.mulf %466, %470 : vector<2x16xf32>
    %472 = arith.truncf %471 : vector<2x16xf32> to vector<2x16xbf16>
    %cst_178 = arith.constant dense<0.000000e+00> : vector<2x64xf32>
    %473 = tpu.matmul %472, %367, %cst_178 {dimension_numbers = #tpu.dot_dimension_numbers<[1], [0], [0], [1], [0, 0, 1, 1], [], []>} : vector<2x16xbf16>, vector<16x64xbf16>, vector<2x64xf32> -> vector<2x64xf32>
    %474 = arith.truncf %437 : vector<2x16xf32> to vector<2x16xbf16>
    %cst_179 = arith.constant dense<0.000000e+00> : vector<2x64xf32>
    %475 = tpu.matmul %474, %369, %cst_179 {dimension_numbers = #tpu.dot_dimension_numbers<[1], [0], [0], [1], [0, 0, 1, 1], [], []>} : vector<2x16xbf16>, vector<16x64xbf16>, vector<2x64xf32> -> vector<2x64xf32>
    %476 = arith.addf %473, %475 : vector<2x64xf32>
    %477 = vector.broadcast %370 : vector<1x64xf32> to vector<2x64xf32>
    %478 = arith.addf %476, %477 : vector<2x64xf32>
    %479 = vector.extract_strided_slice %478 {offsets = [0, 0], sizes = [2, 16], strides = [1, 1]} : vector<2x64xf32> to vector<2x16xf32>
    %480 = arith.negf %479 : vector<2x16xf32>
    %481 = math.exp %480 : vector<2x16xf32>
    %cst_180 = arith.constant 1.000000e+00 : f32
    %482 = vector.broadcast %cst_180 : f32 to vector<2x16xf32>
    %483 = arith.addf %482, %481 : vector<2x16xf32>
    %484 = arith.divf %482, %483 : vector<2x16xf32>
    %485 = vector.extract_strided_slice %478 {offsets = [0, 16], sizes = [2, 16], strides = [1, 1]} : vector<2x64xf32> to vector<2x16xf32>
    %486 = arith.negf %485 : vector<2x16xf32>
    %487 = math.exp %486 : vector<2x16xf32>
    %cst_181 = arith.constant 1.000000e+00 : f32
    %488 = vector.broadcast %cst_181 : f32 to vector<2x16xf32>
    %489 = arith.addf %488, %487 : vector<2x16xf32>
    %490 = arith.divf %488, %489 : vector<2x16xf32>
    %491 = vector.extract_strided_slice %478 {offsets = [0, 32], sizes = [2, 16], strides = [1, 1]} : vector<2x64xf32> to vector<2x16xf32>
    %492 = math.tanh %491 : vector<2x16xf32>
    %493 = vector.extract_strided_slice %478 {offsets = [0, 48], sizes = [2, 16], strides = [1, 1]} : vector<2x64xf32> to vector<2x16xf32>
    %494 = arith.negf %493 : vector<2x16xf32>
    %495 = math.exp %494 : vector<2x16xf32>
    %cst_182 = arith.constant 1.000000e+00 : f32
    %496 = vector.broadcast %cst_182 : f32 to vector<2x16xf32>
    %497 = arith.addf %496, %495 : vector<2x16xf32>
    %498 = arith.divf %496, %497 : vector<2x16xf32>
    %499 = arith.mulf %490, %435 : vector<2x16xf32>
    %500 = arith.mulf %484, %492 : vector<2x16xf32>
    %501 = arith.addf %499, %500 : vector<2x16xf32>
    %502 = math.tanh %501 : vector<2x16xf32>
    %503 = arith.mulf %498, %502 : vector<2x16xf32>
    %c2_i32 = arith.constant 2 : i32
    %504 = arith.index_cast %c2_i32 : i32 to index
    %c0_183 = arith.constant 0 : index
    %c0_184 = arith.constant 0 : index
    %505 = vector.load %arg17[%504, %c0_183, %c0_184] : memref<8x2x4xf32, #tpu.memory_space<vmem>>, vector<1x2x4xf32>
    %506 = vector.shape_cast %505 : vector<1x2x4xf32> to vector<2x4xf32>
    %507 = arith.truncf %506 : vector<2x4xf32> to vector<2x4xbf16>
    %cst_185 = arith.constant dense<0.000000e+00> : vector<2x64xf32>
    %508 = tpu.matmul %507, %363, %cst_185 {dimension_numbers = #tpu.dot_dimension_numbers<[1], [0], [0], [1], [0, 0, 1, 1], [], []>} : vector<2x4xbf16>, vector<4x64xbf16>, vector<2x64xf32> -> vector<2x64xf32>
    %509 = arith.addf %508, %361 : vector<2x64xf32>
    %510 = arith.truncf %471 : vector<2x16xf32> to vector<2x16xbf16>
    %cst_186 = arith.constant dense<0.000000e+00> : vector<2x64xf32>
    %511 = tpu.matmul %510, %365, %cst_186 {dimension_numbers = #tpu.dot_dimension_numbers<[1], [0], [0], [1], [0, 0, 1, 1], [], []>} : vector<2x16xbf16>, vector<16x64xbf16>, vector<2x64xf32> -> vector<2x64xf32>
    %512 = arith.addf %509, %511 : vector<2x64xf32>
    %513 = vector.extract_strided_slice %512 {offsets = [0, 0], sizes = [2, 16], strides = [1, 1]} : vector<2x64xf32> to vector<2x16xf32>
    %514 = arith.negf %513 : vector<2x16xf32>
    %515 = math.exp %514 : vector<2x16xf32>
    %cst_187 = arith.constant 1.000000e+00 : f32
    %516 = vector.broadcast %cst_187 : f32 to vector<2x16xf32>
    %517 = arith.addf %516, %515 : vector<2x16xf32>
    %518 = arith.divf %516, %517 : vector<2x16xf32>
    %519 = vector.extract_strided_slice %512 {offsets = [0, 16], sizes = [2, 16], strides = [1, 1]} : vector<2x64xf32> to vector<2x16xf32>
    %520 = arith.negf %519 : vector<2x16xf32>
    %521 = math.exp %520 : vector<2x16xf32>
    %cst_188 = arith.constant 1.000000e+00 : f32
    %522 = vector.broadcast %cst_188 : f32 to vector<2x16xf32>
    %523 = arith.addf %522, %521 : vector<2x16xf32>
    %524 = arith.divf %522, %523 : vector<2x16xf32>
    %525 = vector.extract_strided_slice %512 {offsets = [0, 32], sizes = [2, 16], strides = [1, 1]} : vector<2x64xf32> to vector<2x16xf32>
    %526 = math.tanh %525 : vector<2x16xf32>
    %527 = vector.extract_strided_slice %512 {offsets = [0, 48], sizes = [2, 16], strides = [1, 1]} : vector<2x64xf32> to vector<2x16xf32>
    %528 = arith.negf %527 : vector<2x16xf32>
    %529 = math.exp %528 : vector<2x16xf32>
    %cst_189 = arith.constant 1.000000e+00 : f32
    %530 = vector.broadcast %cst_189 : f32 to vector<2x16xf32>
    %531 = arith.addf %530, %529 : vector<2x16xf32>
    %532 = arith.divf %530, %531 : vector<2x16xf32>
    %533 = arith.mulf %524, %469 : vector<2x16xf32>
    %534 = arith.mulf %518, %526 : vector<2x16xf32>
    %535 = arith.addf %533, %534 : vector<2x16xf32>
    %536 = math.tanh %535 : vector<2x16xf32>
    %537 = arith.mulf %532, %536 : vector<2x16xf32>
    %538 = arith.truncf %537 : vector<2x16xf32> to vector<2x16xbf16>
    %cst_190 = arith.constant dense<0.000000e+00> : vector<2x64xf32>
    %539 = tpu.matmul %538, %367, %cst_190 {dimension_numbers = #tpu.dot_dimension_numbers<[1], [0], [0], [1], [0, 0, 1, 1], [], []>} : vector<2x16xbf16>, vector<16x64xbf16>, vector<2x64xf32> -> vector<2x64xf32>
    %540 = arith.truncf %503 : vector<2x16xf32> to vector<2x16xbf16>
    %cst_191 = arith.constant dense<0.000000e+00> : vector<2x64xf32>
    %541 = tpu.matmul %540, %369, %cst_191 {dimension_numbers = #tpu.dot_dimension_numbers<[1], [0], [0], [1], [0, 0, 1, 1], [], []>} : vector<2x16xbf16>, vector<16x64xbf16>, vector<2x64xf32> -> vector<2x64xf32>
    %542 = arith.addf %539, %541 : vector<2x64xf32>
    %543 = vector.broadcast %370 : vector<1x64xf32> to vector<2x64xf32>
    %544 = arith.addf %542, %543 : vector<2x64xf32>
    %545 = vector.extract_strided_slice %544 {offsets = [0, 0], sizes = [2, 16], strides = [1, 1]} : vector<2x64xf32> to vector<2x16xf32>
    %546 = arith.negf %545 : vector<2x16xf32>
    %547 = math.exp %546 : vector<2x16xf32>
    %cst_192 = arith.constant 1.000000e+00 : f32
    %548 = vector.broadcast %cst_192 : f32 to vector<2x16xf32>
    %549 = arith.addf %548, %547 : vector<2x16xf32>
    %550 = arith.divf %548, %549 : vector<2x16xf32>
    %551 = vector.extract_strided_slice %544 {offsets = [0, 16], sizes = [2, 16], strides = [1, 1]} : vector<2x64xf32> to vector<2x16xf32>
    %552 = arith.negf %551 : vector<2x16xf32>
    %553 = math.exp %552 : vector<2x16xf32>
    %cst_193 = arith.constant 1.000000e+00 : f32
    %554 = vector.broadcast %cst_193 : f32 to vector<2x16xf32>
    %555 = arith.addf %554, %553 : vector<2x16xf32>
    %556 = arith.divf %554, %555 : vector<2x16xf32>
    %557 = vector.extract_strided_slice %544 {offsets = [0, 32], sizes = [2, 16], strides = [1, 1]} : vector<2x64xf32> to vector<2x16xf32>
    %558 = math.tanh %557 : vector<2x16xf32>
    %559 = vector.extract_strided_slice %544 {offsets = [0, 48], sizes = [2, 16], strides = [1, 1]} : vector<2x64xf32> to vector<2x16xf32>
    %560 = arith.negf %559 : vector<2x16xf32>
    %561 = math.exp %560 : vector<2x16xf32>
    %cst_194 = arith.constant 1.000000e+00 : f32
    %562 = vector.broadcast %cst_194 : f32 to vector<2x16xf32>
    %563 = arith.addf %562, %561 : vector<2x16xf32>
    %564 = arith.divf %562, %563 : vector<2x16xf32>
    %565 = arith.mulf %556, %501 : vector<2x16xf32>
    %566 = arith.mulf %550, %558 : vector<2x16xf32>
    %567 = arith.addf %565, %566 : vector<2x16xf32>
    %568 = math.tanh %567 : vector<2x16xf32>
    %569 = arith.mulf %564, %568 : vector<2x16xf32>
    %c3_i32 = arith.constant 3 : i32
    %570 = arith.index_cast %c3_i32 : i32 to index
    %c0_195 = arith.constant 0 : index
    %c0_196 = arith.constant 0 : index
    %571 = vector.load %arg17[%570, %c0_195, %c0_196] : memref<8x2x4xf32, #tpu.memory_space<vmem>>, vector<1x2x4xf32>
    %572 = vector.shape_cast %571 : vector<1x2x4xf32> to vector<2x4xf32>
    %573 = arith.truncf %572 : vector<2x4xf32> to vector<2x4xbf16>
    %cst_197 = arith.constant dense<0.000000e+00> : vector<2x64xf32>
    %574 = tpu.matmul %573, %363, %cst_197 {dimension_numbers = #tpu.dot_dimension_numbers<[1], [0], [0], [1], [0, 0, 1, 1], [], []>} : vector<2x4xbf16>, vector<4x64xbf16>, vector<2x64xf32> -> vector<2x64xf32>
    %575 = arith.addf %574, %361 : vector<2x64xf32>
    %576 = arith.truncf %537 : vector<2x16xf32> to vector<2x16xbf16>
    %cst_198 = arith.constant dense<0.000000e+00> : vector<2x64xf32>
    %577 = tpu.matmul %576, %365, %cst_198 {dimension_numbers = #tpu.dot_dimension_numbers<[1], [0], [0], [1], [0, 0, 1, 1], [], []>} : vector<2x16xbf16>, vector<16x64xbf16>, vector<2x64xf32> -> vector<2x64xf32>
    %578 = arith.addf %575, %577 : vector<2x64xf32>
    %579 = vector.extract_strided_slice %578 {offsets = [0, 0], sizes = [2, 16], strides = [1, 1]} : vector<2x64xf32> to vector<2x16xf32>
    %580 = arith.negf %579 : vector<2x16xf32>
    %581 = math.exp %580 : vector<2x16xf32>
    %cst_199 = arith.constant 1.000000e+00 : f32
    %582 = vector.broadcast %cst_199 : f32 to vector<2x16xf32>
    %583 = arith.addf %582, %581 : vector<2x16xf32>
    %584 = arith.divf %582, %583 : vector<2x16xf32>
    %585 = vector.extract_strided_slice %578 {offsets = [0, 16], sizes = [2, 16], strides = [1, 1]} : vector<2x64xf32> to vector<2x16xf32>
    %586 = arith.negf %585 : vector<2x16xf32>
    %587 = math.exp %586 : vector<2x16xf32>
    %cst_200 = arith.constant 1.000000e+00 : f32
    %588 = vector.broadcast %cst_200 : f32 to vector<2x16xf32>
    %589 = arith.addf %588, %587 : vector<2x16xf32>
    %590 = arith.divf %588, %589 : vector<2x16xf32>
    %591 = vector.extract_strided_slice %578 {offsets = [0, 32], sizes = [2, 16], strides = [1, 1]} : vector<2x64xf32> to vector<2x16xf32>
    %592 = math.tanh %591 : vector<2x16xf32>
    %593 = vector.extract_strided_slice %578 {offsets = [0, 48], sizes = [2, 16], strides = [1, 1]} : vector<2x64xf32> to vector<2x16xf32>
    %594 = arith.negf %593 : vector<2x16xf32>
    %595 = math.exp %594 : vector<2x16xf32>
    %cst_201 = arith.constant 1.000000e+00 : f32
    %596 = vector.broadcast %cst_201 : f32 to vector<2x16xf32>
    %597 = arith.addf %596, %595 : vector<2x16xf32>
    %598 = arith.divf %596, %597 : vector<2x16xf32>
    %599 = arith.mulf %590, %535 : vector<2x16xf32>
    %600 = arith.mulf %584, %592 : vector<2x16xf32>
    %601 = arith.addf %599, %600 : vector<2x16xf32>
    %602 = math.tanh %601 : vector<2x16xf32>
    %603 = arith.mulf %598, %602 : vector<2x16xf32>
    %604 = arith.truncf %603 : vector<2x16xf32> to vector<2x16xbf16>
    %cst_202 = arith.constant dense<0.000000e+00> : vector<2x64xf32>
    %605 = tpu.matmul %604, %367, %cst_202 {dimension_numbers = #tpu.dot_dimension_numbers<[1], [0], [0], [1], [0, 0, 1, 1], [], []>} : vector<2x16xbf16>, vector<16x64xbf16>, vector<2x64xf32> -> vector<2x64xf32>
    %606 = arith.truncf %569 : vector<2x16xf32> to vector<2x16xbf16>
    %cst_203 = arith.constant dense<0.000000e+00> : vector<2x64xf32>
    %607 = tpu.matmul %606, %369, %cst_203 {dimension_numbers = #tpu.dot_dimension_numbers<[1], [0], [0], [1], [0, 0, 1, 1], [], []>} : vector<2x16xbf16>, vector<16x64xbf16>, vector<2x64xf32> -> vector<2x64xf32>
    %608 = arith.addf %605, %607 : vector<2x64xf32>
    %609 = vector.broadcast %370 : vector<1x64xf32> to vector<2x64xf32>
    %610 = arith.addf %608, %609 : vector<2x64xf32>
    %611 = vector.extract_strided_slice %610 {offsets = [0, 0], sizes = [2, 16], strides = [1, 1]} : vector<2x64xf32> to vector<2x16xf32>
    %612 = arith.negf %611 : vector<2x16xf32>
    %613 = math.exp %612 : vector<2x16xf32>
    %cst_204 = arith.constant 1.000000e+00 : f32
    %614 = vector.broadcast %cst_204 : f32 to vector<2x16xf32>
    %615 = arith.addf %614, %613 : vector<2x16xf32>
    %616 = arith.divf %614, %615 : vector<2x16xf32>
    %617 = vector.extract_strided_slice %610 {offsets = [0, 16], sizes = [2, 16], strides = [1, 1]} : vector<2x64xf32> to vector<2x16xf32>
    %618 = arith.negf %617 : vector<2x16xf32>
    %619 = math.exp %618 : vector<2x16xf32>
    %cst_205 = arith.constant 1.000000e+00 : f32
    %620 = vector.broadcast %cst_205 : f32 to vector<2x16xf32>
    %621 = arith.addf %620, %619 : vector<2x16xf32>
    %622 = arith.divf %620, %621 : vector<2x16xf32>
    %623 = vector.extract_strided_slice %610 {offsets = [0, 32], sizes = [2, 16], strides = [1, 1]} : vector<2x64xf32> to vector<2x16xf32>
    %624 = math.tanh %623 : vector<2x16xf32>
    %625 = vector.extract_strided_slice %610 {offsets = [0, 48], sizes = [2, 16], strides = [1, 1]} : vector<2x64xf32> to vector<2x16xf32>
    %626 = arith.negf %625 : vector<2x16xf32>
    %627 = math.exp %626 : vector<2x16xf32>
    %cst_206 = arith.constant 1.000000e+00 : f32
    %628 = vector.broadcast %cst_206 : f32 to vector<2x16xf32>
    %629 = arith.addf %628, %627 : vector<2x16xf32>
    %630 = arith.divf %628, %629 : vector<2x16xf32>
    %631 = arith.mulf %622, %567 : vector<2x16xf32>
    %632 = arith.mulf %616, %624 : vector<2x16xf32>
    %633 = arith.addf %631, %632 : vector<2x16xf32>
    %634 = math.tanh %633 : vector<2x16xf32>
    %635 = arith.mulf %630, %634 : vector<2x16xf32>
    %c4_i32 = arith.constant 4 : i32
    %636 = arith.index_cast %c4_i32 : i32 to index
    %c0_207 = arith.constant 0 : index
    %c0_208 = arith.constant 0 : index
    %637 = vector.load %arg17[%636, %c0_207, %c0_208] : memref<8x2x4xf32, #tpu.memory_space<vmem>>, vector<1x2x4xf32>
    %638 = vector.shape_cast %637 : vector<1x2x4xf32> to vector<2x4xf32>
    %639 = arith.truncf %638 : vector<2x4xf32> to vector<2x4xbf16>
    %cst_209 = arith.constant dense<0.000000e+00> : vector<2x64xf32>
    %640 = tpu.matmul %639, %363, %cst_209 {dimension_numbers = #tpu.dot_dimension_numbers<[1], [0], [0], [1], [0, 0, 1, 1], [], []>} : vector<2x4xbf16>, vector<4x64xbf16>, vector<2x64xf32> -> vector<2x64xf32>
    %641 = arith.addf %640, %361 : vector<2x64xf32>
    %642 = arith.truncf %603 : vector<2x16xf32> to vector<2x16xbf16>
    %cst_210 = arith.constant dense<0.000000e+00> : vector<2x64xf32>
    %643 = tpu.matmul %642, %365, %cst_210 {dimension_numbers = #tpu.dot_dimension_numbers<[1], [0], [0], [1], [0, 0, 1, 1], [], []>} : vector<2x16xbf16>, vector<16x64xbf16>, vector<2x64xf32> -> vector<2x64xf32>
    %644 = arith.addf %641, %643 : vector<2x64xf32>
    %645 = vector.extract_strided_slice %644 {offsets = [0, 0], sizes = [2, 16], strides = [1, 1]} : vector<2x64xf32> to vector<2x16xf32>
    %646 = arith.negf %645 : vector<2x16xf32>
    %647 = math.exp %646 : vector<2x16xf32>
    %cst_211 = arith.constant 1.000000e+00 : f32
    %648 = vector.broadcast %cst_211 : f32 to vector<2x16xf32>
    %649 = arith.addf %648, %647 : vector<2x16xf32>
    %650 = arith.divf %648, %649 : vector<2x16xf32>
    %651 = vector.extract_strided_slice %644 {offsets = [0, 16], sizes = [2, 16], strides = [1, 1]} : vector<2x64xf32> to vector<2x16xf32>
    %652 = arith.negf %651 : vector<2x16xf32>
    %653 = math.exp %652 : vector<2x16xf32>
    %cst_212 = arith.constant 1.000000e+00 : f32
    %654 = vector.broadcast %cst_212 : f32 to vector<2x16xf32>
    %655 = arith.addf %654, %653 : vector<2x16xf32>
    %656 = arith.divf %654, %655 : vector<2x16xf32>
    %657 = vector.extract_strided_slice %644 {offsets = [0, 32], sizes = [2, 16], strides = [1, 1]} : vector<2x64xf32> to vector<2x16xf32>
    %658 = math.tanh %657 : vector<2x16xf32>
    %659 = vector.extract_strided_slice %644 {offsets = [0, 48], sizes = [2, 16], strides = [1, 1]} : vector<2x64xf32> to vector<2x16xf32>
    %660 = arith.negf %659 : vector<2x16xf32>
    %661 = math.exp %660 : vector<2x16xf32>
    %cst_213 = arith.constant 1.000000e+00 : f32
    %662 = vector.broadcast %cst_213 : f32 to vector<2x16xf32>
    %663 = arith.addf %662, %661 : vector<2x16xf32>
    %664 = arith.divf %662, %663 : vector<2x16xf32>
    %665 = arith.mulf %656, %601 : vector<2x16xf32>
    %666 = arith.mulf %650, %658 : vector<2x16xf32>
    %667 = arith.addf %665, %666 : vector<2x16xf32>
    %668 = math.tanh %667 : vector<2x16xf32>
    %669 = arith.mulf %664, %668 : vector<2x16xf32>
    %670 = arith.truncf %669 : vector<2x16xf32> to vector<2x16xbf16>
    %cst_214 = arith.constant dense<0.000000e+00> : vector<2x64xf32>
    %671 = tpu.matmul %670, %367, %cst_214 {dimension_numbers = #tpu.dot_dimension_numbers<[1], [0], [0], [1], [0, 0, 1, 1], [], []>} : vector<2x16xbf16>, vector<16x64xbf16>, vector<2x64xf32> -> vector<2x64xf32>
    %672 = arith.truncf %635 : vector<2x16xf32> to vector<2x16xbf16>
    %cst_215 = arith.constant dense<0.000000e+00> : vector<2x64xf32>
    %673 = tpu.matmul %672, %369, %cst_215 {dimension_numbers = #tpu.dot_dimension_numbers<[1], [0], [0], [1], [0, 0, 1, 1], [], []>} : vector<2x16xbf16>, vector<16x64xbf16>, vector<2x64xf32> -> vector<2x64xf32>
    %674 = arith.addf %671, %673 : vector<2x64xf32>
    %675 = vector.broadcast %370 : vector<1x64xf32> to vector<2x64xf32>
    %676 = arith.addf %674, %675 : vector<2x64xf32>
    %677 = vector.extract_strided_slice %676 {offsets = [0, 0], sizes = [2, 16], strides = [1, 1]} : vector<2x64xf32> to vector<2x16xf32>
    %678 = arith.negf %677 : vector<2x16xf32>
    %679 = math.exp %678 : vector<2x16xf32>
    %cst_216 = arith.constant 1.000000e+00 : f32
    %680 = vector.broadcast %cst_216 : f32 to vector<2x16xf32>
    %681 = arith.addf %680, %679 : vector<2x16xf32>
    %682 = arith.divf %680, %681 : vector<2x16xf32>
    %683 = vector.extract_strided_slice %676 {offsets = [0, 16], sizes = [2, 16], strides = [1, 1]} : vector<2x64xf32> to vector<2x16xf32>
    %684 = arith.negf %683 : vector<2x16xf32>
    %685 = math.exp %684 : vector<2x16xf32>
    %cst_217 = arith.constant 1.000000e+00 : f32
    %686 = vector.broadcast %cst_217 : f32 to vector<2x16xf32>
    %687 = arith.addf %686, %685 : vector<2x16xf32>
    %688 = arith.divf %686, %687 : vector<2x16xf32>
    %689 = vector.extract_strided_slice %676 {offsets = [0, 32], sizes = [2, 16], strides = [1, 1]} : vector<2x64xf32> to vector<2x16xf32>
    %690 = math.tanh %689 : vector<2x16xf32>
    %691 = vector.extract_strided_slice %676 {offsets = [0, 48], sizes = [2, 16], strides = [1, 1]} : vector<2x64xf32> to vector<2x16xf32>
    %692 = arith.negf %691 : vector<2x16xf32>
    %693 = math.exp %692 : vector<2x16xf32>
    %cst_218 = arith.constant 1.000000e+00 : f32
    %694 = vector.broadcast %cst_218 : f32 to vector<2x16xf32>
    %695 = arith.addf %694, %693 : vector<2x16xf32>
    %696 = arith.divf %694, %695 : vector<2x16xf32>
    %697 = arith.mulf %688, %633 : vector<2x16xf32>
    %698 = arith.mulf %682, %690 : vector<2x16xf32>
    %699 = arith.addf %697, %698 : vector<2x16xf32>
    %700 = math.tanh %699 : vector<2x16xf32>
    %701 = arith.mulf %696, %700 : vector<2x16xf32>
    %c5_i32 = arith.constant 5 : i32
    %702 = arith.index_cast %c5_i32 : i32 to index
    %c0_219 = arith.constant 0 : index
    %c0_220 = arith.constant 0 : index
    %703 = vector.load %arg17[%702, %c0_219, %c0_220] : memref<8x2x4xf32, #tpu.memory_space<vmem>>, vector<1x2x4xf32>
    %704 = vector.shape_cast %703 : vector<1x2x4xf32> to vector<2x4xf32>
    %705 = arith.truncf %704 : vector<2x4xf32> to vector<2x4xbf16>
    %cst_221 = arith.constant dense<0.000000e+00> : vector<2x64xf32>
    %706 = tpu.matmul %705, %363, %cst_221 {dimension_numbers = #tpu.dot_dimension_numbers<[1], [0], [0], [1], [0, 0, 1, 1], [], []>} : vector<2x4xbf16>, vector<4x64xbf16>, vector<2x64xf32> -> vector<2x64xf32>
    %707 = arith.addf %706, %361 : vector<2x64xf32>
    %708 = arith.truncf %669 : vector<2x16xf32> to vector<2x16xbf16>
    %cst_222 = arith.constant dense<0.000000e+00> : vector<2x64xf32>
    %709 = tpu.matmul %708, %365, %cst_222 {dimension_numbers = #tpu.dot_dimension_numbers<[1], [0], [0], [1], [0, 0, 1, 1], [], []>} : vector<2x16xbf16>, vector<16x64xbf16>, vector<2x64xf32> -> vector<2x64xf32>
    %710 = arith.addf %707, %709 : vector<2x64xf32>
    %711 = vector.extract_strided_slice %710 {offsets = [0, 0], sizes = [2, 16], strides = [1, 1]} : vector<2x64xf32> to vector<2x16xf32>
    %712 = arith.negf %711 : vector<2x16xf32>
    %713 = math.exp %712 : vector<2x16xf32>
    %cst_223 = arith.constant 1.000000e+00 : f32
    %714 = vector.broadcast %cst_223 : f32 to vector<2x16xf32>
    %715 = arith.addf %714, %713 : vector<2x16xf32>
    %716 = arith.divf %714, %715 : vector<2x16xf32>
    %717 = vector.extract_strided_slice %710 {offsets = [0, 16], sizes = [2, 16], strides = [1, 1]} : vector<2x64xf32> to vector<2x16xf32>
    %718 = arith.negf %717 : vector<2x16xf32>
    %719 = math.exp %718 : vector<2x16xf32>
    %cst_224 = arith.constant 1.000000e+00 : f32
    %720 = vector.broadcast %cst_224 : f32 to vector<2x16xf32>
    %721 = arith.addf %720, %719 : vector<2x16xf32>
    %722 = arith.divf %720, %721 : vector<2x16xf32>
    %723 = vector.extract_strided_slice %710 {offsets = [0, 32], sizes = [2, 16], strides = [1, 1]} : vector<2x64xf32> to vector<2x16xf32>
    %724 = math.tanh %723 : vector<2x16xf32>
    %725 = vector.extract_strided_slice %710 {offsets = [0, 48], sizes = [2, 16], strides = [1, 1]} : vector<2x64xf32> to vector<2x16xf32>
    %726 = arith.negf %725 : vector<2x16xf32>
    %727 = math.exp %726 : vector<2x16xf32>
    %cst_225 = arith.constant 1.000000e+00 : f32
    %728 = vector.broadcast %cst_225 : f32 to vector<2x16xf32>
    %729 = arith.addf %728, %727 : vector<2x16xf32>
    %730 = arith.divf %728, %729 : vector<2x16xf32>
    %731 = arith.mulf %722, %667 : vector<2x16xf32>
    %732 = arith.mulf %716, %724 : vector<2x16xf32>
    %733 = arith.addf %731, %732 : vector<2x16xf32>
    %734 = math.tanh %733 : vector<2x16xf32>
    %735 = arith.mulf %730, %734 : vector<2x16xf32>
    %736 = arith.truncf %735 : vector<2x16xf32> to vector<2x16xbf16>
    %cst_226 = arith.constant dense<0.000000e+00> : vector<2x64xf32>
    %737 = tpu.matmul %736, %367, %cst_226 {dimension_numbers = #tpu.dot_dimension_numbers<[1], [0], [0], [1], [0, 0, 1, 1], [], []>} : vector<2x16xbf16>, vector<16x64xbf16>, vector<2x64xf32> -> vector<2x64xf32>
    %738 = arith.truncf %701 : vector<2x16xf32> to vector<2x16xbf16>
    %cst_227 = arith.constant dense<0.000000e+00> : vector<2x64xf32>
    %739 = tpu.matmul %738, %369, %cst_227 {dimension_numbers = #tpu.dot_dimension_numbers<[1], [0], [0], [1], [0, 0, 1, 1], [], []>} : vector<2x16xbf16>, vector<16x64xbf16>, vector<2x64xf32> -> vector<2x64xf32>
    %740 = arith.addf %737, %739 : vector<2x64xf32>
    %741 = vector.broadcast %370 : vector<1x64xf32> to vector<2x64xf32>
    %742 = arith.addf %740, %741 : vector<2x64xf32>
    %743 = vector.extract_strided_slice %742 {offsets = [0, 0], sizes = [2, 16], strides = [1, 1]} : vector<2x64xf32> to vector<2x16xf32>
    %744 = arith.negf %743 : vector<2x16xf32>
    %745 = math.exp %744 : vector<2x16xf32>
    %cst_228 = arith.constant 1.000000e+00 : f32
    %746 = vector.broadcast %cst_228 : f32 to vector<2x16xf32>
    %747 = arith.addf %746, %745 : vector<2x16xf32>
    %748 = arith.divf %746, %747 : vector<2x16xf32>
    %749 = vector.extract_strided_slice %742 {offsets = [0, 16], sizes = [2, 16], strides = [1, 1]} : vector<2x64xf32> to vector<2x16xf32>
    %750 = arith.negf %749 : vector<2x16xf32>
    %751 = math.exp %750 : vector<2x16xf32>
    %cst_229 = arith.constant 1.000000e+00 : f32
    %752 = vector.broadcast %cst_229 : f32 to vector<2x16xf32>
    %753 = arith.addf %752, %751 : vector<2x16xf32>
    %754 = arith.divf %752, %753 : vector<2x16xf32>
    %755 = vector.extract_strided_slice %742 {offsets = [0, 32], sizes = [2, 16], strides = [1, 1]} : vector<2x64xf32> to vector<2x16xf32>
    %756 = math.tanh %755 : vector<2x16xf32>
    %757 = vector.extract_strided_slice %742 {offsets = [0, 48], sizes = [2, 16], strides = [1, 1]} : vector<2x64xf32> to vector<2x16xf32>
    %758 = arith.negf %757 : vector<2x16xf32>
    %759 = math.exp %758 : vector<2x16xf32>
    %cst_230 = arith.constant 1.000000e+00 : f32
    %760 = vector.broadcast %cst_230 : f32 to vector<2x16xf32>
    %761 = arith.addf %760, %759 : vector<2x16xf32>
    %762 = arith.divf %760, %761 : vector<2x16xf32>
    %763 = arith.mulf %754, %699 : vector<2x16xf32>
    %764 = arith.mulf %748, %756 : vector<2x16xf32>
    %765 = arith.addf %763, %764 : vector<2x16xf32>
    %766 = math.tanh %765 : vector<2x16xf32>
    %767 = arith.mulf %762, %766 : vector<2x16xf32>
    %c6_i32 = arith.constant 6 : i32
    %768 = arith.index_cast %c6_i32 : i32 to index
    %c0_231 = arith.constant 0 : index
    %c0_232 = arith.constant 0 : index
    %769 = vector.load %arg17[%768, %c0_231, %c0_232] : memref<8x2x4xf32, #tpu.memory_space<vmem>>, vector<1x2x4xf32>
    %770 = vector.shape_cast %769 : vector<1x2x4xf32> to vector<2x4xf32>
    %771 = arith.truncf %770 : vector<2x4xf32> to vector<2x4xbf16>
    %cst_233 = arith.constant dense<0.000000e+00> : vector<2x64xf32>
    %772 = tpu.matmul %771, %363, %cst_233 {dimension_numbers = #tpu.dot_dimension_numbers<[1], [0], [0], [1], [0, 0, 1, 1], [], []>} : vector<2x4xbf16>, vector<4x64xbf16>, vector<2x64xf32> -> vector<2x64xf32>
    %773 = arith.addf %772, %361 : vector<2x64xf32>
    %774 = arith.truncf %735 : vector<2x16xf32> to vector<2x16xbf16>
    %cst_234 = arith.constant dense<0.000000e+00> : vector<2x64xf32>
    %775 = tpu.matmul %774, %365, %cst_234 {dimension_numbers = #tpu.dot_dimension_numbers<[1], [0], [0], [1], [0, 0, 1, 1], [], []>} : vector<2x16xbf16>, vector<16x64xbf16>, vector<2x64xf32> -> vector<2x64xf32>
    %776 = arith.addf %773, %775 : vector<2x64xf32>
    %777 = vector.extract_strided_slice %776 {offsets = [0, 0], sizes = [2, 16], strides = [1, 1]} : vector<2x64xf32> to vector<2x16xf32>
    %778 = arith.negf %777 : vector<2x16xf32>
    %779 = math.exp %778 : vector<2x16xf32>
    %cst_235 = arith.constant 1.000000e+00 : f32
    %780 = vector.broadcast %cst_235 : f32 to vector<2x16xf32>
    %781 = arith.addf %780, %779 : vector<2x16xf32>
    %782 = arith.divf %780, %781 : vector<2x16xf32>
    %783 = vector.extract_strided_slice %776 {offsets = [0, 16], sizes = [2, 16], strides = [1, 1]} : vector<2x64xf32> to vector<2x16xf32>
    %784 = arith.negf %783 : vector<2x16xf32>
    %785 = math.exp %784 : vector<2x16xf32>
    %cst_236 = arith.constant 1.000000e+00 : f32
    %786 = vector.broadcast %cst_236 : f32 to vector<2x16xf32>
    %787 = arith.addf %786, %785 : vector<2x16xf32>
    %788 = arith.divf %786, %787 : vector<2x16xf32>
    %789 = vector.extract_strided_slice %776 {offsets = [0, 32], sizes = [2, 16], strides = [1, 1]} : vector<2x64xf32> to vector<2x16xf32>
    %790 = math.tanh %789 : vector<2x16xf32>
    %791 = vector.extract_strided_slice %776 {offsets = [0, 48], sizes = [2, 16], strides = [1, 1]} : vector<2x64xf32> to vector<2x16xf32>
    %792 = arith.negf %791 : vector<2x16xf32>
    %793 = math.exp %792 : vector<2x16xf32>
    %cst_237 = arith.constant 1.000000e+00 : f32
    %794 = vector.broadcast %cst_237 : f32 to vector<2x16xf32>
    %795 = arith.addf %794, %793 : vector<2x16xf32>
    %796 = arith.divf %794, %795 : vector<2x16xf32>
    %797 = arith.mulf %788, %733 : vector<2x16xf32>
    %798 = arith.mulf %782, %790 : vector<2x16xf32>
    %799 = arith.addf %797, %798 : vector<2x16xf32>
    %800 = math.tanh %799 : vector<2x16xf32>
    %801 = arith.mulf %796, %800 : vector<2x16xf32>
    %802 = arith.truncf %801 : vector<2x16xf32> to vector<2x16xbf16>
    %cst_238 = arith.constant dense<0.000000e+00> : vector<2x64xf32>
    %803 = tpu.matmul %802, %367, %cst_238 {dimension_numbers = #tpu.dot_dimension_numbers<[1], [0], [0], [1], [0, 0, 1, 1], [], []>} : vector<2x16xbf16>, vector<16x64xbf16>, vector<2x64xf32> -> vector<2x64xf32>
    %804 = arith.truncf %767 : vector<2x16xf32> to vector<2x16xbf16>
    %cst_239 = arith.constant dense<0.000000e+00> : vector<2x64xf32>
    %805 = tpu.matmul %804, %369, %cst_239 {dimension_numbers = #tpu.dot_dimension_numbers<[1], [0], [0], [1], [0, 0, 1, 1], [], []>} : vector<2x16xbf16>, vector<16x64xbf16>, vector<2x64xf32> -> vector<2x64xf32>
    %806 = arith.addf %803, %805 : vector<2x64xf32>
    %807 = vector.broadcast %370 : vector<1x64xf32> to vector<2x64xf32>
    %808 = arith.addf %806, %807 : vector<2x64xf32>
    %809 = vector.extract_strided_slice %808 {offsets = [0, 0], sizes = [2, 16], strides = [1, 1]} : vector<2x64xf32> to vector<2x16xf32>
    %810 = arith.negf %809 : vector<2x16xf32>
    %811 = math.exp %810 : vector<2x16xf32>
    %cst_240 = arith.constant 1.000000e+00 : f32
    %812 = vector.broadcast %cst_240 : f32 to vector<2x16xf32>
    %813 = arith.addf %812, %811 : vector<2x16xf32>
    %814 = arith.divf %812, %813 : vector<2x16xf32>
    %815 = vector.extract_strided_slice %808 {offsets = [0, 16], sizes = [2, 16], strides = [1, 1]} : vector<2x64xf32> to vector<2x16xf32>
    %816 = arith.negf %815 : vector<2x16xf32>
    %817 = math.exp %816 : vector<2x16xf32>
    %cst_241 = arith.constant 1.000000e+00 : f32
    %818 = vector.broadcast %cst_241 : f32 to vector<2x16xf32>
    %819 = arith.addf %818, %817 : vector<2x16xf32>
    %820 = arith.divf %818, %819 : vector<2x16xf32>
    %821 = vector.extract_strided_slice %808 {offsets = [0, 32], sizes = [2, 16], strides = [1, 1]} : vector<2x64xf32> to vector<2x16xf32>
    %822 = math.tanh %821 : vector<2x16xf32>
    %823 = vector.extract_strided_slice %808 {offsets = [0, 48], sizes = [2, 16], strides = [1, 1]} : vector<2x64xf32> to vector<2x16xf32>
    %824 = arith.negf %823 : vector<2x16xf32>
    %825 = math.exp %824 : vector<2x16xf32>
    %cst_242 = arith.constant 1.000000e+00 : f32
    %826 = vector.broadcast %cst_242 : f32 to vector<2x16xf32>
    %827 = arith.addf %826, %825 : vector<2x16xf32>
    %828 = arith.divf %826, %827 : vector<2x16xf32>
    %829 = arith.mulf %820, %765 : vector<2x16xf32>
    %830 = arith.mulf %814, %822 : vector<2x16xf32>
    %831 = arith.addf %829, %830 : vector<2x16xf32>
    %832 = math.tanh %831 : vector<2x16xf32>
    %833 = arith.mulf %828, %832 : vector<2x16xf32>
    %c7_i32 = arith.constant 7 : i32
    %834 = arith.index_cast %c7_i32 : i32 to index
    %c0_243 = arith.constant 0 : index
    %c0_244 = arith.constant 0 : index
    %835 = vector.load %arg17[%834, %c0_243, %c0_244] : memref<8x2x4xf32, #tpu.memory_space<vmem>>, vector<1x2x4xf32>
    %836 = vector.shape_cast %835 : vector<1x2x4xf32> to vector<2x4xf32>
    %837 = arith.truncf %836 : vector<2x4xf32> to vector<2x4xbf16>
    %cst_245 = arith.constant dense<0.000000e+00> : vector<2x64xf32>
    %838 = tpu.matmul %837, %363, %cst_245 {dimension_numbers = #tpu.dot_dimension_numbers<[1], [0], [0], [1], [0, 0, 1, 1], [], []>} : vector<2x4xbf16>, vector<4x64xbf16>, vector<2x64xf32> -> vector<2x64xf32>
    %839 = arith.addf %838, %361 : vector<2x64xf32>
    %840 = arith.truncf %801 : vector<2x16xf32> to vector<2x16xbf16>
    %cst_246 = arith.constant dense<0.000000e+00> : vector<2x64xf32>
    %841 = tpu.matmul %840, %365, %cst_246 {dimension_numbers = #tpu.dot_dimension_numbers<[1], [0], [0], [1], [0, 0, 1, 1], [], []>} : vector<2x16xbf16>, vector<16x64xbf16>, vector<2x64xf32> -> vector<2x64xf32>
    %842 = arith.addf %839, %841 : vector<2x64xf32>
    %843 = vector.extract_strided_slice %842 {offsets = [0, 0], sizes = [2, 16], strides = [1, 1]} : vector<2x64xf32> to vector<2x16xf32>
    %844 = arith.negf %843 : vector<2x16xf32>
    %845 = math.exp %844 : vector<2x16xf32>
    %cst_247 = arith.constant 1.000000e+00 : f32
    %846 = vector.broadcast %cst_247 : f32 to vector<2x16xf32>
    %847 = arith.addf %846, %845 : vector<2x16xf32>
    %848 = arith.divf %846, %847 : vector<2x16xf32>
    %849 = vector.extract_strided_slice %842 {offsets = [0, 16], sizes = [2, 16], strides = [1, 1]} : vector<2x64xf32> to vector<2x16xf32>
    %850 = arith.negf %849 : vector<2x16xf32>
    %851 = math.exp %850 : vector<2x16xf32>
    %cst_248 = arith.constant 1.000000e+00 : f32
    %852 = vector.broadcast %cst_248 : f32 to vector<2x16xf32>
    %853 = arith.addf %852, %851 : vector<2x16xf32>
    %854 = arith.divf %852, %853 : vector<2x16xf32>
    %855 = vector.extract_strided_slice %842 {offsets = [0, 32], sizes = [2, 16], strides = [1, 1]} : vector<2x64xf32> to vector<2x16xf32>
    %856 = math.tanh %855 : vector<2x16xf32>
    %857 = vector.extract_strided_slice %842 {offsets = [0, 48], sizes = [2, 16], strides = [1, 1]} : vector<2x64xf32> to vector<2x16xf32>
    %858 = arith.negf %857 : vector<2x16xf32>
    %859 = math.exp %858 : vector<2x16xf32>
    %cst_249 = arith.constant 1.000000e+00 : f32
    %860 = vector.broadcast %cst_249 : f32 to vector<2x16xf32>
    %861 = arith.addf %860, %859 : vector<2x16xf32>
    %862 = arith.divf %860, %861 : vector<2x16xf32>
    %863 = arith.mulf %854, %799 : vector<2x16xf32>
    %864 = arith.mulf %848, %856 : vector<2x16xf32>
    %865 = arith.addf %863, %864 : vector<2x16xf32>
    %866 = math.tanh %865 : vector<2x16xf32>
    %867 = arith.mulf %862, %866 : vector<2x16xf32>
    %868 = arith.truncf %867 : vector<2x16xf32> to vector<2x16xbf16>
    %cst_250 = arith.constant dense<0.000000e+00> : vector<2x64xf32>
    %869 = tpu.matmul %868, %367, %cst_250 {dimension_numbers = #tpu.dot_dimension_numbers<[1], [0], [0], [1], [0, 0, 1, 1], [], []>} : vector<2x16xbf16>, vector<16x64xbf16>, vector<2x64xf32> -> vector<2x64xf32>
    %870 = arith.truncf %833 : vector<2x16xf32> to vector<2x16xbf16>
    %cst_251 = arith.constant dense<0.000000e+00> : vector<2x64xf32>
    %871 = tpu.matmul %870, %369, %cst_251 {dimension_numbers = #tpu.dot_dimension_numbers<[1], [0], [0], [1], [0, 0, 1, 1], [], []>} : vector<2x16xbf16>, vector<16x64xbf16>, vector<2x64xf32> -> vector<2x64xf32>
    %872 = arith.addf %869, %871 : vector<2x64xf32>
    %873 = vector.broadcast %370 : vector<1x64xf32> to vector<2x64xf32>
    %874 = arith.addf %872, %873 : vector<2x64xf32>
    %875 = vector.extract_strided_slice %874 {offsets = [0, 0], sizes = [2, 16], strides = [1, 1]} : vector<2x64xf32> to vector<2x16xf32>
    %876 = arith.negf %875 : vector<2x16xf32>
    %877 = math.exp %876 : vector<2x16xf32>
    %cst_252 = arith.constant 1.000000e+00 : f32
    %878 = vector.broadcast %cst_252 : f32 to vector<2x16xf32>
    %879 = arith.addf %878, %877 : vector<2x16xf32>
    %880 = arith.divf %878, %879 : vector<2x16xf32>
    %881 = vector.extract_strided_slice %874 {offsets = [0, 16], sizes = [2, 16], strides = [1, 1]} : vector<2x64xf32> to vector<2x16xf32>
    %882 = arith.negf %881 : vector<2x16xf32>
    %883 = math.exp %882 : vector<2x16xf32>
    %cst_253 = arith.constant 1.000000e+00 : f32
    %884 = vector.broadcast %cst_253 : f32 to vector<2x16xf32>
    %885 = arith.addf %884, %883 : vector<2x16xf32>
    %886 = arith.divf %884, %885 : vector<2x16xf32>
    %887 = vector.extract_strided_slice %874 {offsets = [0, 32], sizes = [2, 16], strides = [1, 1]} : vector<2x64xf32> to vector<2x16xf32>
    %888 = math.tanh %887 : vector<2x16xf32>
    %889 = vector.extract_strided_slice %874 {offsets = [0, 48], sizes = [2, 16], strides = [1, 1]} : vector<2x64xf32> to vector<2x16xf32>
    %890 = arith.negf %889 : vector<2x16xf32>
    %891 = math.exp %890 : vector<2x16xf32>
    %cst_254 = arith.constant 1.000000e+00 : f32
    %892 = vector.broadcast %cst_254 : f32 to vector<2x16xf32>
    %893 = arith.addf %892, %891 : vector<2x16xf32>
    %894 = arith.divf %892, %893 : vector<2x16xf32>
    %895 = arith.mulf %886, %831 : vector<2x16xf32>
    %896 = arith.mulf %880, %888 : vector<2x16xf32>
    %897 = arith.addf %895, %896 : vector<2x16xf32>
    %898 = math.tanh %897 : vector<2x16xf32>
    %899 = arith.mulf %894, %898 : vector<2x16xf32>
    %c8_i32 = arith.constant 8 : i32
    %c0_255 = arith.constant 0 : index
    %c0_256 = arith.constant 0 : index
    %900 = vector.load %arg25[%c0_255, %c0_256] : memref<16x1xf32, #tpu.memory_space<vmem>>, vector<16x1xf32>
    %901 = arith.truncf %899 : vector<2x16xf32> to vector<2x16xbf16>
    %902 = arith.truncf %900 : vector<16x1xf32> to vector<16x1xbf16>
    %cst_257 = arith.constant dense<0.000000e+00> : vector<2x1xf32>
    %903 = tpu.matmul %901, %902, %cst_257 {dimension_numbers = #tpu.dot_dimension_numbers<[1], [0], [0], [1], [0, 0, 1, 1], [], []>} : vector<2x16xbf16>, vector<16x1xbf16>, vector<2x1xf32> -> vector<2x1xf32>
    %c0_258 = arith.constant 0 : index
    %c0_259 = arith.constant 0 : index
    %904 = vector.load %arg26[%c0_258, %c0_259] : memref<1x1xf32, #tpu.memory_space<vmem>>, vector<1x1xf32>
    %905 = vector.broadcast %904 : vector<1x1xf32> to vector<2x1xf32>
    %906 = arith.addf %903, %905 : vector<2x1xf32>
    %c0_260 = arith.constant 0 : index
    %c0_261 = arith.constant 0 : index
    %907 = vector.load %arg27[%c0_260, %c0_261] : memref<2x1xf32, #tpu.memory_space<vmem>>, vector<2x1xf32>
    tpu.vector_store %arg27[%c0_260, %c0_261], %906 {strides = array<i32>} : memref<2x1xf32, #tpu.memory_space<vmem>>, vector<2x1xf32>,
    return
  }
  func.func @transform_0(%arg0: i32) -> (i32, i32) {
    %c0_i32 = arith.constant 0 : i32
    %c0_i32_0 = arith.constant 0 : i32
    %c0_i32_1 = arith.constant 0 : i32
    return %c0_i32, %c0_i32_0 : i32, i32
  }
  func.func @transform_1(%arg0: i32) -> (i32, i32, i32) {
    %c0_i32 = arith.constant 0 : i32
    %c0_i32_0 = arith.constant 0 : i32
    %c0_i32_1 = arith.constant 0 : i32
    %c0_i32_2 = arith.constant 0 : i32
    return %c0_i32, %c0_i32_0, %c0_i32_1 : i32, i32, i32
  }
  func.func @transform_2(%arg0: i32) -> (i32, i32) {
    %c0_i32 = arith.constant 0 : i32
    %c0_i32_0 = arith.constant 0 : i32
    %c0_i32_1 = arith.constant 0 : i32
    return %c0_i32, %c0_i32_0 : i32, i32
  }
  func.func @transform_3(%arg0: i32) -> (i32, i32) {
    %c0_i32 = arith.constant 0 : i32
    %c0_i32_0 = arith.constant 0 : i32
    %c0_i32_1 = arith.constant 0 : i32
    return %c0_i32, %c0_i32_0 : i32, i32
  }
  func.func @transform_4(%arg0: i32) -> (i32, i32, i32) {
    %c0_i32 = arith.constant 0 : i32
    %c0_i32_0 = arith.constant 0 : i32
    %c0_i32_1 = arith.constant 0 : i32
    %c0_i32_2 = arith.constant 0 : i32
    return %c0_i32, %c0_i32_0, %c0_i32_1 : i32, i32, i32
  }
  func.func @transform_5(%arg0: i32) -> (i32, i32, i32) {
    %c0_i32 = arith.constant 0 : i32
    %c0_i32_0 = arith.constant 0 : i32
    %c0_i32_1 = arith.constant 0 : i32
    %c0_i32_2 = arith.constant 0 : i32
    return %c0_i32, %c0_i32_0, %c0_i32_1 : i32, i32, i32
  }
  func.func @transform_6(%arg0: i32) -> (i32, i32, i32) {
    %c0_i32 = arith.constant 0 : i32
    %c0_i32_0 = arith.constant 0 : i32
    %c0_i32_1 = arith.constant 0 : i32
    %c0_i32_2 = arith.constant 0 : i32
    return %c0_i32, %c0_i32_0, %c0_i32_1 : i32, i32, i32
  }
  func.func @transform_7(%arg0: i32) -> (i32, i32, i32) {
    %c0_i32 = arith.constant 0 : i32
    %c0_i32_0 = arith.constant 0 : i32
    %c0_i32_1 = arith.constant 0 : i32
    %c0_i32_2 = arith.constant 0 : i32
    return %c0_i32, %c0_i32_0, %c0_i32_1 : i32, i32, i32
  }
  func.func @transform_8(%arg0: i32) -> (i32, i32, i32) {
    %c0_i32 = arith.constant 0 : i32
    %c0_i32_0 = arith.constant 0 : i32
    %c0_i32_1 = arith.constant 0 : i32
    %c0_i32_2 = arith.constant 0 : i32
    return %c0_i32, %c0_i32_0, %c0_i32_1 : i32, i32, i32
  }
  func.func @transform_9(%arg0: i32) -> (i32, i32, i32) {
    %c0_i32 = arith.constant 0 : i32
    %c0_i32_0 = arith.constant 0 : i32
    %c0_i32_1 = arith.constant 0 : i32
    %c0_i32_2 = arith.constant 0 : i32
    return %c0_i32, %c0_i32_0, %c0_i32_1 : i32, i32, i32
  }
  func.func @transform_10(%arg0: i32) -> (i32, i32, i32) {
    %c0_i32 = arith.constant 0 : i32
    %c0_i32_0 = arith.constant 0 : i32
    %c0_i32_1 = arith.constant 0 : i32
    %c0_i32_2 = arith.constant 0 : i32
    return %c0_i32, %c0_i32_0, %c0_i32_1 : i32, i32, i32
  }
  func.func @transform_11(%arg0: i32) -> (i32, i32, i32) {
    %c0_i32 = arith.constant 0 : i32
    %c0_i32_0 = arith.constant 0 : i32
    %c0_i32_1 = arith.constant 0 : i32
    %c0_i32_2 = arith.constant 0 : i32
    return %c0_i32, %c0_i32_0, %c0_i32_1 : i32, i32, i32
  }
  func.func @transform_12(%arg0: i32) -> (i32, i32, i32) {
    %c0_i32 = arith.constant 0 : i32
    %c0_i32_0 = arith.constant 0 : i32
    %c0_i32_1 = arith.constant 0 : i32
    %c0_i32_2 = arith.constant 0 : i32
    return %c0_i32, %c0_i32_0, %c0_i32_1 : i32, i32, i32
  }
  func.func @transform_13(%arg0: i32) -> (i32, i32, i32) {
    %c0_i32 = arith.constant 0 : i32
    %c0_i32_0 = arith.constant 0 : i32
    %c0_i32_1 = arith.constant 0 : i32
    %c0_i32_2 = arith.constant 0 : i32
    return %c0_i32, %c0_i32_0, %c0_i32_1 : i32, i32, i32
  }
  func.func @transform_14(%arg0: i32) -> (i32, i32, i32) {
    %c0_i32 = arith.constant 0 : i32
    %c0_i32_0 = arith.constant 0 : i32
    %c0_i32_1 = arith.constant 0 : i32
    %c0_i32_2 = arith.constant 0 : i32
    return %c0_i32, %c0_i32_0, %c0_i32_1 : i32, i32, i32
  }
  func.func @transform_15(%arg0: i32) -> (i32, i32, i32) {
    %c0_i32 = arith.constant 0 : i32
    %c0_i32_0 = arith.constant 0 : i32
    %c0_i32_1 = arith.constant 0 : i32
    %c0_i32_2 = arith.constant 0 : i32
    return %c0_i32, %c0_i32_0, %c0_i32_1 : i32, i32, i32
  }
  func.func @transform_16(%arg0: i32) -> (i32, i32, i32) {
    %c0_i32 = arith.constant 0 : i32
    %c0_i32_0 = arith.constant 0 : i32
    %c0_i32_1 = arith.constant 0 : i32
    %c0_i32_2 = arith.constant 0 : i32
    return %c0_i32, %c0_i32_0, %c0_i32_1 : i32, i32, i32
  }
  func.func @transform_17(%arg0: i32) -> (i32, i32) {
    %c0_i32 = arith.constant 0 : i32
    %c0_i32_0 = arith.constant 0 : i32
    %c0_i32_1 = arith.constant 0 : i32
    return %c0_i32, %c0_i32_0 : i32, i32
  }
  func.func @transform_18(%arg0: i32) -> (i32, i32) {
    %c0_i32 = arith.constant 0 : i32
    %c0_i32_0 = arith.constant 0 : i32
    %c0_i32_1 = arith.constant 0 : i32
    return %c0_i32, %c0_i32_0 : i32, i32
  }
  func.func @transform_19(%arg0: i32) -> (i32, i32) {
    %c0_i32 = arith.constant 0 : i32
    %c0_i32_0 = arith.constant 0 : i32
    %c0_i32_1 = arith.constant 0 : i32
    return %c0_i32, %c0_i32_0 : i32, i32
  }
  func.func @transform_20(%arg0: i32) -> (i32, i32) {
    %c0_i32 = arith.constant 0 : i32
    %c0_i32_0 = arith.constant 0 : i32
    %c0_i32_1 = arith.constant 0 : i32
    return %c0_i32, %c0_i32_0 : i32, i32
  }
  func.func @transform_21(%arg0: i32) -> (i32, i32) {
    %c0_i32 = arith.constant 0 : i32
    %c0_i32_0 = arith.constant 0 : i32
    %c0_i32_1 = arith.constant 0 : i32
    return %c0_i32, %c0_i32_0 : i32, i32
  }
  func.func @transform_22(%arg0: i32) -> (i32, i32) {
    %c0_i32 = arith.constant 0 : i32
    %c0_i32_0 = arith.constant 0 : i32
    %c0_i32_1 = arith.constant 0 : i32
    return %c0_i32, %c0_i32_0 : i32, i32
  }
  func.func @transform_23(%arg0: i32) -> (i32, i32) {
    %c0_i32 = arith.constant 0 : i32
    %c0_i32_0 = arith.constant 0 : i32
    %c0_i32_1 = arith.constant 0 : i32
    return %c0_i32, %c0_i32_0 : i32, i32
  }
  func.func @transform_24(%arg0: i32) -> (i32, i32) {
    %c0_i32 = arith.constant 0 : i32
    %c0_i32_0 = arith.constant 0 : i32
    %c0_i32_1 = arith.constant 0 : i32
    return %c0_i32, %c0_i32_0 : i32, i32
  }
  func.func @transform_25(%arg0: i32) -> (i32, i32) {
    %c0_i32 = arith.constant 0 : i32
    %c0_i32_0 = arith.constant 0 : i32
    %c0_i32_1 = arith.constant 0 : i32
    return %c0_i32, %c0_i32_0 : i32, i32
  }
  func.func @transform_26(%arg0: i32) -> (i32, i32) {
    %c0_i32 = arith.constant 0 : i32
    %c0_i32_0 = arith.constant 0 : i32
    %c0_i32_1 = arith.constant 0 : i32
    return %c0_i32, %c0_i32_0 : i32, i32
  }
}

</mosaic_0001>

<bundles_post_ra>
// kernel: finbert_lsimf_forward.1
= control target key start
LH: loop header
LB: loop body
LE: loop exit
PB: predicated region body
PF: predicated region fallthrough
CT: control target
= control target key end

     0   :  { %vm90_vm0 = vcmask 261120   ;;  %v4717_v14 = vmov 0.0   ;;  %vm4718_vm1 = vmmov 0   ;;  %s5756_s30 = smov 96   ;;  %vm203_vm2 = vcmask 130048   ;;  %s5754_s27 = smov 64   ;;  %s5712_s0 = inlined_call_operand.vmem [shape: f32[16,32], index: 0, kind: input, shape index: {}]   ;;  %s5713_s4 = inlined_call_operand.vmem [shape: f32[2,32,96], index: 4, kind: input, shape index: {}]   ;;  %s5714_s2 = inlined_call_operand.vmem [shape: f32[1,32], index: 2, kind: input, shape index: {}]   ;;  %s5715_s3 = inlined_call_operand.vmem [shape: f32[1,32], index: 3, kind: input, shape index: {}]   ;;  %s5716_s5 = inlined_call_operand.vmem [shape: f32[2,1,96], index: 5, kind: input, shape index: {}]   ;;  %s5717_s1 = inlined_call_operand.vmem [shape: f32[2,1,8], index: 1, kind: input, shape index: {}]   ;;  %s5718_s6 = inlined_call_operand.vmem [shape: f32[2,32,32], index: 6, kind: input, shape index: {}]   ;;  %s5719_s7 = inlined_call_operand.vmem [shape: f32[2,1,32], index: 7, kind: input, shape index: {}]   ;;  %s5720_s10 = inlined_call_operand.vmem [shape: f32[2,32,64], index: 10, kind: input, shape index: {}]   ;;  %s5721_s8 = inlined_call_operand.vmem [shape: f32[2,1,32], index: 8, kind: input, shape index: {}]   ;;  %s5722_s9 = inlined_call_operand.vmem [shape: f32[2,1,32], index: 9, kind: input, shape index: {}]   ;;  %s5723_s12 = inlined_call_operand.vmem [shape: f32[2,64,32], index: 12, kind: input, shape index: {}]   ;;  %s5724_s11 = inlined_call_operand.vmem [shape: f32[2,1,64], index: 11, kind: input, shape index: {}]   ;;  %s5725_s13 = inlined_call_operand.vmem [shape: f32[2,1,32], index: 13, kind: input, shape index: {}]   ;;  %s5726_s14 = inlined_call_operand.vmem [shape: f32[2,1,32], index: 14, kind: input, shape index: {}]   ;;  %s5727_s15 = inlined_call_operand.vmem [shape: f32[2,1,32], index: 15, kind: input, shape index: {}]   ;;  %s5728_s18 = inlined_call_operand.vmem [shape: f32[32,64], index: 18, kind: input, shape index: {}]   ;;  %s5729_s17 = inlined_call_operand.vmem [shape: f32[4,64], index: 17, kind: input, shape index: {}]   ;;  %s5730_s16 = inlined_call_operand.vmem [shape: f32[8,2,4], index: 16, kind: input, shape index: {}]   ;;  %s5731_s19 = inlined_call_operand.vmem [shape: f32[16,64], index: 19, kind: input, shape index: {}]   ;;  %s5732_s20 = inlined_call_operand.vmem [shape: f32[1,64], index: 20, kind: input, shape index: {}]   ;;  %s5733_s22 = inlined_call_operand.vmem [shape: f32[16,64], index: 22, kind: input, shape index: {}]   ;;  %s5734_s21 = inlined_call_operand.vmem [shape: f32[16,64], index: 21, kind: input, shape index: {}]   ;;  %s5735_s23 = inlined_call_operand.vmem [shape: f32[1,64], index: 23, kind: input, shape index: {}]   ;;  %s5736_s24 = inlined_call_operand.vmem [shape: f32[16,1], index: 24, kind: input, shape index: {}]   ;;  %s5737_s25 = inlined_call_operand.<no memory space> [shape: f32[1,1], index: 25, kind: input, shape index: {}]   ;;  %s5738_s26 = inlined_call_operand.vmem [shape: f32[2,1], index: 26, kind: output, shape index: {}]  }
   0x1   :  { %5758 = sst [smem:[#allocation3_spill]] %s5712_s0  ;;  %4096 = vmatprep.subr.bf16.mxu0 %v4717_v14  ;;  %4100 = vmatprep.mubr.msk.bf16.mxu0 %vm4718_vm1, %v4717_v14  ;;  %vm315_vm3 = vcmask 64512   ;;  %vm345_vm4 = vcmask 1043456   ;;  %s5748_s28 = smov 48   ;;  %vm904_vm5 = vcmask 523264   ;;  %vm1853_vm6 = vcmask 1040384  }
   0x2   :  { %5759 = sst [smem:[#allocation4_spill]] %s5713_s4  ;;  %4104 = vmatprep.subr.bf16.mxu1 %v4717_v14  ;;  %4106 = vmatprep.mubr.msk.bf16.mxu1 %vm4718_vm1, %v4717_v14  ;;  %vm1930_vm7 = vcmask 1041408   ;;  %vm1926_vm8 = vcmask 31744   ;;  %vm3827_vm9 = vcmask 1024  }
   0x3   :  { %5760 = sst [smem:[#allocation5_spill]] %s5714_s2  ;;  %s5771_s0 = sld [smem:[#allocation4_spill]] }
   0x4   :  { %5761 = sst [smem:[#allocation6_spill]] %s5715_s3  ;;  %s5772_s4 = sld [smem:[#allocation5_spill]] }
   0x5   :  { %5762 = sst [smem:[#allocation7_spill]] %s5716_s5  ;;  %s5785_s5 = smov 48  }
   0x6   :  { %5763 = sst [smem:[#allocation8_spill]] %s5717_s1 }
   0x7   :  { %5764 = sst [smem:[#allocation9_spill]] %s5718_s6 }
   0x8   :  { %5765 = sst [smem:[#allocation10_spill]] %s5719_s7  ;;  %s5770_s7 = sld [smem:[#allocation3_spill]] }
   0x9   :  { %5766 = sst [smem:[#allocation11_spill]] %s5720_s10  ;;  %v136_v15 = vld [vmem:[%s5771_s0] sm:$0xff]  ;;  %v137_v16 = vld [vmem:[%s5771_s0 + $0x8] sm:$0xff]  ;;  %v138_v17 = vld [vmem:[%s5771_s0 + $0x10] sm:$0xff]  ;;  %s5773_s10 = sld [smem:[#allocation6_spill]] }
   0xa   :  { %5767 = sst [smem:[#allocation12_spill]] %s5721_s8  ;;  %v141_v18 = vpack.c.bf16 %v137_v16, %v136_v15  ;;  %v139_v19 = vld [vmem:[%s5771_s0 + $0x18] sm:$0xff]  ;;  %v3833_v29 = vld [vmem:[%s5772_s4] ss:$0 sm:$0xff]  ;;  %s5774_s8 = sld [smem:[#allocation7_spill]] }
   0xb   :  { %5768 = sst [smem:[#allocation13_spill]] %s5722_s9  ;;  %v142_v20 = vpack.c.bf16 %v139_v19, %v138_v17  ;;  %s5775_s9 = sld [smem:[#allocation8_spill]] }
   0xc   :  { %5769 = sst [smem:[#allocation14_spill]] %s5738_s26  ;;  %4097 = vmatpush3.bf16.msra.mxu0 %v141_v18  ;;  %s5752_s4 = smov 80  }
   0xd   :  { %4098 = vmatprep.subr.bf16.mxu0 %v4717_v14  ;;  %s5776_s29 = sld [smem:[#allocation9_spill]]  ;;  %s5777_s2 = sld [smem:[#allocation10_spill]] }
   0xe   :  { %v86_v0 = vld [vmem:[%s5770_s7] sm:$0xff]  ;;  %v87_v1 = vld [vmem:[%s5770_s7 + $0x8] sm:$0xff]  ;;  %s5750_s7 = smov 112   ;;  %s5778_s3 = sld [smem:[#allocation11_spill]] }
   0xf   :  { %v91_v2 = vsel %vm90_vm0, %v86_v0, 0.0  ;;  %v94_v3 = vsel %vm90_vm0, %v87_v1, 0.0  ;;  %v3834_v33 = vld [vmem:[%s5773_s10] ss:$0 sm:$0xff]  ;;  %s5779_s6 = sld [smem:[#allocation12_spill]]  ;;  %s5780_s10 = sld [smem:[#allocation13_spill]] }
  0x10   :  { %92 = vadd.xlane.f32.xlu0 %v91_v2  ;;  %4099 = vmatpush3.bf16.msra.mxu0 %v142_v20  ;;  %v3835_v38 = vld [vmem:[%s5774_s8] ss:$0 sm:$0xff]  ;;  %s5783_s26 = smov 80  }
  0x11   :  { %4110 = vmatprep.subr.bf16.mxu0 %v4717_v14  ;;  %v4933_v52 = vld [vmem:[%s5775_s9] ss:$0 sm:$0xff]  ;;  %v4938_v57 = vld [vmem:[%s5775_s9 + $0x1] ss:$0 sm:$0xff] }
  0x14   :  { %95 = vadd.xlane.f32.xlu0 %v94_v3 }
  0x9d   :  { %v93_v4 = vpop.xlane.xlu0 %92 }
  0x9e   :  { %v98_v5 = vmul.f32 0.03125, %v93_v4 }
  0xa0   :  { %v100_v6 = vsub.f32 %v86_v0, %v98_v5 }
  0xa1   :  { %v96_v7 = vpop.xlane.xlu0 %95 }
  0xa2   :  { %v99_v8 = vmul.f32 0.03125, %v96_v7  ;;  %v102_v9 = vmul.f32 %v100_v6, %v100_v6 }
  0xa4   :  { %v101_v10 = vsub.f32 %v87_v1, %v99_v8  ;;  %v104_v11 = vsel %vm90_vm0, %v102_v9, 0.0 }
  0xa5   :  { %105 = vadd.xlane.f32.xlu1 %v104_v11 }
  0xa6   :  { %v103_v12 = vmul.f32 %v101_v10, %v101_v10 }
  0xa8   :  { %v107_v13 = vsel %vm90_vm0, %v103_v12, 0.0 }
  0xa9   :  { %108 = vadd.xlane.f32.xlu1 %v107_v13 }
 0x132   :  { %v106_v21 = vpop.xlane.xlu1 %105 }
 0x133   :  { %v110_v22 = vmul.f32 0.03125, %v106_v21 }
 0x135   :  { %v112_v23 = vadd.f32 1e-12, %v110_v22 }
 0x136   :  { %v109_v24 = vpop.xlane.xlu1 %108 }
 0x137   :  { %4528 = vrsqrt.f32 %v112_v23  ;;  %v111_v25 = vmul.f32 0.03125, %v109_v24 }
 0x139   :  { %v113_v26 = vadd.f32 1e-12, %v111_v25 }
 0x13b   :  { %4530 = vrsqrt.f32 %v113_v26 }
 0x141   :  { %v4529_v27 = vpop.eup %4528 }
 0x142   :  { %v116_v28 = vmul.f32 %v4529_v27, %v100_v6 }
 0x144   :  { %v124_v32 = vmul.f32 %v3833_v29, %v116_v28 }
 0x145   :  { %v4531_v30 = vpop.eup %4530 }
 0x146   :  { %v117_v31 = vmul.f32 %v4531_v30, %v101_v10  ;;  %v4898_v35 = vadd.f32 %v3834_v33, %v124_v32 }
 0x148   :  { %v125_v34 = vmul.f32 %v3833_v29, %v117_v31 }
 0x14a   :  { %v4900_v36 = vadd.f32 %v3834_v33, %v125_v34 }
 0x14c   :  { %v140_v37 = vpack.c.bf16 %v4900_v36, %v4898_v35 }
 0x14e   :  { %4101 = vmatmul.mubr.msk.bf16.vlgmr.msra.gmra.mrb[0].mxu0 %vm90_vm0, %v140_v37 }
 0x14f   :  { %4112 = vmatprep.mubr.msk.bf16.mxu0 %vm4718_vm1, %v4717_v14 }
 0x221   :  { %v187_v39 = vpop.f32.mrb[0].mxu0 }
 0x222   :  { %v188_v40 = vadd.f32 %v3835_v38, %v187_v39  ;;  %v4102_v41 = vpop.f32.mrb[1].mxu0 }
 0x223   :  { %v190_v42 = vpop.f32.mrb[2].mxu0 }
 0x224   :  { %v4910_v43 = vpack.c.bf16 %v188_v40, %v188_v40  ;;  %v191_v44 = vadd.f32 %v3835_v38, %v190_v42  ;;  %v4103_v45 = vpop.f32.mrb[3].mxu0 }
 0x226   :  { %v4912_v46 = vpack.c.bf16 %v191_v44, %v191_v44  ;;  %201 = vrot.lane.b32.xlu0 %v4910_v43, %s5756_s30 }
 0x228   :  { %251 = vrot.lane.b32.xlu1 %v4912_v46, %s5756_s30 }
 0x298   :  { %v202_v47 = vpop.permute.xlu0 %201 }
 0x299   :  { %v208_v48 = vsel %vm203_vm2, %v202_v47, 0 }
 0x29a   :  { %4105 = vmatpush3.bf16.xpose.msra.mxu1 %v208_v48  ;;  %v252_v49 = vpop.permute.xlu1 %251 }
 0x29b   :  { %v257_v50 = vsel %vm203_vm2, %v252_v49, 0  ;;  %4116 = vmatprep.subr.bf16.mxu1 %v4717_v14 }
 0x29c   :  { %4111 = vmatpush3.bf16.xpose.msra.mxu0 %v257_v50 }
 0x29d   :  { %4122 = vmatprep.subr.bf16.mxu0 %v4717_v14 }
 0x2a1   :  { %4107 = vmatmul.mubr.msk.bf16.vlgmr.msra.gmra.mrb[0].mxu1 %vm203_vm2, %v4910_v43 }
 0x2a2   :  { %4118 = vmatprep.mubr.msk.bf16.mxu1 %vm4718_vm1, %v4717_v14 }
 0x2a3   :  { %4113 = vmatmul.mubr.msk.bf16.vlgmr.msra.gmra.mrb[4].mxu0 %vm203_vm2, %v4912_v46 }
 0x2a4   :  { %4124 = vmatprep.mubr.msk.bf16.mxu0 %vm4718_vm1, %v4717_v14 }
 0x374   :  { %v244_v51 = vpop.f32.mrb[0].mxu1 }
 0x375   :  { %v299_v53 = vmul.f32 0.25, %v244_v51  ;;  %v4108_v54 = vpop.f32.mrb[1].mxu1 }
 0x376   :  { %v247_v55 = vpop.f32.mrb[2].mxu1  ;;  %v293_v56 = vpop.f32.mrb[4].mxu0 }
 0x377   :  { %v300_v58 = vmul.f32 0.25, %v293_v56  ;;  %v4109_v59 = vpop.f32.mrb[3].mxu1  ;;  %v4114_v60 = vpop.f32.mrb[5].mxu0  ;;  %v313_v61 = vadd.f32 %v4933_v52, %v299_v53 }
 0x378   :  { %v296_v62 = vpop.f32.mrb[6].mxu0 }
 0x379   :  { %v4115_v63 = vpop.f32.mrb[7].mxu0  ;;  %v316_v0 = vsel %vm315_vm3, %v313_v61, -inf  ;;  %v314_v1 = vadd.f32 %v4938_v57, %v300_v58 }
 0x37a   :  { %317 = vmax.xlane.f32.xlu1 %v316_v0 }
 0x37b   :  { %v319_v2 = vsel %vm315_vm3, %v314_v1, -inf }
 0x37c   :  { %320 = vmax.xlane.f32.xlu0 %v319_v2 }
 0x38b   :  { %389 = vrot.lane.b32.xlu1 %v4912_v46, %s5754_s27 }
 0x38f   :  { %441 = vrot.lane.b32.xlu1 %v4910_v43, %s5752_s4 }
 0x407   :  { %v318_v3 = vpop.xlane.xlu1 %317 }
 0x408   :  { %v322_v4 = vsub.f32 %v313_v61, %v318_v3 }
 0x409   :  { %v321_v5 = vpop.xlane.xlu0 %320 }
 0x40a   :  { %v324_v6 = vmul.f32 1.442695, %v322_v4  ;;  %v323_v7 = vsub.f32 %v314_v1, %v321_v5 }
 0x40b   :  { %v390_v8 = vpop.permute.xlu1 %389 }
 0x40c   :  { %4532 = vpow2.f32 %v324_v6  ;;  %v326_v9 = vmul.f32 1.442695, %v323_v7  ;;  %v395_v10 = vsel %vm345_vm4, %v390_v8, 0 }
 0x40d   :  { %4123 = vmatpush3.bf16.msra.mxu0 %v395_v10 }
 0x40e   :  { %4534 = vpow2.f32 %v326_v9  ;;  %4134 = vmatprep.subr.bf16.mxu0 %v4717_v14 }
 0x40f   :  { %v442_v16 = vpop.permute.xlu1 %441 }
 0x410   :  { %v447_v27 = vsel %vm203_vm2, %v442_v16, 0  ;;  %v194_v16 = vld [vmem:[%s5776_s29] sm:$0xff] }
 0x416   :  { %v4533_v11 = vpop.eup %4532 }
 0x417   :  { %v328_v12 = vsel %vm315_vm3, %v4533_v11, 0.0 }
 0x418   :  { %v4535_v13 = vpop.eup %4534  ;;  %329 = vadd.xlane.f32.xlu0 %v328_v12 }
 0x419   :  { %v331_v15 = vsel %vm315_vm3, %v4535_v13, 0.0 }
 0x41a   :  { %332 = vadd.xlane.f32.xlu1 %v331_v15 }
 0x42b   :  { %491 = vrot.lane.b32.xlu1 %v4912_v46, %s5752_s4 }
 0x42e   :  { %340 = vrot.lane.b32.xlu0 %v4910_v43, %s5754_s27  ;;  %s5781_s27 = smov 96  }
 0x42f   :  { %489 = vrot.lane.b32.xlu1 %v4912_v46, %s5750_s7 }
 0x432   :  { %439 = vrot.lane.b32.xlu0 %v4910_v43, %s5750_s7  ;;  %s5784_s7 = smov 112  }
 0x4a5   :  { %v330_v17 = vpop.xlane.xlu0 %329 }
 0x4a6   :  { %4536 = vrcp.f32 %v330_v17 }
 0x4a7   :  { %v333_v18 = vpop.xlane.xlu1 %332 }
 0x4a8   :  { %4538 = vrcp.f32 %v333_v18 }
 0x4a9   :  { %v341_v19 = vpop.permute.xlu0 %340 }
 0x4aa   :  { %v347_v20 = vsel %vm345_vm4, %v341_v19, 0 }
 0x4ab   :  { %4117 = vmatpush3.bf16.msra.mxu1 %v347_v20  ;;  %v492_v26 = vpop.permute.xlu1 %491 }
 0x4ac   :  { %4128 = vmatprep.subr.bf16.mxu1 %v4717_v14  ;;  %v497_v29 = vsel %vm203_vm2, %v492_v26, 0 }
 0x4ad   :  { %v440_v30 = vpop.permute.xlu0 %439 }
 0x4af   :  { %v490_v31 = vpop.permute.xlu1 %489 }
 0x4b0   :  { %v4537_v21 = vpop.eup %4536 }
 0x4b1   :  { %v335_v22 = vmul.f32 %v4537_v21, %v4533_v11  ;;  %v196_v21 = vld [vmem:[%s5776_s29 + $0x10] sm:$0xff] }
 0x4b2   :  { %v4539_v23 = vpop.eup %4538 }
 0x4b3   :  { %v338_v24 = vpack.c.bf16 %v335_v22, %v335_v22  ;;  %v337_v25 = vmul.f32 %v4539_v23, %v4535_v13  ;;  %v197_v22 = vld [vmem:[%s5776_s29 + $0x18] sm:$0xff] }
 0x4b4   :  { %v664_v23 = vpack.c.bf16 %v197_v22, %v196_v21  ;;  %v884_v22 = vld [vmem:[%s5723_s12] sm:$0xff] }
 0x4b5   :  { %4119 = vmatmul.mubr.msk.bf16.vlgmr.msra.gmra.mrb[4].mxu1 %vm315_vm3, %v338_v24  ;;  %v339_v28 = vpack.c.bf16 %v337_v25, %v337_v25 }
 0x4b6   :  { %4129 = vmatpush3.bf16.xpose.msra.mxu1 %v447_v27  ;;  %4130 = vmatprep.mubr.msk.bf16.mxu1 %vm4718_vm1, %v4717_v14 }
 0x4b7   :  { %4125 = vmatmul.mubr.msk.bf16.vlgmr.msra.gmra.mrb[8].mxu0 %vm315_vm3, %v339_v28  ;;  %4140 = vmatprep.subr.bf16.mxu1 %v4717_v14 }
 0x4b8   :  { %4135 = vmatpush3.bf16.xpose.msra.mxu0 %v497_v29  ;;  %4136 = vmatprep.mubr.msk.bf16.mxu0 %vm4718_vm1, %v4717_v14 }
 0x4b9   :  { %4146 = vmatprep.subr.bf16.mxu0 %v4717_v14 }
 0x4bd   :  { %4131 = vmatmul.mubr.msk.bf16.vlgmr.msra.gmra.mrb[8].mxu1 %vm203_vm2, %v440_v30 }
 0x4be   :  { %4142 = vmatprep.mubr.msk.bf16.mxu1 %vm4718_vm1, %v4717_v14 }
 0x4bf   :  { %4137 = vmatmul.mubr.msk.bf16.vlgmr.msra.gmra.mrb[12].mxu0 %vm203_vm2, %v490_v31 }
 0x4c0   :  { %4148 = vmatprep.mubr.msk.bf16.mxu0 %vm4718_vm1, %v4717_v14 }
 0x588   :  { %v4978_v32 = vpop.f32.mrb[4].mxu1 }
 0x589   :  { %v4120_v33 = vpop.f32.mrb[5].mxu1 }
 0x58a   :  { %v386_v34 = vpop.f32.mrb[6].mxu1  ;;  %v4980_v37 = vpop.f32.mrb[8].mxu0 }
 0x58b   :  { %v437_v38 = vpack.c.bf16 %v4980_v37, %v4978_v32  ;;  %v4121_v39 = vpop.f32.mrb[7].mxu1  ;;  %v4126_v40 = vpop.f32.mrb[9].mxu0 }
 0x58c   :  { %v434_v41 = vpop.f32.mrb[10].mxu0  ;;  %v3849_v40 = vld [vmem:[%s5777_s2] ss:$0 sm:$0xff] }
 0x58d   :  { %v4127_v42 = vpop.f32.mrb[11].mxu0 }
 0x590   :  { %v483_v44 = vpop.f32.mrb[8].mxu1 }
 0x591   :  { %v539_v45 = vmul.f32 0.25, %v483_v44  ;;  %v4132_v47 = vpop.f32.mrb[9].mxu1 }
 0x592   :  { %v486_v48 = vpop.f32.mrb[10].mxu1  ;;  %v533_v49 = vpop.f32.mrb[12].mxu0 }
 0x593   :  { %v540_v50 = vmul.f32 0.25, %v533_v49  ;;  %v4133_v51 = vpop.f32.mrb[11].mxu1  ;;  %v4138_v53 = vpop.f32.mrb[13].mxu0  ;;  %v541_v54 = vadd.f32 %v4933_v52, %v539_v45 }
 0x594   :  { %v536_v55 = vpop.f32.mrb[14].mxu0 }
 0x595   :  { %v4139_v56 = vpop.f32.mrb[15].mxu0  ;;  %v543_v58 = vsel %vm315_vm3, %v541_v54, -inf  ;;  %v542_v59 = vadd.f32 %v4938_v57, %v540_v50 }
 0x596   :  { %544 = vmax.xlane.f32.xlu0 %v543_v58 }
 0x597   :  { %v546_v60 = vsel %vm315_vm3, %v542_v59, -inf }
 0x598   :  { %547 = vmax.xlane.f32.xlu1 %v546_v60 }
 0x5a9   :  { %615 = vrot.lane.b32.xlu1 %v4912_v46, %s5748_s28 }
 0x623   :  { %v545_v61 = vpop.xlane.xlu0 %544 }
 0x624   :  { %v549_v62 = vsub.f32 %v541_v54, %v545_v61 }
 0x625   :  { %v548_v63 = vpop.xlane.xlu1 %547 }
 0x626   :  { %v551_v0 = vmul.f32 1.442695, %v549_v62  ;;  %v550_v1 = vsub.f32 %v542_v59, %v548_v63 }
 0x628   :  { %4540 = vpow2.f32 %v551_v0  ;;  %v553_v2 = vmul.f32 1.442695, %v550_v1  ;;  %v809_v1 = vld [vmem:[%s5778_s3 + $0x8] sm:$0xff] }
 0x629   :  { %v616_v3 = vpop.permute.xlu1 %615 }
 0x62a   :  { %4542 = vpow2.f32 %v553_v2  ;;  %v621_v4 = vsel %vm345_vm4, %v616_v3, 0  ;;  %v810_v3 = vld [vmem:[%s5778_s3 + $0x10] sm:$0xff] }
 0x62b   :  { %4147 = vmatpush3.bf16.msra.mxu0 %v621_v4  ;;  %v811_v4 = vld [vmem:[%s5778_s3 + $0x18] sm:$0xff] }
 0x62c   :  { %4158 = vmatprep.subr.bf16.mxu0 %v4717_v14 }
 0x632   :  { %v4541_v5 = vpop.eup %4540 }
 0x633   :  { %v555_v6 = vsel %vm315_vm3, %v4541_v5, 0.0 }
 0x634   :  { %v4543_v7 = vpop.eup %4542  ;;  %556 = vadd.xlane.f32.xlu0 %v555_v6 }
 0x635   :  { %v558_v46 = vsel %vm315_vm3, %v4543_v7, 0.0 }
 0x638   :  { %559 = vadd.xlane.f32.xlu0 %v558_v46 }
 0x64e   :  { %567 = vrot.lane.b32.xlu0 %v4910_v43, %s5748_s28  ;;  %v195_v43 = vld [vmem:[%s5776_s29 + $0x8] sm:$0xff] }
 0x64f   :  { %v438_v19 = vpack.c.bf16 %v195_v43, %v194_v16 }
 0x6c1   :  { %v557_v8 = vpop.xlane.xlu0 %556 }
 0x6c2   :  { %4544 = vrcp.f32 %v557_v8 }
 0x6c5   :  { %v560_v9 = vpop.xlane.xlu0 %559 }
 0x6c6   :  { %4546 = vrcp.f32 %v560_v9 }
 0x6c9   :  { %v568_v10 = vpop.permute.xlu0 %567 }
 0x6ca   :  { %v573_v11 = vsel %vm345_vm4, %v568_v10, 0 }
 0x6cb   :  { %4141 = vmatpush3.bf16.msra.mxu1 %v573_v11 }
 0x6cc   :  { %v4545_v12 = vpop.eup %4544  ;;  %4152 = vmatprep.subr.bf16.mxu1 %v4717_v14 }
 0x6cd   :  { %v562_v13 = vmul.f32 %v4545_v12, %v4541_v5  ;;  %v814_v5 = vpack.c.bf16 %v811_v4, %v810_v3  ;;  %v3850_v12 = vld [vmem:[%s5779_s6] ss:$0 sm:$0xff] }
 0x6cf   :  { %v565_v15 = vpack.c.bf16 %v562_v13, %v562_v13 }
 0x6d0   :  { %v4547_v17 = vpop.eup %4546 }
 0x6d1   :  { %4143 = vmatmul.mubr.msk.bf16.vlgmr.msra.gmra.mrb[12].mxu1 %vm315_vm3, %v565_v15  ;;  %v564_v18 = vmul.f32 %v4547_v17, %v4543_v7  ;;  %v3851_v17 = vld [vmem:[%s5780_s10] ss:$0 sm:$0xff] }
 0x6d2   :  { %4154 = vmatprep.mubr.msk.bf16.mxu1 %vm4718_vm1, %v4717_v14  ;;  %4153 = vmatpush3.bf16.msra.mxu1 %v664_v23  ;;  %v885_v23 = vld [vmem:[%s5723_s12 + $0x8] sm:$0xff] }
 0x6d3   :  { %v566_v20 = vpack.c.bf16 %v564_v18, %v564_v18  ;;  %4164 = vmatprep.subr.bf16.mxu1 %v4717_v14 }
 0x6d5   :  { %4149 = vmatmul.mubr.msk.bf16.vlgmr.msra.gmra.mrb[16].mxu0 %vm315_vm3, %v566_v20 }
 0x6d6   :  { %4159 = vmatpush3.bf16.msra.mxu0 %v438_v19  ;;  %4160 = vmatprep.mubr.msk.bf16.mxu0 %vm4718_vm1, %v4717_v14 }
 0x6d7   :  { %4172 = vmatprep.subr.bf16.mxu0 %v4717_v14 }
 0x6dd   :  { %4161 = vmatmul.mubr.msk.bf16.vlgmr.msra.gmra.mrb[20].mxu0 %vm203_vm2, %v437_v38 }
 0x6de   :  { %4180 = vmatprep.mubr.msk.bf16.mxu0 %vm4718_vm1, %v4717_v14 }
 0x7a4   :  { %v609_v24 = vpop.f32.mrb[12].mxu1 }
 0x7a5   :  { %v4144_v25 = vpop.f32.mrb[13].mxu1 }
 0x7a6   :  { %v612_v26 = vpop.f32.mrb[14].mxu1  ;;  %v893_v25 = vpack.c.bf16 %v885_v23, %v884_v22  ;;  %v3860_v23 = vld [vmem:[%s5771_s0 + $0x30] sm:$0xff] }
 0x7a7   :  { %v4145_v27 = vpop.f32.mrb[15].mxu1  ;;  %v887_v26 = vld [vmem:[%s5723_s12 + $0x18] sm:$0xff] }
 0x7a8   :  { %v657_v28 = vpop.f32.mrb[16].mxu0  ;;  %4173 = vmatpush3.bf16.msra.mxu0 %v893_v25 }
 0x7a9   :  { %v663_v29 = vpack.c.bf16 %v657_v28, %v609_v24  ;;  %v4150_v30 = vpop.f32.mrb[17].mxu0  ;;  %v886_v24 = vld [vmem:[%s5723_s12 + $0x10] sm:$0xff]  ;;  %4174 = vmatprep.subr.bf16.mxu0 %v4717_v14  ;;  %v888_v28 = vld [vmem:[%s5723_s12 + $0x20] sm:$0xff] }
 0x7aa   :  { %v660_v31 = vpop.f32.mrb[18].mxu0  ;;  %v894_v27 = vpack.c.bf16 %v887_v26, %v886_v24  ;;  %v3861_v24 = vld [vmem:[%s5771_s0 + $0x38] sm:$0xff] }
 0x7ab   :  { %v4151_v32 = vpop.f32.mrb[19].mxu0  ;;  %4155 = vmatmul.mubr.msk.bf16.vlgmr.msra.gmra.mrb[16].mxu1 %vm203_vm2, %v663_v29  ;;  %v889_v29 = vld [vmem:[%s5723_s12 + $0x28] sm:$0xff]  ;;  %v890_v31 = vld [vmem:[%s5723_s12 + $0x30] sm:$0xff]  ;;  %v1002_v25 = vpack.c.bf16 %v3861_v24, %v3860_v23 }
 0x7ac   :  { %4168 = vmatprep.mubr.msk.bf16.mxu1 %vm4718_vm1, %v4717_v14  ;;  %4175 = vmatpush3.bf16.msra.mxu0 %v894_v27  ;;  %v895_v30 = vpack.c.bf16 %v889_v29, %v888_v28  ;;  %v891_v32 = vld [vmem:[%s5723_s12 + $0x38] sm:$0xff] }
 0x7ad   :  { %4176 = vmatprep.subr.bf16.mxu0 %v4717_v14 }
 0x7b0   :  { %v746_v33 = vpop.f32.mrb[20].mxu0  ;;  %4177 = vmatpush3.bf16.msra.mxu0 %v895_v30 }
 0x7b1   :  { %v4162_v34 = vpop.f32.mrb[21].mxu0  ;;  %4178 = vmatprep.subr.bf16.mxu0 %v4717_v14 }
 0x7b2   :  { %v749_v37 = vpop.f32.mrb[22].mxu0  ;;  %v3852_v34 = vld [vmem:[%s5724_s11] ss:$0 sm:$0xff] }
 0x7b3   :  { %v4163_v38 = vpop.f32.mrb[23].mxu0 }
 0x87e   :  { %v702_v39 = vpop.f32.mrb[16].mxu1 }
 0x87f   :  { %v747_v41 = vadd.f32 %v746_v33, %v702_v39  ;;  %v4156_v42 = vpop.f32.mrb[17].mxu1  ;;  %v896_v33 = vpack.c.bf16 %v891_v32, %v890_v31 }
 0x880   :  { %v705_v44 = vpop.f32.mrb[18].mxu1 }
 0x881   :  { %v760_v45 = vadd.f32 %v3849_v40, %v747_v41  ;;  %v750_v47 = vadd.f32 %v749_v37, %v705_v44  ;;  %v4157_v48 = vpop.f32.mrb[19].mxu1  ;;  %4179 = vmatpush3.bf16.msra.mxu0 %v896_v33  ;;  %v3856_v33 = vld [vmem:[%s5726_s14] ss:$0 sm:$0xff] }
 0x882   :  { %4198 = vmatprep.subr.bf16.mxu0 %v4717_v14 }
 0x883   :  { %v761_v49 = vadd.f32 %v3849_v40, %v750_v47  ;;  %v762_v50 = vadd.f32 %v760_v45, %v4898_v35 }
 0x885   :  { %v766_v51 = vsel %vm90_vm0, %v762_v50, 0.0  ;;  %v763_v53 = vadd.f32 %v761_v49, %v4900_v36  ;;  %v808_v36 = vld [vmem:[%s5778_s3] sm:$0xff] }
 0x886   :  { %767 = vadd.xlane.f32.xlu1 %v766_v51  ;;  %v813_v2 = vpack.c.bf16 %v809_v1, %v808_v36  ;;  %v3854_v36 = vld [vmem:[%s5725_s13] ss:$0 sm:$0xff] }
 0x887   :  { %v769_v54 = vsel %vm90_vm0, %v763_v53, 0.0 }
 0x888   :  { %770 = vadd.xlane.f32.xlu0 %v769_v54  ;;  %4165 = vmatpush3.bf16.msra.mxu1 %v813_v2 }
 0x889   :  { %4166 = vmatprep.subr.bf16.mxu1 %v4717_v14 }
 0x88c   :  { %4167 = vmatpush3.bf16.msra.mxu1 %v814_v5 }
 0x88d   :  { %4184 = vmatprep.subr.bf16.mxu1 %v4717_v14 }
 0x913   :  { %v768_v55 = vpop.xlane.xlu1 %767 }
 0x914   :  { %v772_v56 = vmul.f32 0.03125, %v768_v55 }
 0x915   :  { %v771_v58 = vpop.xlane.xlu0 %770 }
 0x916   :  { %v774_v59 = vsub.f32 %v762_v50, %v772_v56  ;;  %v773_v60 = vmul.f32 0.03125, %v771_v58 }
 0x918   :  { %v775_v61 = vsub.f32 %v763_v53, %v773_v60  ;;  %v776_v62 = vmul.f32 %v774_v59, %v774_v59 }
 0x91a   :  { %v778_v63 = vsel %vm90_vm0, %v776_v62, 0.0  ;;  %v777_v0 = vmul.f32 %v775_v61, %v775_v61 }
 0x91b   :  { %779 = vadd.xlane.f32.xlu0 %v778_v63 }
 0x91c   :  { %v781_v35 = vsel %vm90_vm0, %v777_v0, 0.0 }
 0x91d   :  { %782 = vadd.xlane.f32.xlu1 %v781_v35 }
 0x9a8   :  { %v780_v6 = vpop.xlane.xlu0 %779 }
 0x9a9   :  { %v784_v7 = vmul.f32 0.03125, %v780_v6 }
 0x9aa   :  { %v783_v46 = vpop.xlane.xlu1 %782 }
 0x9ab   :  { %v786_v8 = vadd.f32 1e-12, %v784_v7  ;;  %v785_v9 = vmul.f32 0.03125, %v783_v46 }
 0x9ad   :  { %4548 = vrsqrt.f32 %v786_v8  ;;  %v787_v10 = vadd.f32 1e-12, %v785_v9 }
 0x9af   :  { %4550 = vrsqrt.f32 %v787_v10 }
 0x9b7   :  { %v4549_v11 = vpop.eup %4548 }
 0x9b8   :  { %v790_v13 = vmul.f32 %v4549_v11, %v774_v59 }
 0x9b9   :  { %v4551_v15 = vpop.eup %4550 }
 0x9ba   :  { %v798_v16 = vmul.f32 %v3850_v12, %v790_v13  ;;  %v791_v43 = vmul.f32 %v4551_v15, %v775_v61 }
 0x9bc   :  { %v799_v18 = vmul.f32 %v3850_v12, %v791_v43  ;;  %v5056_v19 = vadd.f32 %v3851_v17, %v798_v16 }
 0x9be   :  { %v5058_v20 = vadd.f32 %v3851_v17, %v799_v18 }
 0x9c0   :  { %v812_v21 = vpack.c.bf16 %v5058_v20, %v5056_v19 }
 0x9c2   :  { %4169 = vmatmul.mubr.msk.bf16.vlgmr.msra.gmra.mrb[20].mxu1 %vm90_vm0, %v812_v21  ;;  %v3859_v21 = vld [vmem:[%s5771_s0 + $0x28] sm:$0xff] }
 0x9c3   :  { %4188 = vmatprep.mubr.msk.bf16.mxu1 %vm4718_vm1, %v4717_v14 }
 0xa95   :  { %v859_v37 = vpop.f32.mrb[20].mxu1 }
 0xa96   :  { %v860_v38 = vadd.f32 %v3852_v34, %v859_v37  ;;  %v4170_v39 = vpop.f32.mrb[21].mxu1 }
 0xa97   :  { %v862_v40 = vpop.f32.mrb[22].mxu1 }
 0xa98   :  { %v868_v41 = vmul.f32 0.044715, %v860_v38  ;;  %v863_v42 = vadd.f32 %v3852_v34, %v862_v40  ;;  %v4171_v44 = vpop.f32.mrb[23].mxu1  ;;  %v866_v60 = vmul.f32 0.5, %v860_v38  ;;  %v3857_v40 = vld [vmem:[%s5727_s15] ss:$0 sm:$0xff] }
 0xa9a   :  { %v870_v45 = vmul.f32 %v868_v41, %v860_v38  ;;  %v869_v47 = vmul.f32 0.044715, %v863_v42  ;;  %v867_v61 = vmul.f32 0.5, %v863_v42 }
 0xa9c   :  { %v872_v48 = vmul.f32 %v870_v45, %v860_v38  ;;  %v871_v49 = vmul.f32 %v869_v47, %v863_v42  ;;  %v3863_v47 = vld [vmem:[%s5774_s8 + $0x1] ss:$0 sm:$0xff]  ;;  %s5782_s8 = smov 64  }
 0xa9e   :  { %v874_v50 = vadd.f32 %v872_v48, %v860_v38  ;;  %v873_v51 = vmul.f32 %v871_v49, %v863_v42 }
 0xaa0   :  { %v876_v53 = vmul.f32 0.7978846, %v874_v50  ;;  %v875_v54 = vadd.f32 %v873_v51, %v863_v42 }
 0xaa2   :  { %4552 = vtanh.f32 %v876_v53  ;;  %v877_v55 = vmul.f32 0.7978846, %v875_v54 }
 0xaa4   :  { %4554 = vtanh.f32 %v877_v55 }
 0xaac   :  { %v4553_v56 = vpop.eup %4552 }
 0xaad   :  { %v880_v58 = vadd.f32 1.0, %v4553_v56 }
 0xaae   :  { %v4555_v59 = vpop.eup %4554 }
 0xaaf   :  { %v881_v62 = vadd.f32 1.0, %v4555_v59  ;;  %v882_v63 = vmul.f32 %v880_v58, %v866_v60 }
 0xab1   :  { %v883_v0 = vmul.f32 %v881_v62, %v867_v61 }
 0xab3   :  { %v892_v35 = vpack.c.bf16 %v883_v0, %v882_v63 }
 0xab5   :  { %4181 = vmatmul.mubr.msk.bf16.vlgmr.msra.gmra.mrb[24].mxu0 %vm904_vm5, %v892_v35 }
 0xab6   :  { %4200 = vmatprep.mubr.msk.bf16.mxu0 %vm4718_vm1, %v4717_v14 }
 0xb88   :  { %v942_v1 = vpop.f32.mrb[24].mxu0 }
 0xb89   :  { %v943_v2 = vadd.f32 %v3854_v36, %v942_v1  ;;  %v4182_v3 = vpop.f32.mrb[25].mxu0 }
 0xb8a   :  { %v945_v4 = vpop.f32.mrb[26].mxu0 }
 0xb8b   :  { %v946_v5 = vadd.f32 %v3854_v36, %v945_v4  ;;  %v4183_v6 = vpop.f32.mrb[27].mxu0  ;;  %v949_v7 = vadd.f32 %v943_v2, %v5056_v19 }
 0xb8d   :  { %v953_v46 = vsel %vm90_vm0, %v949_v7, 0.0  ;;  %v950_v8 = vadd.f32 %v946_v5, %v5058_v20  ;;  %v3858_v20 = vld [vmem:[%s5771_s0 + $0x20] sm:$0xff] }
 0xb8e   :  { %954 = vadd.xlane.f32.xlu0 %v953_v46  ;;  %v1001_v22 = vpack.c.bf16 %v3859_v21, %v3858_v20 }
 0xb8f   :  { %v956_v9 = vsel %vm90_vm0, %v950_v8, 0.0 }
 0xb90   :  { %957 = vadd.xlane.f32.xlu1 %v956_v9  ;;  %4185 = vmatpush3.bf16.msra.mxu1 %v1001_v22 }
 0xb91   :  { %4186 = vmatprep.subr.bf16.mxu1 %v4717_v14 }
 0xb94   :  { %4187 = vmatpush3.bf16.msra.mxu1 %v1002_v25 }
 0xb95   :  { %4192 = vmatprep.subr.bf16.mxu1 %v4717_v14 }
 0xc1b   :  { %v955_v10 = vpop.xlane.xlu0 %954 }
 0xc1c   :  { %v959_v11 = vmul.f32 0.03125, %v955_v10 }
 0xc1d   :  { %v958_v12 = vpop.xlane.xlu1 %957 }
 0xc1e   :  { %v961_v13 = vsub.f32 %v949_v7, %v959_v11  ;;  %v960_v15 = vmul.f32 0.03125, %v958_v12 }
 0xc20   :  { %v962_v16 = vsub.f32 %v950_v8, %v960_v15  ;;  %v963_v43 = vmul.f32 %v961_v13, %v961_v13 }
 0xc22   :  { %v965_v17 = vsel %vm90_vm0, %v963_v43, 0.0  ;;  %v964_v18 = vmul.f32 %v962_v16, %v962_v16 }
 0xc23   :  { %966 = vadd.xlane.f32.xlu0 %v965_v17 }
 0xc24   :  { %v968_v19 = vsel %vm90_vm0, %v964_v18, 0.0 }
 0xc25   :  { %969 = vadd.xlane.f32.xlu1 %v968_v19 }
 0xcb0   :  { %v967_v26 = vpop.xlane.xlu0 %966 }
 0xcb1   :  { %v971_v27 = vmul.f32 0.03125, %v967_v26 }
 0xcb2   :  { %v970_v28 = vpop.xlane.xlu1 %969 }
 0xcb3   :  { %v973_v29 = vadd.f32 1e-12, %v971_v27  ;;  %v972_v30 = vmul.f32 0.03125, %v970_v28 }
 0xcb5   :  { %4556 = vrsqrt.f32 %v973_v29  ;;  %v974_v31 = vadd.f32 1e-12, %v972_v30 }
 0xcb7   :  { %4558 = vrsqrt.f32 %v974_v31 }
 0xcbf   :  { %v4557_v32 = vpop.eup %4556 }
 0xcc0   :  { %v977_v34 = vmul.f32 %v4557_v32, %v961_v13 }
 0xcc1   :  { %v4559_v37 = vpop.eup %4558 }
 0xcc2   :  { %v985_v38 = vmul.f32 %v3856_v33, %v977_v34  ;;  %v978_v39 = vmul.f32 %v4559_v37, %v962_v16 }
 0xcc4   :  { %v986_v41 = vmul.f32 %v3856_v33, %v978_v39  ;;  %v5128_v42 = vadd.f32 %v3857_v40, %v985_v38 }
 0xcc6   :  { %v5130_v44 = vadd.f32 %v3857_v40, %v986_v41 }
 0xcc8   :  { %v1000_v45 = vpack.c.bf16 %v5130_v44, %v5128_v42 }
 0xcca   :  { %4189 = vmatmul.mubr.msk.bf16.vlgmr.msra.gmra.mrb[24].mxu1 %vm90_vm0, %v1000_v45 }
 0xccb   :  { %4194 = vmatprep.mubr.msk.bf16.mxu1 %vm4718_vm1, %v4717_v14 }
 0xd9d   :  { %v1048_v48 = vpop.f32.mrb[24].mxu1 }
 0xd9e   :  { %v1049_v49 = vadd.f32 %v3863_v47, %v1048_v48  ;;  %v4190_v50 = vpop.f32.mrb[25].mxu1 }
 0xd9f   :  { %v1051_v51 = vpop.f32.mrb[26].mxu1 }
 0xda0   :  { %v5140_v53 = vpack.c.bf16 %v1049_v49, %v1049_v49  ;;  %v1052_v54 = vadd.f32 %v3863_v47, %v1051_v51  ;;  %v4191_v55 = vpop.f32.mrb[27].mxu1 }
 0xda2   :  { %v5142_v56 = vpack.c.bf16 %v1052_v54, %v1052_v54  ;;  %1063 = vrot.lane.b32.xlu0 %v5140_v53, %s5781_s27 }
 0xda4   :  { %1112 = vrot.lane.b32.xlu1 %v5142_v56, %s5781_s27 }
 0xe14   :  { %v1064_v58 = vpop.permute.xlu0 %1063 }
 0xe15   :  { %v1069_v59 = vsel %vm203_vm2, %v1064_v58, 0 }
 0xe16   :  { %4193 = vmatpush3.bf16.xpose.msra.mxu1 %v1069_v59  ;;  %v1113_v60 = vpop.permute.xlu1 %1112 }
 0xe17   :  { %v1118_v61 = vsel %vm203_vm2, %v1113_v60, 0  ;;  %4204 = vmatprep.subr.bf16.mxu1 %v4717_v14 }
 0xe18   :  { %4199 = vmatpush3.bf16.xpose.msra.mxu0 %v1118_v61 }
 0xe19   :  { %4210 = vmatprep.subr.bf16.mxu0 %v4717_v14 }
 0xe1d   :  { %4195 = vmatmul.mubr.msk.bf16.vlgmr.msra.gmra.mrb[28].mxu1 %vm203_vm2, %v5140_v53 }
 0xe1e   :  { %4206 = vmatprep.mubr.msk.bf16.mxu1 %vm4718_vm1, %v4717_v14 }
 0xe1f   :  { %4201 = vmatmul.mubr.msk.bf16.vlgmr.msra.gmra.mrb[28].mxu0 %vm203_vm2, %v5142_v56 }
 0xe20   :  { %4212 = vmatprep.mubr.msk.bf16.mxu0 %vm4718_vm1, %v4717_v14 }
 0xef0   :  { %v1105_v62 = vpop.f32.mrb[28].mxu1 }
 0xef1   :  { %v1160_v63 = vmul.f32 0.25, %v1105_v62  ;;  %v4196_v0 = vpop.f32.mrb[29].mxu1 }
 0xef2   :  { %v1108_v35 = vpop.f32.mrb[30].mxu1  ;;  %v1154_v36 = vpop.f32.mrb[28].mxu0 }
 0xef3   :  { %v1161_v1 = vmul.f32 0.25, %v1154_v36  ;;  %v4197_v2 = vpop.f32.mrb[31].mxu1  ;;  %v4202_v3 = vpop.f32.mrb[29].mxu0  ;;  %v1162_v4 = vadd.f32 %v4933_v52, %v1160_v63 }
 0xef4   :  { %v1157_v5 = vpop.f32.mrb[30].mxu0 }
 0xef5   :  { %v4203_v6 = vpop.f32.mrb[31].mxu0  ;;  %v1164_v7 = vsel %vm315_vm3, %v1162_v4, -inf  ;;  %v1163_v46 = vadd.f32 %v4938_v57, %v1161_v1 }
 0xef6   :  { %1165 = vmax.xlane.f32.xlu1 %v1164_v7 }
 0xef7   :  { %v1167_v8 = vsel %vm315_vm3, %v1163_v46, -inf }
 0xef8   :  { %1168 = vmax.xlane.f32.xlu0 %v1167_v8 }
 0xf07   :  { %1236 = vrot.lane.b32.xlu1 %v5142_v56, %s5782_s8 }
 0xf0b   :  { %1288 = vrot.lane.b32.xlu1 %v5140_v53, %s5783_s26 }
 0xf83   :  { %v1166_v9 = vpop.xlane.xlu1 %1165 }
 0xf84   :  { %v1170_v10 = vsub.f32 %v1162_v4, %v1166_v9 }
 0xf85   :  { %v1169_v11 = vpop.xlane.xlu0 %1168 }
 0xf86   :  { %v1172_v12 = vmul.f32 1.442695, %v1170_v10  ;;  %v1171_v13 = vsub.f32 %v1163_v46, %v1169_v11 }
 0xf87   :  { %v1237_v15 = vpop.permute.xlu1 %1236 }
 0xf88   :  { %4560 = vpow2.f32 %v1172_v12  ;;  %v1174_v16 = vmul.f32 1.442695, %v1171_v13  ;;  %v1242_v43 = vsel %vm345_vm4, %v1237_v15, 0 }
 0xf89   :  { %4211 = vmatpush3.bf16.msra.mxu0 %v1242_v43 }
 0xf8a   :  { %4562 = vpow2.f32 %v1174_v16  ;;  %4222 = vmatprep.subr.bf16.mxu0 %v4717_v14 }
 0xf8b   :  { %v1289_v21 = vpop.permute.xlu1 %1288 }
 0xf8c   :  { %v1294_v32 = vsel %vm203_vm2, %v1289_v21, 0 }
 0xf92   :  { %v4561_v17 = vpop.eup %4560 }
 0xf93   :  { %v1176_v18 = vsel %vm315_vm3, %v4561_v17, 0.0 }
 0xf94   :  { %v4563_v19 = vpop.eup %4562  ;;  %1177 = vadd.xlane.f32.xlu0 %v1176_v18 }
 0xf95   :  { %v1179_v20 = vsel %vm315_vm3, %v4563_v19, 0.0 }
 0xf96   :  { %1180 = vadd.xlane.f32.xlu1 %v1179_v20 }
 0xfa7   :  { %1338 = vrot.lane.b32.xlu1 %v5142_v56, %s5783_s26 }
 0xfaa   :  { %1188 = vrot.lane.b32.xlu0 %v5140_v53, %s5782_s8  ;;  %s5786_s8 = sld [smem:[#allocation14_spill]] }
 0xfab   :  { %1336 = vrot.lane.b32.xlu1 %v5142_v56, %s5784_s7 }
 0xfae   :  { %1286 = vrot.lane.b32.xlu0 %v5140_v53, %s5784_s7 }
0x1021   :  { %v1178_v22 = vpop.xlane.xlu0 %1177 }
0x1022   :  { %4564 = vrcp.f32 %v1178_v22 }
0x1023   :  { %v1181_v23 = vpop.xlane.xlu1 %1180 }
0x1024   :  { %4566 = vrcp.f32 %v1181_v23 }
0x1025   :  { %v1189_v24 = vpop.permute.xlu0 %1188 }
0x1026   :  { %v1194_v25 = vsel %vm345_vm4, %v1189_v24, 0  ;;  %v3867_v24 = vld [vmem:[%s5776_s29 + $0x30] sm:$0xff] }
0x1027   :  { %4205 = vmatpush3.bf16.msra.mxu1 %v1194_v25  ;;  %v1339_v31 = vpop.permute.xlu1 %1338  ;;  %v3868_v25 = vld [vmem:[%s5776_s29 + $0x38] sm:$0xff] }
0x1028   :  { %4216 = vmatprep.subr.bf16.mxu1 %v4717_v14  ;;  %v1344_v34 = vsel %vm203_vm2, %v1339_v31, 0 }
0x1029   :  { %v1287_v37 = vpop.permute.xlu0 %1286 }
0x102b   :  { %v1337_v38 = vpop.permute.xlu1 %1336 }
0x102c   :  { %v4565_v26 = vpop.eup %4564 }
0x102d   :  { %v1183_v27 = vmul.f32 %v4565_v26, %v4561_v17  ;;  %v1511_v26 = vpack.c.bf16 %v3868_v25, %v3867_v24  ;;  %v3893_v24 = vld [vmem:[%s5723_s12 + $0x48] sm:$0xff]  ;;  %v3894_v25 = vld [vmem:[%s5723_s12 + $0x50] sm:$0xff] }
0x102e   :  { %v4567_v28 = vpop.eup %4566 }
0x102f   :  { %v1185_v29 = vmul.f32 %v4567_v28, %v4563_v19  ;;  %v1186_v30 = vpack.c.bf16 %v1183_v27, %v1183_v27  ;;  %v3865_v19 = vld [vmem:[%s5776_s29 + $0x20] sm:$0xff] }
0x1031   :  { %4207 = vmatmul.mubr.msk.bf16.vlgmr.msra.gmra.mrb[32].mxu1 %vm315_vm3, %v1186_v30  ;;  %v1187_v33 = vpack.c.bf16 %v1185_v29, %v1185_v29 }
0x1032   :  { %4217 = vmatpush3.bf16.xpose.msra.mxu1 %v1294_v32  ;;  %4218 = vmatprep.mubr.msk.bf16.mxu1 %vm4718_vm1, %v4717_v14 }
0x1033   :  { %4213 = vmatmul.mubr.msk.bf16.vlgmr.msra.gmra.mrb[32].mxu0 %vm315_vm3, %v1187_v33  ;;  %4228 = vmatprep.subr.bf16.mxu1 %v4717_v14 }
0x1034   :  { %4223 = vmatpush3.bf16.xpose.msra.mxu0 %v1344_v34  ;;  %4224 = vmatprep.mubr.msk.bf16.mxu0 %vm4718_vm1, %v4717_v14 }
0x1035   :  { %4234 = vmatprep.subr.bf16.mxu0 %v4717_v14 }
0x1039   :  { %4219 = vmatmul.mubr.msk.bf16.vlgmr.msra.gmra.mrb[36].mxu1 %vm203_vm2, %v1287_v37 }
0x103a   :  { %4230 = vmatprep.mubr.msk.bf16.mxu1 %vm4718_vm1, %v4717_v14 }
0x103b   :  { %4225 = vmatmul.mubr.msk.bf16.vlgmr.msra.gmra.mrb[36].mxu0 %vm203_vm2, %v1337_v38 }
0x103c   :  { %4236 = vmatprep.mubr.msk.bf16.mxu0 %vm4718_vm1, %v4717_v14 }
0x1104   :  { %v5198_v39 = vpop.f32.mrb[32].mxu1 }
0x1105   :  { %v4208_v40 = vpop.f32.mrb[33].mxu1 }
0x1106   :  { %v1233_v41 = vpop.f32.mrb[34].mxu1  ;;  %v5200_v45 = vpop.f32.mrb[32].mxu0 }
0x1107   :  { %v1284_v47 = vpack.c.bf16 %v5200_v45, %v5198_v39  ;;  %v4209_v48 = vpop.f32.mrb[35].mxu1  ;;  %v4214_v49 = vpop.f32.mrb[33].mxu0 }
0x1108   :  { %v1281_v50 = vpop.f32.mrb[34].mxu0 }
0x1109   :  { %v4215_v51 = vpop.f32.mrb[35].mxu0 }
0x110c   :  { %v1330_v54 = vpop.f32.mrb[36].mxu1 }
0x110d   :  { %v1386_v55 = vmul.f32 0.25, %v1330_v54  ;;  %v4220_v58 = vpop.f32.mrb[37].mxu1 }
0x110e   :  { %v1333_v59 = vpop.f32.mrb[38].mxu1  ;;  %v1380_v60 = vpop.f32.mrb[36].mxu0 }
0x110f   :  { %v1387_v61 = vmul.f32 0.25, %v1380_v60  ;;  %v4221_v62 = vpop.f32.mrb[39].mxu1  ;;  %v4226_v63 = vpop.f32.mrb[37].mxu0  ;;  %v1388_v0 = vadd.f32 %v4933_v52, %v1386_v55 }
0x1110   :  { %v1383_v35 = vpop.f32.mrb[38].mxu0 }
0x1111   :  { %v4227_v36 = vpop.f32.mrb[39].mxu0  ;;  %v1390_v1 = vsel %vm315_vm3, %v1388_v0, -inf  ;;  %v1389_v2 = vadd.f32 %v4938_v57, %v1387_v61 }
0x1112   :  { %1391 = vmax.xlane.f32.xlu0 %v1390_v1 }
0x1113   :  { %v1393_v3 = vsel %vm315_vm3, %v1389_v2, -inf }
0x1114   :  { %1394 = vmax.xlane.f32.xlu1 %v1393_v3 }
0x1125   :  { %1462 = vrot.lane.b32.xlu1 %v5142_v56, %s5785_s5 }
0x119f   :  { %v1392_v4 = vpop.xlane.xlu0 %1391 }
0x11a0   :  { %v1396_v5 = vsub.f32 %v1388_v0, %v1392_v4 }
0x11a1   :  { %v1395_v6 = vpop.xlane.xlu1 %1394 }
0x11a2   :  { %v1398_v7 = vmul.f32 1.442695, %v1396_v5  ;;  %v1397_v46 = vsub.f32 %v1389_v2, %v1395_v6  ;;  %v3886_v6 = vld [vmem:[%s5778_s3 + $0x28] sm:$0xff] }
0x11a4   :  { %4568 = vpow2.f32 %v1398_v7  ;;  %v1400_v52 = vmul.f32 1.442695, %v1397_v46  ;;  %v3887_v46 = vld [vmem:[%s5778_s3 + $0x30] sm:$0xff] }
0x11a5   :  { %v1463_v8 = vpop.permute.xlu1 %1462 }
0x11a6   :  { %4570 = vpow2.f32 %v1400_v52  ;;  %v1468_v9 = vsel %vm345_vm4, %v1463_v8, 0  ;;  %v3888_v52 = vld [vmem:[%s5778_s3 + $0x38] sm:$0xff] }
0x11a7   :  { %4235 = vmatpush3.bf16.msra.mxu0 %v1468_v9  ;;  %v1665_v8 = vpack.c.bf16 %v3888_v52, %v3887_v46 }
0x11a8   :  { %4246 = vmatprep.subr.bf16.mxu0 %v4717_v14 }
0x11ae   :  { %v4569_v57 = vpop.eup %4568 }
0x11af   :  { %v1402_v10 = vsel %vm315_vm3, %v4569_v57, 0.0 }
0x11b0   :  { %v4571_v11 = vpop.eup %4570  ;;  %1403 = vadd.xlane.f32.xlu0 %v1402_v10 }
0x11b1   :  { %v1405_v56 = vsel %vm315_vm3, %v4571_v11, 0.0 }
0x11b4   :  { %1406 = vadd.xlane.f32.xlu0 %v1405_v56 }
0x11ca   :  { %1414 = vrot.lane.b32.xlu0 %v5140_v53, %s5785_s5  ;;  %v3866_v53 = vld [vmem:[%s5776_s29 + $0x28] sm:$0xff] }
0x11cb   :  { %v1285_v22 = vpack.c.bf16 %v3866_v53, %v3865_v19  ;;  %v3884_v19 = vld [vmem:[%s5780_s10 + $0x1] ss:$0 sm:$0xff] }
0x123d   :  { %v1404_v12 = vpop.xlane.xlu0 %1403 }
0x123e   :  { %4572 = vrcp.f32 %v1404_v12 }
0x1241   :  { %v1407_v13 = vpop.xlane.xlu0 %1406 }
0x1242   :  { %4574 = vrcp.f32 %v1407_v13 }
0x1245   :  { %v1415_v15 = vpop.permute.xlu0 %1414 }
0x1246   :  { %v1420_v16 = vsel %vm345_vm4, %v1415_v15, 0  ;;  %v3883_v15 = vld [vmem:[%s5779_s6 + $0x1] ss:$0 sm:$0xff] }
0x1247   :  { %4229 = vmatpush3.bf16.msra.mxu1 %v1420_v16 }
0x1248   :  { %v4573_v43 = vpop.eup %4572  ;;  %4240 = vmatprep.subr.bf16.mxu1 %v4717_v14 }
0x1249   :  { %v1409_v17 = vmul.f32 %v4573_v43, %v4569_v57 }
0x124b   :  { %v1412_v18 = vpack.c.bf16 %v1409_v17, %v1409_v17 }
0x124c   :  { %v4575_v20 = vpop.eup %4574 }
0x124d   :  { %v1411_v21 = vmul.f32 %v4575_v20, %v4571_v11  ;;  %4231 = vmatmul.mubr.msk.bf16.vlgmr.msra.gmra.mrb[40].mxu1 %vm315_vm3, %v1412_v18 }
0x124e   :  { %4242 = vmatprep.mubr.msk.bf16.mxu1 %vm4718_vm1, %v4717_v14  ;;  %4241 = vmatpush3.bf16.msra.mxu1 %v1511_v26 }
0x124f   :  { %v1413_v23 = vpack.c.bf16 %v1411_v21, %v1411_v21  ;;  %4252 = vmatprep.subr.bf16.mxu1 %v4717_v14 }
0x1251   :  { %4237 = vmatmul.mubr.msk.bf16.vlgmr.msra.gmra.mrb[40].mxu0 %vm315_vm3, %v1413_v23  ;;  %v3892_v23 = vld [vmem:[%s5723_s12 + $0x40] sm:$0xff] }
0x1252   :  { %4247 = vmatpush3.bf16.msra.mxu0 %v1285_v22  ;;  %4248 = vmatprep.mubr.msk.bf16.mxu0 %vm4718_vm1, %v4717_v14  ;;  %v1746_v26 = vpack.c.bf16 %v3893_v24, %v3892_v23  ;;  %v1858_v23 = vld [vmem:[%s5728_s18 + $0x18] sm:$0xff] }
0x1253   :  { %4260 = vmatprep.subr.bf16.mxu0 %v4717_v14 }
0x1259   :  { %4249 = vmatmul.mubr.msk.bf16.vlgmr.msra.gmra.mrb[44].mxu0 %vm203_vm2, %v1284_v47  ;;  %v3880_v47 = vld [vmem:[%s5777_s2 + $0x1] ss:$0 sm:$0xff] }
0x125a   :  { %4268 = vmatprep.mubr.msk.bf16.mxu0 %vm4718_vm1, %v4717_v14  ;;  %4261 = vmatpush3.bf16.msra.mxu0 %v1746_v26 }
0x125b   :  { %4262 = vmatprep.subr.bf16.mxu0 %v4717_v14 }
0x1320   :  { %v1456_v27 = vpop.f32.mrb[40].mxu1 }
0x1321   :  { %v4232_v28 = vpop.f32.mrb[41].mxu1 }
0x1322   :  { %v1459_v29 = vpop.f32.mrb[42].mxu1 }
0x1323   :  { %v4233_v30 = vpop.f32.mrb[43].mxu1  ;;  %v3896_v29 = vld [vmem:[%s5723_s12 + $0x60] sm:$0xff] }
0x1324   :  { %v1504_v31 = vpop.f32.mrb[40].mxu0  ;;  %v3897_v30 = vld [vmem:[%s5723_s12 + $0x68] sm:$0xff] }
0x1325   :  { %v1510_v32 = vpack.c.bf16 %v1504_v31, %v1456_v27  ;;  %v4238_v33 = vpop.f32.mrb[41].mxu0  ;;  %v3895_v27 = vld [vmem:[%s5723_s12 + $0x58] sm:$0xff]  ;;  %v1748_v31 = vpack.c.bf16 %v3897_v30, %v3896_v29 }
0x1326   :  { %v1507_v34 = vpop.f32.mrb[42].mxu0  ;;  %v1747_v28 = vpack.c.bf16 %v3895_v27, %v3894_v25  ;;  %v3899_v33 = vld [vmem:[%s5723_s12 + $0x78] sm:$0xff] }
0x1327   :  { %v4239_v37 = vpop.f32.mrb[43].mxu0  ;;  %4243 = vmatmul.mubr.msk.bf16.vlgmr.msra.gmra.mrb[44].mxu1 %vm203_vm2, %v1510_v32  ;;  %v3898_v32 = vld [vmem:[%s5723_s12 + $0x70] sm:$0xff] }
0x1328   :  { %4256 = vmatprep.mubr.msk.bf16.mxu1 %vm4718_vm1, %v4717_v14  ;;  %4263 = vmatpush3.bf16.msra.mxu0 %v1747_v28  ;;  %v1749_v34 = vpack.c.bf16 %v3899_v33, %v3898_v32  ;;  %v3890_v37 = vld [vmem:[%s5724_s11 + $0x1] ss:$0 sm:$0xff] }
0x1329   :  { %4264 = vmatprep.subr.bf16.mxu0 %v4717_v14 }
0x132c   :  { %v1593_v38 = vpop.f32.mrb[44].mxu0  ;;  %4265 = vmatpush3.bf16.msra.mxu0 %v1748_v31 }
0x132d   :  { %v4250_v39 = vpop.f32.mrb[45].mxu0  ;;  %4266 = vmatprep.subr.bf16.mxu0 %v4717_v14 }
0x132e   :  { %v1596_v40 = vpop.f32.mrb[46].mxu0 }
0x132f   :  { %v4251_v41 = vpop.f32.mrb[47].mxu0 }
0x1330   :  { %4267 = vmatpush3.bf16.msra.mxu0 %v1749_v34  ;;  %v3905_v34 = vld [vmem:[%s5726_s14 + $0x1] ss:$0 sm:$0xff] }
0x1331   :  { %4292 = vmatprep.subr.bf16.mxu0 %v4717_v14 }
0x13fa   :  { %v1549_v45 = vpop.f32.mrb[44].mxu1 }
0x13fb   :  { %v1594_v48 = vadd.f32 %v1593_v38, %v1549_v45  ;;  %v4244_v49 = vpop.f32.mrb[45].mxu1 }
0x13fc   :  { %v1552_v50 = vpop.f32.mrb[46].mxu1 }
0x13fd   :  { %v1608_v51 = vadd.f32 %v3880_v47, %v1594_v48  ;;  %v1597_v54 = vadd.f32 %v1596_v40, %v1552_v50  ;;  %v4245_v55 = vpop.f32.mrb[47].mxu1 }
0x13ff   :  { %v1609_v58 = vadd.f32 %v3880_v47, %v1597_v54  ;;  %v1610_v59 = vadd.f32 %v1608_v51, %v5128_v42 }
0x1401   :  { %v1616_v60 = vsel %vm90_vm0, %v1610_v59, 0.0  ;;  %v1611_v61 = vadd.f32 %v1609_v58, %v5130_v44  ;;  %v3885_v44 = vld [vmem:[%s5778_s3 + $0x20] sm:$0xff] }
0x1402   :  { %1617 = vadd.xlane.f32.xlu1 %v1616_v60  ;;  %v1664_v7 = vpack.c.bf16 %v3886_v6, %v3885_v44 }
0x1403   :  { %v1619_v62 = vsel %vm90_vm0, %v1611_v61, 0.0 }
0x1404   :  { %1620 = vadd.xlane.f32.xlu0 %v1619_v62  ;;  %4253 = vmatpush3.bf16.msra.mxu1 %v1664_v7 }
0x1405   :  { %4254 = vmatprep.subr.bf16.mxu1 %v4717_v14 }
0x1408   :  { %4255 = vmatpush3.bf16.msra.mxu1 %v1665_v8 }
0x1409   :  { %4272 = vmatprep.subr.bf16.mxu1 %v4717_v14 }
0x148f   :  { %v1618_v63 = vpop.xlane.xlu1 %1617 }
0x1490   :  { %v1622_v0 = vmul.f32 0.03125, %v1618_v63 }
0x1491   :  { %v1621_v35 = vpop.xlane.xlu0 %1620 }
0x1492   :  { %v1624_v36 = vsub.f32 %v1610_v59, %v1622_v0  ;;  %v1623_v1 = vmul.f32 0.03125, %v1621_v35 }
0x1494   :  { %v1625_v2 = vsub.f32 %v1611_v61, %v1623_v1  ;;  %v1626_v3 = vmul.f32 %v1624_v36, %v1624_v36 }
0x1496   :  { %v1628_v4 = vsel %vm90_vm0, %v1626_v3, 0.0  ;;  %v1627_v5 = vmul.f32 %v1625_v2, %v1625_v2 }
0x1497   :  { %1629 = vadd.xlane.f32.xlu0 %v1628_v4 }
0x1498   :  { %v1631_v42 = vsel %vm90_vm0, %v1627_v5, 0.0  ;;  %v3901_v5 = vld [vmem:[%s5725_s13 + $0x1] ss:$0 sm:$0xff] }
0x1499   :  { %1632 = vadd.xlane.f32.xlu1 %v1631_v42 }
0x1524   :  { %v1630_v9 = vpop.xlane.xlu0 %1629 }
0x1525   :  { %v1634_v57 = vmul.f32 0.03125, %v1630_v9 }
0x1526   :  { %v1633_v10 = vpop.xlane.xlu1 %1632 }
0x1527   :  { %v1636_v11 = vadd.f32 1e-12, %v1634_v57  ;;  %v1635_v56 = vmul.f32 0.03125, %v1633_v10 }
0x1529   :  { %4576 = vrsqrt.f32 %v1636_v11  ;;  %v1637_v12 = vadd.f32 1e-12, %v1635_v56 }
0x152b   :  { %4578 = vrsqrt.f32 %v1637_v12 }
0x1533   :  { %v4577_v13 = vpop.eup %4576 }
0x1534   :  { %v1640_v16 = vmul.f32 %v4577_v13, %v1624_v36 }
0x1535   :  { %v4579_v43 = vpop.eup %4578 }
0x1536   :  { %v1648_v17 = vmul.f32 %v3883_v15, %v1640_v16  ;;  %v1641_v18 = vmul.f32 %v4579_v43, %v1625_v2 }
0x1538   :  { %v1649_v53 = vmul.f32 %v3883_v15, %v1641_v18  ;;  %v1656_v20 = vadd.f32 %v3884_v19, %v1648_v17 }
0x153a   :  { %v5276_v21 = vadd.f32 %v3884_v19, %v1649_v53  ;;  %v1855_v53 = vld [vmem:[%s5728_s18] sm:$0xff] }
0x153c   :  { %v1663_v22 = vpack.c.bf16 %v5276_v21, %v1656_v20 }
0x153e   :  { %4257 = vmatmul.mubr.msk.bf16.vlgmr.msra.gmra.mrb[48].mxu1 %vm90_vm0, %v1663_v22  ;;  %v1857_v22 = vld [vmem:[%s5728_s18 + $0x10] sm:$0xff] }
0x153f   :  { %4276 = vmatprep.mubr.msk.bf16.mxu1 %vm4718_vm1, %v4717_v14  ;;  %v1861_v24 = vpack.c.bf16 %v1858_v23, %v1857_v22 }
0x1611   :  { %v1711_v38 = vpop.f32.mrb[48].mxu1 }
0x1612   :  { %v1712_v39 = vadd.f32 %v3890_v37, %v1711_v38  ;;  %v4258_v40 = vpop.f32.mrb[49].mxu1 }
0x1613   :  { %v1714_v41 = vpop.f32.mrb[50].mxu1  ;;  %v1912_v40 = vld [vmem:[%s5729_s17] sm:$0xf] }
0x1614   :  { %v1720_v45 = vmul.f32 0.044715, %v1712_v39  ;;  %v1715_v47 = vadd.f32 %v3890_v37, %v1714_v41  ;;  %v4259_v48 = vpop.f32.mrb[51].mxu1  ;;  %v1718_v35 = vmul.f32 0.5, %v1712_v39  ;;  %v3906_v41 = vld [vmem:[%s5727_s15 + $0x1] ss:$0 sm:$0xff] }
0x1616   :  { %v1722_v49 = vmul.f32 %v1720_v45, %v1712_v39  ;;  %v1721_v50 = vmul.f32 0.044715, %v1715_v47  ;;  %v1719_v36 = vmul.f32 0.5, %v1715_v47 }
0x1618   :  { %v1724_v51 = vmul.f32 %v1722_v49, %v1712_v39  ;;  %v1723_v54 = vmul.f32 %v1721_v50, %v1715_v47 }
0x161a   :  { %v1726_v55 = vadd.f32 %v1724_v51, %v1712_v39  ;;  %v1725_v58 = vmul.f32 %v1723_v54, %v1715_v47 }
0x161c   :  { %v1728_v59 = vmul.f32 0.7978846, %v1726_v55  ;;  %v1727_v60 = vadd.f32 %v1725_v58, %v1715_v47  ;;  %v1913_v47 = vpack.c.bf16 %v1912_v40, %v1912_v40  ;;  %v1924_v55 = vld [vmem:[%s5730_s16] sm:$0x3] }
0x161d   :  { %v1914_v58 = vld [vmem:[%s5731_s19] sm:$0xff] }
0x161e   :  { %4580 = vtanh.f32 %v1728_v59  ;;  %v1729_v61 = vmul.f32 0.7978846, %v1727_v60  ;;  %v5347_v54 = vsel %vm1930_vm7, %v1913_v47, 0  ;;  %v1915_v59 = vld [vmem:[%s5731_s19 + $0x8] sm:$0xff]  ;;  %v1925_v60 = vpack.c.bf16 %v1924_v55, %v1924_v55 }
0x1620   :  { %4582 = vtanh.f32 %v1729_v61  ;;  %v5363_v61 = vpack.c.bf16 %v1915_v59, %v1914_v58 }
0x1628   :  { %v4581_v62 = vpop.eup %4580 }
0x1629   :  { %v1732_v63 = vadd.f32 1.0, %v4581_v62  ;;  %v4724_v62 = vmov 0  }
0x162a   :  { %v4583_v0 = vpop.eup %4582 }
0x162b   :  { %v1733_v1 = vadd.f32 1.0, %v4583_v0  ;;  %v1734_v2 = vmul.f32 %v1732_v63, %v1718_v35 }
0x162d   :  { %v1735_v3 = vmul.f32 %v1733_v1, %v1719_v36  ;;  %v3907_v1 = vld [vmem:[%s5732_s20] ss:$0 sm:$0xff]  ;;  %s4725_s20 = smov 16  }
0x162f   :  { %v1745_v4 = vpack.c.bf16 %v1735_v3, %v1734_v2 }
0x1631   :  { %4269 = vmatmul.mubr.msk.bf16.vlgmr.msra.gmra.mrb[48].mxu0 %vm904_vm5, %v1745_v4 }
0x1632   :  { %4294 = vmatprep.mubr.msk.bf16.mxu0 %vm4718_vm1, %v4717_v14 }
0x1704   :  { %v1795_v42 = vpop.f32.mrb[48].mxu0 }
0x1705   :  { %v1796_v44 = vadd.f32 %v3901_v5, %v1795_v42  ;;  %v4270_v6 = vpop.f32.mrb[49].mxu0 }
0x1706   :  { %v1798_v7 = vpop.f32.mrb[50].mxu0 }
0x1707   :  { %v1799_v46 = vadd.f32 %v3901_v5, %v1798_v7  ;;  %v4271_v52 = vpop.f32.mrb[51].mxu0  ;;  %v1802_v8 = vadd.f32 %v1796_v44, %v1656_v20  ;;  %v1856_v20 = vld [vmem:[%s5728_s18 + $0x8] sm:$0xff] }
0x1709   :  { %v1808_v9 = vsel %vm90_vm0, %v1802_v8, 0.0  ;;  %v1803_v57 = vadd.f32 %v1799_v46, %v5276_v21  ;;  %v1860_v21 = vpack.c.bf16 %v1856_v20, %v1855_v53 }
0x170a   :  { %1809 = vadd.xlane.f32.xlu1 %v1808_v9 }
0x170b   :  { %v1811_v10 = vsel %vm90_vm0, %v1803_v57, 0.0  ;;  %4273 = vmatpush3.bf16.msra.mxu1 %v1860_v21 }
0x170c   :  { %1812 = vadd.xlane.f32.xlu0 %v1811_v10  ;;  %4274 = vmatprep.subr.bf16.mxu1 %v4717_v14 }
0x170f   :  { %4275 = vmatpush3.bf16.msra.mxu1 %v1861_v24 }
0x1710   :  { %4280 = vmatprep.subr.bf16.mxu1 %v4717_v14 }
0x1797   :  { %v1810_v11 = vpop.xlane.xlu1 %1809 }
0x1798   :  { %v1814_v56 = vmul.f32 0.03125, %v1810_v11 }
0x1799   :  { %v1813_v12 = vpop.xlane.xlu0 %1812 }
0x179a   :  { %v1816_v13 = vsub.f32 %v1802_v8, %v1814_v56  ;;  %v1815_v15 = vmul.f32 0.03125, %v1813_v12  ;;  %v3914_v12 = vld [vmem:[%s5730_s16 + $0x2] sm:$0x3] }
0x179c   :  { %v1817_v16 = vsub.f32 %v1803_v57, %v1815_v15  ;;  %v1818_v43 = vmul.f32 %v1816_v13, %v1816_v13  ;;  %v1921_v15 = vld [vmem:[%s5733_s22 + $0x8] sm:$0xff] }
0x179e   :  { %v1820_v17 = vsel %vm90_vm0, %v1818_v43, 0.0  ;;  %v1819_v18 = vmul.f32 %v1817_v16, %v1817_v16  ;;  %v1917_v43 = vld [vmem:[%s5734_s21] sm:$0xff] }
0x179f   :  { %1821 = vadd.xlane.f32.xlu1 %v1820_v17 }
0x17a0   :  { %v1823_v19 = vsel %vm90_vm0, %v1819_v18, 0.0  ;;  %v1918_v18 = vld [vmem:[%s5734_s21 + $0x8] sm:$0xff]  ;;  %s4726_s21 = smov 32  }
0x17a1   :  { %1824 = vadd.xlane.f32.xlu0 %v1823_v19  ;;  %v5404_v19 = vpack.c.bf16 %v1918_v18, %v1917_v43 }
0x182c   :  { %v1822_v25 = vpop.xlane.xlu1 %1821 }
0x182d   :  { %v1826_v26 = vmul.f32 0.03125, %v1822_v25 }
0x182e   :  { %v1825_v27 = vpop.xlane.xlu0 %1824 }
0x182f   :  { %v1828_v28 = vadd.f32 1e-12, %v1826_v26  ;;  %v1827_v29 = vmul.f32 0.03125, %v1825_v27 }
0x1831   :  { %4584 = vrsqrt.f32 %v1828_v28  ;;  %v1829_v30 = vadd.f32 1e-12, %v1827_v29  ;;  %v5430_v28 = vld [vmem:[%s5735_s23] ss:$0 sm:$0xff] }
0x1833   :  { %4586 = vrsqrt.f32 %v1829_v30 }
0x183b   :  { %v4585_v31 = vpop.eup %4584 }
0x183c   :  { %v1832_v32 = vmul.f32 %v4585_v31, %v1816_v13  ;;  %v1920_v13 = vld [vmem:[%s5733_s22] sm:$0xff] }
0x183d   :  { %v4587_v33 = vpop.eup %4586  ;;  %v5397_v17 = vpack.c.bf16 %v1921_v15, %v1920_v13 }
0x183e   :  { %v1833_v37 = vmul.f32 %v4587_v33, %v1817_v16  ;;  %v1840_v38 = vmul.f32 %v3905_v34, %v1832_v32  ;;  %v2162_v16 = vpack.c.bf16 %v3914_v12, %v3914_v12 }
0x183f   :  { %4293 = vmatpush3.bf16.msra.mxu0 %v5397_v17 }
0x1840   :  { %v1841_v39 = vmul.f32 %v3905_v34, %v1833_v37  ;;  %v1848_v48 = vadd.f32 %v3906_v41, %v1840_v38  ;;  %4298 = vmatprep.subr.bf16.mxu0 %v4717_v14 }
0x1842   :  { %v1849_v45 = vadd.f32 %v3906_v41, %v1841_v39  ;;  %4295 = vmatmul.mubr.bf16.vlgmr.msra.gmra.mrb[52].mxu0 %v4724_v62 }
0x1843   :  { %4299 = vmatpush3.bf16.msra.mxu0 %v5404_v19  ;;  %4300 = vmatprep.mubr.msk.bf16.mxu0 %vm4718_vm1, %v4717_v14 }
0x1844   :  { %v1851_v49 = vrot.slane %v1849_v45, 7  ;;  %4316 = vmatprep.subr.bf16.mxu0 %v4717_v14 }
0x1846   :  { %v1854_v50 = vsel %vm1853_vm6, %v1848_v48, %v1851_v49 }
0x1847   :  { %v1859_v51 = vpack.c.bf16 %v1854_v50, %v1854_v50 }
0x1849   :  { %4277 = vmatmul.mubr.msk.bf16.vlgmr.msra.gmra.mrb[52].mxu1 %vm90_vm0, %v1859_v51 }
0x184a   :  { %4281 = vmatpush3.bf16.msra.mxu1 %v5347_v54  ;;  %4282 = vmatprep.mubr.msk.bf16.mxu1 %vm4718_vm1, %v4717_v14 }
0x184b   :  { %4286 = vmatprep.subr.bf16.mxu1 %v4717_v14 }
0x1851   :  { %4283 = vmatmul.mubr.msk.bf16.vlgmr.msra.gmra.mrb[56].mxu1 %vm1926_vm8, %v1925_v60 }
0x1852   :  { %4287 = vmatpush3.bf16.msra.mxu1 %v5363_v61  ;;  %4288 = vmatprep.mubr.msk.bf16.mxu1 %vm4718_vm1, %v4717_v14 }
0x1853   :  { %4304 = vmatprep.subr.bf16.mxu1 %v4717_v14 }
0x185d   :  { %4289 = vmatmul.mubr.bf16.vlgmr.msra.gmra.mrb[56].mxu1 %v4724_v62 }
0x185e   :  { %4305 = vmatpush3.bf16.msra.mxu1 %v5347_v54  ;;  %4306 = vmatprep.mubr.msk.bf16.mxu1 %vm4718_vm1, %v4717_v14 }
0x185f   :  { %4310 = vmatprep.subr.bf16.mxu1 %v4717_v14 }
0x1865   :  { %4307 = vmatmul.mubr.msk.bf16.vlgmr.msra.gmra.mrb[60].mxu1 %vm1926_vm8, %v2162_v16 }
0x1866   :  { %4311 = vmatpush3.bf16.msra.mxu1 %v5363_v61  ;;  %4312 = vmatprep.mubr.msk.bf16.mxu1 %vm4718_vm1, %v4717_v14 }
0x1867   :  { %4328 = vmatprep.subr.bf16.mxu1 %v4717_v14 }
0x1915   :  { %v2077_v23 = vpop.f32.mrb[52].mxu0 }
0x1916   :  { %v4296_v24 = vpop.f32.mrb[53].mxu0 }
0x1917   :  { %v2080_v25 = vpop.f32.mrb[54].mxu0 }
0x1918   :  { %v4297_v26 = vpop.f32.mrb[55].mxu0 }
0x191c   :  { %v1906_v63 = vpop.f32.mrb[52].mxu1 }
0x191d   :  { %v4278_v0 = vpop.f32.mrb[53].mxu1  ;;  %v5377_v2 = vadd.f32 %v3907_v1, %v1906_v63 }
0x191e   :  { %v1909_v35 = vpop.f32.mrb[54].mxu1 }
0x191f   :  { %v4279_v36 = vpop.f32.mrb[55].mxu1 }
0x1930   :  { %v2011_v3 = vpop.f32.mrb[56].mxu1 }
0x1931   :  { %v4478_v4 = vadd.f32 %v2011_v3, %v5377_v2  ;;  %v4290_v5 = vpop.f32.mrb[57].mxu1 }
0x1932   :  { %v2014_v42 = vpop.f32.mrb[58].mxu1 }
0x1933   :  { %4588 = vtanh.f32 %v4478_v4  ;;  %v4291_v44 = vpop.f32.mrb[59].mxu1  ;;  %v3910_v7 = vmul.f32 -1.442695, %v4478_v4 }
0x1934   :  { %v3921_v44 = vld [vmem:[%s5730_s16 + $0x4] sm:$0x3] }
0x1935   :  { %4590 = vpow2.f32 %v3910_v7 }
0x193d   :  { %v4589_v6 = vpop.eup %4588 }
0x193e   :  { %2027 = vrot.lane.b32.xlu0 %v4589_v6, %s5781_s27  ;;  %v2392_v6 = vpack.c.bf16 %v3921_v44, %v3921_v44 }
0x193f   :  { %v4591_v46 = vpop.eup %4590 }
0x1940   :  { %v2021_v52 = vadd.f32 1.0, %v4591_v46 }
0x1942   :  { %4592 = vrcp.f32 %v2021_v52 }
0x194c   :  { %v4593_v8 = vpop.eup %4592 }
0x194d   :  { %v2025_v10 = vmul.f32 0.0, %v4593_v8 }
0x19b0   :  { %v2028_v9 = vpop.permute.xlu0 %2027 }
0x19b1   :  { %v2030_v57 = vmul.f32 %v4593_v8, %v2028_v9 }
0x19b3   :  { %2032 = vrot.lane.b32.xlu1 %v2030_v57, %s4725_s20 }
0x1a25   :  { %v2033_v11 = vpop.permute.xlu1 %2032 }
0x1a26   :  { %v5382_v56 = vadd.f32 %v2033_v11, %v2025_v10 }
0x1a28   :  { %4594 = vtanh.f32 %v5382_v56 }
0x1a32   :  { %v4595_v53 = vpop.eup %4594 }
0x1a33   :  { %2038 = vrot.lane.b32.xlu1 %v4595_v53, %s4726_s21 }
0x1aa5   :  { %v2039_v20 = vpop.permute.xlu1 %2038 }
0x1aa6   :  { %v2041_v21 = vmul.f32 %v4593_v8, %v2039_v20 }
0x1aa8   :  { %v2042_v22 = vpack.c.bf16 %v2041_v21, %v2041_v21 }
0x1aaa   :  { %2084 = vrot.lane.b32.xlu1 %v2042_v22, %s5783_s26 }
0x1b1c   :  { %v2085_v27 = vpop.permute.xlu1 %2084 }
0x1b1d   :  { %4301 = vmatmul.mubr.msk.bf16.vlgmr.msra.gmra.mrb[56].mxu0 %vm203_vm2, %v2085_v27  ;;  %4313 = vmatmul.mubr.msk.bf16.vlgmr.msra.gmra.mrb[60].mxu1 %vm203_vm2, %v2085_v27 }
0x1b1e   :  { %4329 = vmatpush3.bf16.msra.mxu1 %v5347_v54  ;;  %4330 = vmatprep.mubr.msk.bf16.mxu1 %vm4718_vm1, %v4717_v14 }
0x1b1f   :  { %4317 = vmatpush3.bf16.msra.mxu0 %v5397_v17  ;;  %4334 = vmatprep.subr.bf16.mxu1 %v4717_v14 }
0x1b20   :  { %4318 = vmatprep.mubr.msk.bf16.mxu0 %vm4718_vm1, %v4717_v14  ;;  %4322 = vmatprep.subr.bf16.mxu0 %v4717_v14 }
0x1b25   :  { %4331 = vmatmul.mubr.msk.bf16.vlgmr.msra.gmra.mrb[64].mxu1 %vm1926_vm8, %v2392_v6 }
0x1b26   :  { %4335 = vmatpush3.bf16.msra.mxu1 %v5363_v61  ;;  %4336 = vmatprep.mubr.msk.bf16.mxu1 %vm4718_vm1, %v4717_v14 }
0x1b27   :  { %4352 = vmatprep.subr.bf16.mxu1 %v4717_v14 }
0x1bf0   :  { %v2123_v29 = vpop.f32.mrb[56].mxu0  ;;  %v2240_v30 = vpop.f32.mrb[60].mxu1 }
0x1bf1   :  { %v2124_v31 = vadd.f32 %v2123_v29, %v2077_v23  ;;  %v4479_v32 = vadd.f32 %v2240_v30, %v5377_v2  ;;  %v4302_v33 = vpop.f32.mrb[57].mxu0  ;;  %v4314_v34 = vpop.f32.mrb[61].mxu1 }
0x1bf2   :  { %v2126_v37 = vpop.f32.mrb[58].mxu0  ;;  %v2243_v38 = vpop.f32.mrb[62].mxu1 }
0x1bf3   :  { %v2135_v39 = vadd.f32 %v5430_v28, %v2124_v31  ;;  %4596 = vtanh.f32 %v4479_v32  ;;  %v4303_v40 = vpop.f32.mrb[59].mxu0  ;;  %v4315_v41 = vpop.f32.mrb[63].mxu1  ;;  %v3917_v48 = vmul.f32 -1.442695, %v4479_v32 }
0x1bf5   :  { %4598 = vtanh.f32 %v2135_v39  ;;  %v3913_v49 = vmul.f32 -1.442695, %v2135_v39 }
0x1bf6   :  { %4600 = vpow2.f32 %v3917_v48 }
0x1bf7   :  { %4602 = vpow2.f32 %v3913_v49 }
0x1bfd   :  { %v4597_v45 = vpop.eup %4596 }
0x1bfe   :  { %2256 = vrot.lane.b32.xlu1 %v4597_v45, %s5781_s27 }
0x1bff   :  { %v4599_v47 = vpop.eup %4598 }
0x1c00   :  { %2145 = vrot.lane.b32.xlu0 %v4599_v47, %s5781_s27  ;;  %v4601_v50 = vpop.eup %4600 }
0x1c01   :  { %v4603_v51 = vpop.eup %4602  ;;  %v2250_v55 = vadd.f32 1.0, %v4601_v50 }
0x1c02   :  { %v2139_v58 = vadd.f32 1.0, %v4603_v51 }
0x1c03   :  { %4604 = vrcp.f32 %v2250_v55 }
0x1c04   :  { %4606 = vrcp.f32 %v2139_v58 }
0x1c0d   :  { %v4605_v59 = vpop.eup %4604 }
0x1c0e   :  { %v4607_v63 = vpop.eup %4606  ;;  %v2254_v36 = vmul.f32 %v4605_v59, %v5382_v56 }
0x1c0f   :  { %v2143_v4 = vmul.f32 0.0, %v4607_v63 }
0x1c70   :  { %v2257_v60 = vpop.permute.xlu1 %2256 }
0x1c71   :  { %v2259_v62 = vmul.f32 %v4605_v59, %v2257_v60 }
0x1c72   :  { %v2146_v0 = vpop.permute.xlu0 %2145 }
0x1c73   :  { %v2148_v35 = vmul.f32 %v4607_v63, %v2146_v0  ;;  %2261 = vrot.lane.b32.xlu1 %v2259_v62, %s4725_s20 }
0x1c75   :  { %2150 = vrot.lane.b32.xlu0 %v2148_v35, %s4725_s20 }
0x1ce5   :  { %v2262_v1 = vpop.permute.xlu1 %2261 }
0x1ce6   :  { %v5439_v3 = vadd.f32 %v2262_v1, %v2254_v36 }
0x1ce7   :  { %v2151_v5 = vpop.permute.xlu0 %2150 }
0x1ce8   :  { %4608 = vtanh.f32 %v5439_v3  ;;  %v5442_v42 = vadd.f32 %v2151_v5, %v2143_v4 }
0x1cea   :  { %4610 = vtanh.f32 %v5442_v42 }
0x1cf2   :  { %v4609_v7 = vpop.eup %4608 }
0x1cf3   :  { %2267 = vrot.lane.b32.xlu1 %v4609_v7, %s4726_s21 }
0x1cf4   :  { %v4611_v46 = vpop.eup %4610 }
0x1cf5   :  { %2156 = vrot.lane.b32.xlu0 %v4611_v46, %s4726_s21 }
0x1d65   :  { %v2268_v52 = vpop.permute.xlu1 %2267 }
0x1d66   :  { %v2270_v8 = vmul.f32 %v4605_v59, %v2268_v52 }
0x1d67   :  { %v2157_v9 = vpop.permute.xlu0 %2156 }
0x1d68   :  { %v2271_v57 = vpack.c.bf16 %v2270_v8, %v2270_v8  ;;  %v2159_v10 = vmul.f32 %v4607_v63, %v2157_v9  ;;  %v3928_v63 = vld [vmem:[%s5730_s16 + $0x6] sm:$0x3] }
0x1d69   :  { %v2622_v0 = vpack.c.bf16 %v3928_v63, %v3928_v63 }
0x1d6a   :  { %v2272_v11 = vpack.c.bf16 %v2159_v10, %v2159_v10  ;;  %2320 = vrot.lane.b32.xlu1 %v2271_v57, %s5783_s26 }
0x1d6c   :  { %2274 = vrot.lane.b32.xlu0 %v2272_v11, %s5783_s26 }
0x1ddc   :  { %v2321_v56 = vpop.permute.xlu1 %2320 }
0x1ddd   :  { %4337 = vmatmul.mubr.msk.bf16.vlgmr.msra.gmra.mrb[64].mxu1 %vm203_vm2, %v2321_v56 }
0x1dde   :  { %v2275_v12 = vpop.permute.xlu0 %2274  ;;  %4353 = vmatpush3.bf16.msra.mxu1 %v5347_v54  ;;  %4354 = vmatprep.mubr.msk.bf16.mxu1 %vm4718_vm1, %v4717_v14 }
0x1ddf   :  { %4319 = vmatmul.mubr.msk.bf16.vlgmr.msra.gmra.mrb[60].mxu0 %vm203_vm2, %v2275_v12  ;;  %4358 = vmatprep.subr.bf16.mxu1 %v4717_v14 }
0x1de0   :  { %4323 = vmatpush3.bf16.msra.mxu0 %v5404_v19  ;;  %4324 = vmatprep.mubr.msk.bf16.mxu0 %vm4718_vm1, %v4717_v14 }
0x1de1   :  { %4340 = vmatprep.subr.bf16.mxu0 %v4717_v14 }
0x1de5   :  { %4355 = vmatmul.mubr.msk.bf16.vlgmr.msra.gmra.mrb[68].mxu1 %vm1926_vm8, %v2622_v0 }
0x1de6   :  { %4359 = vmatpush3.bf16.msra.mxu1 %v5363_v61  ;;  %4360 = vmatprep.mubr.msk.bf16.mxu1 %vm4718_vm1, %v4717_v14 }
0x1de7   :  { %4325 = vmatmul.mubr.msk.bf16.vlgmr.msra.gmra.mrb[64].mxu0 %vm203_vm2, %v2321_v56  ;;  %4376 = vmatprep.subr.bf16.mxu1 %v4717_v14 }
0x1de8   :  { %4341 = vmatpush3.bf16.msra.mxu0 %v5397_v17  ;;  %4342 = vmatprep.mubr.msk.bf16.mxu0 %vm4718_vm1, %v4717_v14 }
0x1de9   :  { %4346 = vmatprep.subr.bf16.mxu0 %v4717_v14 }
0x1eb0   :  { %v2470_v13 = vpop.f32.mrb[64].mxu1 }
0x1eb1   :  { %v4480_v15 = vadd.f32 %v2470_v13, %v5377_v2  ;;  %v4338_v16 = vpop.f32.mrb[65].mxu1 }
0x1eb2   :  { %v2313_v43 = vpop.f32.mrb[60].mxu0  ;;  %v2473_v18 = vpop.f32.mrb[66].mxu1 }
0x1eb3   :  { %4612 = vtanh.f32 %v4480_v15  ;;  %v4320_v53 = vpop.f32.mrb[61].mxu0  ;;  %v4339_v20 = vpop.f32.mrb[67].mxu1  ;;  %v3924_v32 = vmul.f32 -1.442695, %v4480_v15 }
0x1eb4   :  { %v2316_v21 = vpop.f32.mrb[62].mxu0 }
0x1eb5   :  { %v4321_v22 = vpop.f32.mrb[63].mxu0 }
0x1eba   :  { %v2359_v23 = vpop.f32.mrb[64].mxu0 }
0x1ebb   :  { %v2360_v24 = vadd.f32 %v2359_v23, %v2313_v43  ;;  %v4326_v25 = vpop.f32.mrb[65].mxu0 }
0x1ebc   :  { %v2362_v26 = vpop.f32.mrb[66].mxu0 }
0x1ebd   :  { %v4613_v27 = vpop.eup %4612  ;;  %v2365_v29 = vadd.f32 %v5430_v28, %v2360_v24  ;;  %v4327_v30 = vpop.f32.mrb[67].mxu0 }
0x1ebe   :  { %2486 = vrot.lane.b32.xlu1 %v4613_v27, %s5781_s27 }
0x1ebf   :  { %4614 = vtanh.f32 %v2365_v29  ;;  %v3920_v33 = vmul.f32 -1.442695, %v2365_v29 }
0x1ec0   :  { %4616 = vpow2.f32 %v3924_v32 }
0x1ec1   :  { %4618 = vpow2.f32 %v3920_v33 }
0x1ec9   :  { %v4615_v31 = vpop.eup %4614 }
0x1eca   :  { %2375 = vrot.lane.b32.xlu0 %v4615_v31, %s5781_s27  ;;  %v4617_v34 = vpop.eup %4616 }
0x1ecb   :  { %v2480_v37 = vadd.f32 1.0, %v4617_v34  ;;  %v4619_v38 = vpop.eup %4618 }
0x1ecc   :  { %v2369_v39 = vadd.f32 1.0, %v4619_v38 }
0x1ecd   :  { %4620 = vrcp.f32 %v2480_v37 }
0x1ece   :  { %4622 = vrcp.f32 %v2369_v39 }
0x1ed7   :  { %v4621_v40 = vpop.eup %4620 }
0x1ed8   :  { %v4623_v47 = vpop.eup %4622  ;;  %v2484_v50 = vmul.f32 %v4621_v40, %v5439_v3 }
0x1ed9   :  { %v2373_v58 = vmul.f32 %v4623_v47, %v5442_v42 }
0x1f30   :  { %v2487_v41 = vpop.permute.xlu1 %2486 }
0x1f31   :  { %v2489_v45 = vmul.f32 %v4621_v40, %v2487_v41 }
0x1f33   :  { %2491 = vrot.lane.b32.xlu1 %v2489_v45, %s4725_s20 }
0x1f3c   :  { %v2376_v48 = vpop.permute.xlu0 %2375 }
0x1f3d   :  { %v2378_v49 = vmul.f32 %v4623_v47, %v2376_v48 }
0x1f3f   :  { %2380 = vrot.lane.b32.xlu0 %v2378_v49, %s4725_s20 }
0x1fa5   :  { %v2492_v51 = vpop.permute.xlu1 %2491 }
0x1fa6   :  { %v5479_v55 = vadd.f32 %v2492_v51, %v2484_v50 }
0x1fa8   :  { %4624 = vtanh.f32 %v5479_v55 }
0x1fb1   :  { %v2381_v59 = vpop.permute.xlu0 %2380 }
0x1fb2   :  { %v4625_v60 = vpop.eup %4624  ;;  %v5483_v62 = vadd.f32 %v2381_v59, %v2373_v58 }
0x1fb3   :  { %2497 = vrot.lane.b32.xlu1 %v4625_v60, %s4726_s21 }
0x1fb4   :  { %4626 = vtanh.f32 %v5483_v62 }
0x1fbe   :  { %v4627_v35 = vpop.eup %4626 }
0x1fbf   :  { %2386 = vrot.lane.b32.xlu0 %v4627_v35, %s4726_s21 }
0x2025   :  { %v2498_v36 = vpop.permute.xlu1 %2497 }
0x2026   :  { %v2500_v1 = vmul.f32 %v4621_v40, %v2498_v36 }
0x2028   :  { %v2501_v3 = vpack.c.bf16 %v2500_v1, %v2500_v1 }
0x202a   :  { %2550 = vrot.lane.b32.xlu1 %v2501_v3, %s5783_s26 }
0x2031   :  { %v2387_v4 = vpop.permute.xlu0 %2386 }
0x2032   :  { %v2389_v5 = vmul.f32 %v4623_v47, %v2387_v4  ;;  %v3935_v47 = vld [vmem:[%s5730_s16 + $0x8] sm:$0x3] }
0x2033   :  { %v2852_v48 = vpack.c.bf16 %v3935_v47, %v3935_v47 }
0x2034   :  { %v2502_v42 = vpack.c.bf16 %v2389_v5, %v2389_v5 }
0x2036   :  { %2504 = vrot.lane.b32.xlu0 %v2502_v42, %s5783_s26 }
0x209c   :  { %v2551_v44 = vpop.permute.xlu1 %2550 }
0x209d   :  { %4361 = vmatmul.mubr.msk.bf16.vlgmr.msra.gmra.mrb[68].mxu1 %vm203_vm2, %v2551_v44 }
0x209e   :  { %4377 = vmatpush3.bf16.msra.mxu1 %v5347_v54  ;;  %4378 = vmatprep.mubr.msk.bf16.mxu1 %vm4718_vm1, %v4717_v14 }
0x209f   :  { %4382 = vmatprep.subr.bf16.mxu1 %v4717_v14 }
0x20a5   :  { %4379 = vmatmul.mubr.msk.bf16.vlgmr.msra.gmra.mrb[72].mxu1 %vm1926_vm8, %v2852_v48 }
0x20a6   :  { %4383 = vmatpush3.bf16.msra.mxu1 %v5363_v61  ;;  %4384 = vmatprep.mubr.msk.bf16.mxu1 %vm4718_vm1, %v4717_v14 }
0x20a7   :  { %4400 = vmatprep.subr.bf16.mxu1 %v4717_v14 }
0x20a8   :  { %v2505_v6 = vpop.permute.xlu0 %2504 }
0x20a9   :  { %4343 = vmatmul.mubr.msk.bf16.vlgmr.msra.gmra.mrb[68].mxu0 %vm203_vm2, %v2505_v6 }
0x20aa   :  { %4347 = vmatpush3.bf16.msra.mxu0 %v5404_v19  ;;  %4348 = vmatprep.mubr.msk.bf16.mxu0 %vm4718_vm1, %v4717_v14 }
0x20ab   :  { %4364 = vmatprep.subr.bf16.mxu0 %v4717_v14 }
0x20b1   :  { %4349 = vmatmul.mubr.msk.bf16.vlgmr.msra.gmra.mrb[72].mxu0 %vm203_vm2, %v2551_v44 }
0x20b2   :  { %4365 = vmatpush3.bf16.msra.mxu0 %v5397_v17  ;;  %4366 = vmatprep.mubr.msk.bf16.mxu0 %vm4718_vm1, %v4717_v14 }
0x20b3   :  { %4370 = vmatprep.subr.bf16.mxu0 %v4717_v14 }
0x2170   :  { %v2700_v7 = vpop.f32.mrb[68].mxu1 }
0x2171   :  { %v4481_v46 = vadd.f32 %v2700_v7, %v5377_v2  ;;  %v4362_v52 = vpop.f32.mrb[69].mxu1 }
0x2172   :  { %v2703_v8 = vpop.f32.mrb[70].mxu1 }
0x2173   :  { %4628 = vtanh.f32 %v4481_v46  ;;  %v4363_v9 = vpop.f32.mrb[71].mxu1  ;;  %v3931_v21 = vmul.f32 -1.442695, %v4481_v46 }
0x217c   :  { %v2543_v57 = vpop.f32.mrb[68].mxu0 }
0x217d   :  { %v4629_v10 = vpop.eup %4628  ;;  %v4344_v11 = vpop.f32.mrb[69].mxu0 }
0x217e   :  { %2716 = vrot.lane.b32.xlu1 %v4629_v10, %s5781_s27  ;;  %v2546_v56 = vpop.f32.mrb[70].mxu0 }
0x217f   :  { %v4345_v12 = vpop.f32.mrb[71].mxu0 }
0x2184   :  { %v2589_v13 = vpop.f32.mrb[72].mxu0 }
0x2185   :  { %v2590_v15 = vadd.f32 %v2589_v13, %v2543_v57  ;;  %v4350_v16 = vpop.f32.mrb[73].mxu0 }
0x2186   :  { %v2592_v43 = vpop.f32.mrb[74].mxu0 }
0x2187   :  { %v2595_v18 = vadd.f32 %v5430_v28, %v2590_v15  ;;  %v4351_v53 = vpop.f32.mrb[75].mxu0 }
0x2189   :  { %4630 = vtanh.f32 %v2595_v18  ;;  %v3927_v24 = vmul.f32 -1.442695, %v2595_v18 }
0x218a   :  { %4632 = vpow2.f32 %v3931_v21 }
0x2193   :  { %v4631_v20 = vpop.eup %4630 }
0x2194   :  { %2605 = vrot.lane.b32.xlu0 %v4631_v20, %s5781_s27  ;;  %v4633_v22 = vpop.eup %4632 }
0x2195   :  { %v2710_v23 = vadd.f32 1.0, %v4633_v22 }
0x2197   :  { %4634 = vrcp.f32 %v2710_v23 }
0x2198   :  { %4636 = vpow2.f32 %v3927_v24 }
0x21a1   :  { %v4635_v25 = vpop.eup %4634 }
0x21a2   :  { %v4637_v29 = vpop.eup %4636  ;;  %v2714_v34 = vmul.f32 %v4635_v25, %v5479_v55 }
0x21a3   :  { %v2599_v30 = vadd.f32 1.0, %v4637_v29 }
0x21a5   :  { %4638 = vrcp.f32 %v2599_v30 }
0x21af   :  { %v4639_v31 = vpop.eup %4638 }
0x21b0   :  { %v2603_v40 = vmul.f32 %v4639_v31, %v5483_v62 }
0x21f0   :  { %v2717_v26 = vpop.permute.xlu1 %2716 }
0x21f1   :  { %v2719_v27 = vmul.f32 %v4635_v25, %v2717_v26 }
0x21f3   :  { %2721 = vrot.lane.b32.xlu1 %v2719_v27, %s4725_s20 }
0x2206   :  { %v2606_v32 = vpop.permute.xlu0 %2605 }
0x2207   :  { %v2608_v33 = vmul.f32 %v4639_v31, %v2606_v32 }
0x2209   :  { %2610 = vrot.lane.b32.xlu0 %v2608_v33, %s4725_s20 }
0x2265   :  { %v2722_v37 = vpop.permute.xlu1 %2721 }
0x2266   :  { %v5520_v38 = vadd.f32 %v2722_v37, %v2714_v34 }
0x2268   :  { %4640 = vtanh.f32 %v5520_v38 }
0x2272   :  { %v4641_v39 = vpop.eup %4640 }
0x2273   :  { %2727 = vrot.lane.b32.xlu1 %v4641_v39, %s4726_s21 }
0x227b   :  { %v2611_v41 = vpop.permute.xlu0 %2610 }
0x227c   :  { %v5525_v45 = vadd.f32 %v2611_v41, %v2603_v40 }
0x227e   :  { %4642 = vtanh.f32 %v5525_v45 }
0x2288   :  { %v4643_v49 = vpop.eup %4642 }
0x2289   :  { %2616 = vrot.lane.b32.xlu0 %v4643_v49, %s4726_s21 }
0x22e5   :  { %v2728_v50 = vpop.permute.xlu1 %2727 }
0x22e6   :  { %v2730_v51 = vmul.f32 %v4635_v25, %v2728_v50 }
0x22e8   :  { %v2731_v55 = vpack.c.bf16 %v2730_v51, %v2730_v51 }
0x22ea   :  { %2780 = vrot.lane.b32.xlu1 %v2731_v55, %s5783_s26 }
0x22fb   :  { %v2617_v58 = vpop.permute.xlu0 %2616 }
0x22fc   :  { %v2619_v59 = vmul.f32 %v4639_v31, %v2617_v58  ;;  %v3942_v31 = vld [vmem:[%s5730_s16 + $0xa] sm:$0x3] }
0x22fd   :  { %v3082_v32 = vpack.c.bf16 %v3942_v31, %v3942_v31 }
0x22fe   :  { %v2732_v60 = vpack.c.bf16 %v2619_v59, %v2619_v59 }
0x2300   :  { %2734 = vrot.lane.b32.xlu0 %v2732_v60, %s5783_s26 }
0x235c   :  { %v2781_v62 = vpop.permute.xlu1 %2780 }
0x235d   :  { %4385 = vmatmul.mubr.msk.bf16.vlgmr.msra.gmra.mrb[72].mxu1 %vm203_vm2, %v2781_v62 }
0x235e   :  { %4401 = vmatpush3.bf16.msra.mxu1 %v5347_v54  ;;  %4402 = vmatprep.mubr.msk.bf16.mxu1 %vm4718_vm1, %v4717_v14 }
0x235f   :  { %4406 = vmatprep.subr.bf16.mxu1 %v4717_v14 }
0x2365   :  { %4403 = vmatmul.mubr.msk.bf16.vlgmr.msra.gmra.mrb[76].mxu1 %vm1926_vm8, %v3082_v32 }
0x2366   :  { %4407 = vmatpush3.bf16.msra.mxu1 %v5363_v61  ;;  %4408 = vmatprep.mubr.msk.bf16.mxu1 %vm4718_vm1, %v4717_v14 }
0x2367   :  { %4424 = vmatprep.subr.bf16.mxu1 %v4717_v14 }
0x2372   :  { %v2735_v63 = vpop.permute.xlu0 %2734 }
0x2373   :  { %4367 = vmatmul.mubr.msk.bf16.vlgmr.msra.gmra.mrb[76].mxu0 %vm203_vm2, %v2735_v63 }
0x2374   :  { %4371 = vmatpush3.bf16.msra.mxu0 %v5404_v19  ;;  %4372 = vmatprep.mubr.msk.bf16.mxu0 %vm4718_vm1, %v4717_v14 }
0x2375   :  { %4388 = vmatprep.subr.bf16.mxu0 %v4717_v14 }
0x237b   :  { %4373 = vmatmul.mubr.msk.bf16.vlgmr.msra.gmra.mrb[80].mxu0 %vm203_vm2, %v2781_v62 }
0x237c   :  { %4389 = vmatpush3.bf16.msra.mxu0 %v5397_v17  ;;  %4390 = vmatprep.mubr.msk.bf16.mxu0 %vm4718_vm1, %v4717_v14 }
0x237d   :  { %4394 = vmatprep.subr.bf16.mxu0 %v4717_v14 }
0x2430   :  { %v2930_v0 = vpop.f32.mrb[72].mxu1 }
0x2431   :  { %v4482_v35 = vadd.f32 %v2930_v0, %v5377_v2  ;;  %v4386_v36 = vpop.f32.mrb[73].mxu1 }
0x2432   :  { %v2933_v1 = vpop.f32.mrb[74].mxu1 }
0x2433   :  { %4644 = vtanh.f32 %v4482_v35  ;;  %v4387_v3 = vpop.f32.mrb[75].mxu1  ;;  %v3938_v11 = vmul.f32 -1.442695, %v4482_v35 }
0x243d   :  { %v4645_v4 = vpop.eup %4644 }
0x243e   :  { %2946 = vrot.lane.b32.xlu1 %v4645_v4, %s5781_s27 }
0x2446   :  { %v2773_v5 = vpop.f32.mrb[76].mxu0 }
0x2447   :  { %v4368_v42 = vpop.f32.mrb[77].mxu0 }
0x2448   :  { %v2776_v44 = vpop.f32.mrb[78].mxu0 }
0x2449   :  { %v4369_v6 = vpop.f32.mrb[79].mxu0 }
0x244e   :  { %v2819_v7 = vpop.f32.mrb[80].mxu0 }
0x244f   :  { %v2820_v46 = vadd.f32 %v2819_v7, %v2773_v5  ;;  %v4374_v52 = vpop.f32.mrb[81].mxu0 }
0x2450   :  { %v2822_v8 = vpop.f32.mrb[82].mxu0 }
0x2451   :  { %v2825_v9 = vadd.f32 %v5430_v28, %v2820_v46  ;;  %v4375_v57 = vpop.f32.mrb[83].mxu0 }
0x2453   :  { %4646 = vtanh.f32 %v2825_v9  ;;  %v3934_v16 = vmul.f32 -1.442695, %v2825_v9 }
0x2454   :  { %4648 = vpow2.f32 %v3938_v11 }
0x245d   :  { %v4647_v10 = vpop.eup %4646 }
0x245e   :  { %2835 = vrot.lane.b32.xlu0 %v4647_v10, %s5781_s27  ;;  %v4649_v56 = vpop.eup %4648 }
0x245f   :  { %v2940_v12 = vadd.f32 1.0, %v4649_v56 }
0x2461   :  { %4650 = vrcp.f32 %v2940_v12 }
0x2462   :  { %4652 = vpow2.f32 %v3934_v16 }
0x246b   :  { %v4651_v13 = vpop.eup %4650 }
0x246c   :  { %v4653_v18 = vpop.eup %4652  ;;  %v2944_v23 = vmul.f32 %v4651_v13, %v5520_v38 }
0x246d   :  { %v2829_v53 = vadd.f32 1.0, %v4653_v18 }
0x246f   :  { %4654 = vrcp.f32 %v2829_v53 }
0x2479   :  { %v4655_v20 = vpop.eup %4654 }
0x247a   :  { %v2833_v27 = vmul.f32 %v4655_v20, %v5525_v45 }
0x24b0   :  { %v2947_v15 = vpop.permute.xlu1 %2946 }
0x24b1   :  { %v2949_v43 = vmul.f32 %v4651_v13, %v2947_v15 }
0x24b3   :  { %2951 = vrot.lane.b32.xlu1 %v2949_v43, %s4725_s20 }
0x24d0   :  { %v2836_v21 = vpop.permute.xlu0 %2835 }
0x24d1   :  { %v2838_v22 = vmul.f32 %v4655_v20, %v2836_v21 }
0x24d3   :  { %2840 = vrot.lane.b32.xlu0 %v2838_v22, %s4725_s20 }
0x2525   :  { %v2952_v24 = vpop.permute.xlu1 %2951 }
0x2526   :  { %v5561_v25 = vadd.f32 %v2952_v24, %v2944_v23 }
0x2528   :  { %4656 = vtanh.f32 %v5561_v25 }
0x2532   :  { %v4657_v26 = vpop.eup %4656 }
0x2533   :  { %2957 = vrot.lane.b32.xlu1 %v4657_v26, %s4726_s21 }
0x2545   :  { %v2841_v29 = vpop.permute.xlu0 %2840 }
0x2546   :  { %v5566_v30 = vadd.f32 %v2841_v29, %v2833_v27 }
0x2548   :  { %4658 = vtanh.f32 %v5566_v30 }
0x2552   :  { %v4659_v33 = vpop.eup %4658 }
0x2553   :  { %2846 = vrot.lane.b32.xlu0 %v4659_v33, %s4726_s21 }
0x25a5   :  { %v2958_v34 = vpop.permute.xlu1 %2957 }
0x25a6   :  { %v2960_v37 = vmul.f32 %v4651_v13, %v2958_v34 }
0x25a8   :  { %v2961_v38 = vpack.c.bf16 %v2960_v37, %v2960_v37 }
0x25aa   :  { %3010 = vrot.lane.b32.xlu1 %v2961_v38, %s5783_s26 }
0x25c5   :  { %v2847_v39 = vpop.permute.xlu0 %2846 }
0x25c6   :  { %v2849_v40 = vmul.f32 %v4655_v20, %v2847_v39  ;;  %v3949_v20 = vld [vmem:[%s5730_s16 + $0xc] sm:$0x3] }
0x25c7   :  { %v3312_v21 = vpack.c.bf16 %v3949_v20, %v3949_v20 }
0x25c8   :  { %v2962_v41 = vpack.c.bf16 %v2849_v40, %v2849_v40 }
0x25ca   :  { %2964 = vrot.lane.b32.xlu0 %v2962_v41, %s5783_s26 }
0x261c   :  { %v3011_v45 = vpop.permute.xlu1 %3010 }
0x261d   :  { %4409 = vmatmul.mubr.msk.bf16.vlgmr.msra.gmra.mrb[76].mxu1 %vm203_vm2, %v3011_v45 }
0x261e   :  { %4425 = vmatpush3.bf16.msra.mxu1 %v5347_v54  ;;  %4426 = vmatprep.mubr.msk.bf16.mxu1 %vm4718_vm1, %v4717_v14 }
0x261f   :  { %4430 = vmatprep.subr.bf16.mxu1 %v4717_v14 }
0x2625   :  { %4427 = vmatmul.mubr.msk.bf16.vlgmr.msra.gmra.mrb[80].mxu1 %vm1926_vm8, %v3312_v21 }
0x2626   :  { %4431 = vmatpush3.bf16.msra.mxu1 %v5363_v61  ;;  %4432 = vmatprep.mubr.msk.bf16.mxu1 %vm4718_vm1, %v4717_v14 }
0x2627   :  { %4448 = vmatprep.subr.bf16.mxu1 %v4717_v14 }
0x263c   :  { %v2965_v47 = vpop.permute.xlu0 %2964 }
0x263d   :  { %4391 = vmatmul.mubr.msk.bf16.vlgmr.msra.gmra.mrb[84].mxu0 %vm203_vm2, %v2965_v47 }
0x263e   :  { %4395 = vmatpush3.bf16.msra.mxu0 %v5404_v19  ;;  %4396 = vmatprep.mubr.msk.bf16.mxu0 %vm4718_vm1, %v4717_v14 }
0x263f   :  { %4412 = vmatprep.subr.bf16.mxu0 %v4717_v14 }
0x2645   :  { %4397 = vmatmul.mubr.msk.bf16.vlgmr.msra.gmra.mrb[88].mxu0 %vm203_vm2, %v3011_v45 }
0x2646   :  { %4413 = vmatpush3.bf16.msra.mxu0 %v5397_v17  ;;  %4414 = vmatprep.mubr.msk.bf16.mxu0 %vm4718_vm1, %v4717_v14 }
0x2647   :  { %4418 = vmatprep.subr.bf16.mxu0 %v4717_v14 }
0x26f0   :  { %v3160_v48 = vpop.f32.mrb[76].mxu1 }
0x26f1   :  { %v4483_v49 = vadd.f32 %v3160_v48, %v5377_v2  ;;  %v4410_v50 = vpop.f32.mrb[77].mxu1 }
0x26f2   :  { %v3163_v51 = vpop.f32.mrb[78].mxu1 }
0x26f3   :  { %4660 = vtanh.f32 %v4483_v49  ;;  %v4411_v55 = vpop.f32.mrb[79].mxu1  ;;  %v3945_v42 = vmul.f32 -1.442695, %v4483_v49 }
0x26fd   :  { %v4661_v58 = vpop.eup %4660 }
0x26fe   :  { %3176 = vrot.lane.b32.xlu1 %v4661_v58, %s5781_s27 }
0x2710   :  { %v3003_v59 = vpop.f32.mrb[84].mxu0 }
0x2711   :  { %v4392_v60 = vpop.f32.mrb[85].mxu0 }
0x2712   :  { %v3006_v62 = vpop.f32.mrb[86].mxu0 }
0x2713   :  { %v4393_v63 = vpop.f32.mrb[87].mxu0 }
0x2718   :  { %v3049_v0 = vpop.f32.mrb[88].mxu0 }
0x2719   :  { %v3050_v35 = vadd.f32 %v3049_v0, %v3003_v59  ;;  %v4398_v36 = vpop.f32.mrb[89].mxu0 }
0x271a   :  { %v3052_v1 = vpop.f32.mrb[90].mxu0 }
0x271b   :  { %v3055_v3 = vadd.f32 %v5430_v28, %v3050_v35  ;;  %v4399_v4 = vpop.f32.mrb[91].mxu0 }
0x271d   :  { %4662 = vtanh.f32 %v3055_v3  ;;  %v3941_v8 = vmul.f32 -1.442695, %v3055_v3 }
0x271e   :  { %4664 = vpow2.f32 %v3945_v42 }
0x2727   :  { %v4663_v5 = vpop.eup %4662 }
0x2728   :  { %3065 = vrot.lane.b32.xlu0 %v4663_v5, %s5781_s27  ;;  %v4665_v44 = vpop.eup %4664 }
0x2729   :  { %v3170_v6 = vadd.f32 1.0, %v4665_v44 }
0x272b   :  { %4666 = vrcp.f32 %v3170_v6 }
0x272c   :  { %4668 = vpow2.f32 %v3941_v8 }
0x2735   :  { %v4667_v7 = vpop.eup %4666 }
0x2736   :  { %v4669_v9 = vpop.eup %4668  ;;  %v3174_v12 = vmul.f32 %v4667_v7, %v5561_v25 }
0x2737   :  { %v3059_v57 = vadd.f32 1.0, %v4669_v9 }
0x2739   :  { %4670 = vrcp.f32 %v3059_v57  ;;  %v3956_v57 = vld [vmem:[%s5730_s16 + $0xe] sm:$0x3] }
0x2743   :  { %v4671_v10 = vpop.eup %4670 }
0x2744   :  { %v3063_v43 = vmul.f32 %v4671_v10, %v5566_v30 }
0x2770   :  { %v3177_v46 = vpop.permute.xlu1 %3176 }
0x2771   :  { %v3179_v52 = vmul.f32 %v4667_v7, %v3177_v46 }
0x2773   :  { %3181 = vrot.lane.b32.xlu1 %v3179_v52, %s4725_s20 }
0x279a   :  { %v3066_v11 = vpop.permute.xlu0 %3065 }
0x279b   :  { %v3068_v56 = vmul.f32 %v4671_v10, %v3066_v11 }
0x279d   :  { %3070 = vrot.lane.b32.xlu0 %v3068_v56, %s4725_s20 }
0x27e5   :  { %v3182_v13 = vpop.permute.xlu1 %3181 }
0x27e6   :  { %v5602_v15 = vadd.f32 %v3182_v13, %v3174_v12 }
0x27e8   :  { %4672 = vtanh.f32 %v5602_v15 }
0x27f2   :  { %v4673_v16 = vpop.eup %4672 }
0x27f3   :  { %3187 = vrot.lane.b32.xlu1 %v4673_v16, %s4726_s21 }
0x280f   :  { %v3071_v18 = vpop.permute.xlu0 %3070 }
0x2810   :  { %v5607_v53 = vadd.f32 %v3071_v18, %v3063_v43 }
0x2812   :  { %4674 = vtanh.f32 %v5607_v53 }
0x281c   :  { %v4675_v22 = vpop.eup %4674 }
0x281d   :  { %3076 = vrot.lane.b32.xlu0 %v4675_v22, %s4726_s21 }
0x2865   :  { %v3188_v23 = vpop.permute.xlu1 %3187 }
0x2866   :  { %v3190_v24 = vmul.f32 %v4667_v7, %v3188_v23 }
0x2868   :  { %v3191_v25 = vpack.c.bf16 %v3190_v24, %v3190_v24 }
0x286a   :  { %3240 = vrot.lane.b32.xlu1 %v3191_v25, %s5783_s26 }
0x288f   :  { %v3077_v26 = vpop.permute.xlu0 %3076 }
0x2890   :  { %v3079_v27 = vmul.f32 %v4671_v10, %v3077_v26  ;;  %v3542_v10 = vpack.c.bf16 %v3956_v57, %v3956_v57 }
0x2892   :  { %v3192_v29 = vpack.c.bf16 %v3079_v27, %v3079_v27 }
0x2894   :  { %3194 = vrot.lane.b32.xlu0 %v3192_v29, %s5783_s26 }
0x28dc   :  { %v3241_v30 = vpop.permute.xlu1 %3240 }
0x28dd   :  { %4433 = vmatmul.mubr.msk.bf16.vlgmr.msra.gmra.mrb[80].mxu1 %vm203_vm2, %v3241_v30 }
0x28de   :  { %4449 = vmatpush3.bf16.msra.mxu1 %v5347_v54  ;;  %4450 = vmatprep.mubr.msk.bf16.mxu1 %vm4718_vm1, %v4717_v14 }
0x28df   :  { %4454 = vmatprep.subr.bf16.mxu1 %v4717_v14 }
0x28e5   :  { %4451 = vmatmul.mubr.msk.bf16.vlgmr.msra.gmra.mrb[84].mxu1 %vm1926_vm8, %v3542_v10 }
0x28e6   :  { %4455 = vmatpush3.bf16.msra.mxu1 %v5363_v61  ;;  %4456 = vmatprep.mubr.msk.bf16.mxu1 %vm4718_vm1, %v4717_v14 }
0x28e7   :  { %4472 = vmatprep.subr.bf16.mxu1 %v4717_v14 }
0x2906   :  { %v3195_v31 = vpop.permute.xlu0 %3194 }
0x2907   :  { %4415 = vmatmul.mubr.msk.bf16.vlgmr.msra.gmra.mrb[92].mxu0 %vm203_vm2, %v3195_v31 }
0x2908   :  { %4419 = vmatpush3.bf16.msra.mxu0 %v5404_v19  ;;  %4420 = vmatprep.mubr.msk.bf16.mxu0 %vm4718_vm1, %v4717_v14 }
0x2909   :  { %4436 = vmatprep.subr.bf16.mxu0 %v4717_v14 }
0x290f   :  { %4421 = vmatmul.mubr.msk.bf16.vlgmr.msra.gmra.mrb[96].mxu0 %vm203_vm2, %v3241_v30 }
0x2910   :  { %4437 = vmatpush3.bf16.msra.mxu0 %v5397_v17  ;;  %4438 = vmatprep.mubr.msk.bf16.mxu0 %vm4718_vm1, %v4717_v14 }
0x2911   :  { %4442 = vmatprep.subr.bf16.mxu0 %v4717_v14 }
0x29b0   :  { %v3390_v54 = vpop.f32.mrb[80].mxu1 }
0x29b1   :  { %v4484_v32 = vadd.f32 %v3390_v54, %v5377_v2  ;;  %v4434_v33 = vpop.f32.mrb[81].mxu1 }
0x29b2   :  { %v3393_v34 = vpop.f32.mrb[82].mxu1 }
0x29b3   :  { %4676 = vtanh.f32 %v4484_v32  ;;  %v4435_v37 = vpop.f32.mrb[83].mxu1  ;;  %v3952_v59 = vmul.f32 -1.442695, %v4484_v32 }
0x29bd   :  { %v4677_v38 = vpop.eup %4676 }
0x29be   :  { %3406 = vrot.lane.b32.xlu1 %v4677_v38, %s5781_s27 }
0x29da   :  { %v3233_v39 = vpop.f32.mrb[92].mxu0 }
0x29db   :  { %v4416_v40 = vpop.f32.mrb[93].mxu0 }
0x29dc   :  { %v3236_v41 = vpop.f32.mrb[94].mxu0 }
0x29dd   :  { %v4417_v45 = vpop.f32.mrb[95].mxu0 }
0x29e2   :  { %v3279_v47 = vpop.f32.mrb[96].mxu0 }
0x29e3   :  { %v3280_v48 = vadd.f32 %v3279_v47, %v3233_v39  ;;  %v4422_v49 = vpop.f32.mrb[97].mxu0 }
0x29e4   :  { %v3282_v50 = vpop.f32.mrb[98].mxu0 }
0x29e5   :  { %v3285_v51 = vadd.f32 %v5430_v28, %v3280_v48  ;;  %v4423_v55 = vpop.f32.mrb[99].mxu0 }
0x29e7   :  { %4678 = vtanh.f32 %v3285_v51  ;;  %v3948_v36 = vmul.f32 -1.442695, %v3285_v51 }
0x29e8   :  { %4680 = vpow2.f32 %v3952_v59 }
0x29f1   :  { %v4679_v58 = vpop.eup %4678 }
0x29f2   :  { %3295 = vrot.lane.b32.xlu0 %v4679_v58, %s5781_s27  ;;  %v4681_v60 = vpop.eup %4680 }
0x29f3   :  { %v3400_v62 = vadd.f32 1.0, %v4681_v60 }
0x29f5   :  { %4682 = vrcp.f32 %v3400_v62 }
0x29f6   :  { %4684 = vpow2.f32 %v3948_v36 }
0x29ff   :  { %v4683_v63 = vpop.eup %4682 }
0x2a00   :  { %v4685_v1 = vpop.eup %4684  ;;  %v3404_v44 = vmul.f32 %v4683_v63, %v5602_v15 }
0x2a01   :  { %v3289_v3 = vadd.f32 1.0, %v4685_v1 }
0x2a03   :  { %4686 = vrcp.f32 %v3289_v3 }
0x2a0d   :  { %v4687_v4 = vpop.eup %4686 }
0x2a0e   :  { %v3293_v52 = vmul.f32 %v4687_v4, %v5607_v53 }
0x2a30   :  { %v3407_v0 = vpop.permute.xlu1 %3406 }
0x2a31   :  { %v3409_v35 = vmul.f32 %v4683_v63, %v3407_v0 }
0x2a33   :  { %3411 = vrot.lane.b32.xlu1 %v3409_v35, %s4725_s20 }
0x2a64   :  { %v3296_v5 = vpop.permute.xlu0 %3295 }
0x2a65   :  { %v3298_v42 = vmul.f32 %v4687_v4, %v3296_v5 }
0x2a67   :  { %3300 = vrot.lane.b32.xlu0 %v3298_v42, %s4725_s20 }
0x2aa5   :  { %v3412_v6 = vpop.permute.xlu1 %3411 }
0x2aa6   :  { %v5643_v7 = vadd.f32 %v3412_v6, %v3404_v44 }
0x2aa8   :  { %4688 = vtanh.f32 %v5643_v7 }
0x2ab2   :  { %v4689_v46 = vpop.eup %4688 }
0x2ab3   :  { %3417 = vrot.lane.b32.xlu1 %v4689_v46, %s4726_s21 }
0x2ad9   :  { %v3301_v8 = vpop.permute.xlu0 %3300 }
0x2ada   :  { %v5648_v9 = vadd.f32 %v3301_v8, %v3293_v52 }
0x2adc   :  { %4690 = vtanh.f32 %v5648_v9 }
0x2ae6   :  { %v4691_v11 = vpop.eup %4690 }
0x2ae7   :  { %3306 = vrot.lane.b32.xlu0 %v4691_v11, %s4726_s21  ;;  %v4716_v11 = vld [vmem:[%s5735_s23] ss:$0 sm:$0xff] }
0x2b25   :  { %v3418_v56 = vpop.permute.xlu1 %3417 }
0x2b26   :  { %v3420_v12 = vmul.f32 %v4683_v63, %v3418_v56 }
0x2b28   :  { %v3421_v13 = vpack.c.bf16 %v3420_v12, %v3420_v12 }
0x2b2a   :  { %3470 = vrot.lane.b32.xlu1 %v3421_v13, %s5783_s26 }
0x2b59   :  { %v3307_v15 = vpop.permute.xlu0 %3306 }
0x2b5a   :  { %v3309_v16 = vmul.f32 %v4687_v4, %v3307_v15 }
0x2b5c   :  { %v3422_v43 = vpack.c.bf16 %v3309_v16, %v3309_v16 }
0x2b5e   :  { %3424 = vrot.lane.b32.xlu0 %v3422_v43, %s5783_s26 }
0x2b9c   :  { %v3471_v18 = vpop.permute.xlu1 %3470 }
0x2b9d   :  { %4457 = vmatmul.mubr.msk.bf16.vlgmr.msra.gmra.mrb[84].mxu1 %vm203_vm2, %v3471_v18 }
0x2b9e   :  { %4474 = vmatprep.mubr.msk.bf16.mxu1 %vm4718_vm1, %v4717_v14 }
0x2bd0   :  { %v3425_v61 = vpop.permute.xlu0 %3424 }
0x2bd1   :  { %4439 = vmatmul.mubr.msk.bf16.vlgmr.msra.gmra.mrb[100].mxu0 %vm203_vm2, %v3425_v61 }
0x2bd2   :  { %4443 = vmatpush3.bf16.msra.mxu0 %v5404_v19  ;;  %4444 = vmatprep.mubr.msk.bf16.mxu0 %vm4718_vm1, %v4717_v14 }
0x2bd3   :  { %4460 = vmatprep.subr.bf16.mxu0 %v4717_v14 }
0x2bd9   :  { %4445 = vmatmul.mubr.msk.bf16.vlgmr.msra.gmra.mrb[104].mxu0 %vm203_vm2, %v3471_v18 }
0x2bda   :  { %4461 = vmatpush3.bf16.msra.mxu0 %v5397_v17  ;;  %4462 = vmatprep.mubr.msk.bf16.mxu0 %vm4718_vm1, %v4717_v14 }
0x2bdb   :  { %4466 = vmatprep.subr.bf16.mxu0 %v4717_v14 }
0x2c70   :  { %v3620_v53 = vpop.f32.mrb[84].mxu1 }
0x2c71   :  { %v4485_v20 = vadd.f32 %v3620_v53, %v5377_v2  ;;  %v4458_v21 = vpop.f32.mrb[85].mxu1 }
0x2c72   :  { %v3623_v22 = vpop.f32.mrb[86].mxu1  ;;  %v3770_v21 = vld [vmem:[%s5736_s24] sm:$0xff] }
0x2c73   :  { %4692 = vtanh.f32 %v4485_v20  ;;  %v4459_v23 = vpop.f32.mrb[87].mxu1  ;;  %v3959_v34 = vmul.f32 -1.442695, %v4485_v20  ;;  %v3771_v22 = vld [vmem:[%s5736_s24 + $0x8] sm:$0xff] }
0x2c74   :  { %v3773_v23 = vpack.c.bf16 %v3771_v22, %v3770_v21 }
0x2c76   :  { %4473 = vmatpush3.bf16.msra.mxu1 %v3773_v23 }
0x2c7d   :  { %v4693_v24 = vpop.eup %4692 }
0x2c7e   :  { %3636 = vrot.lane.b32.xlu1 %v4693_v24, %s5781_s27 }
0x2ca4   :  { %v3463_v25 = vpop.f32.mrb[100].mxu0 }
0x2ca5   :  { %v4440_v26 = vpop.f32.mrb[101].mxu0 }
0x2ca6   :  { %v3466_v27 = vpop.f32.mrb[102].mxu0 }
0x2ca7   :  { %v4441_v29 = vpop.f32.mrb[103].mxu0 }
0x2cac   :  { %v3509_v17 = vpop.f32.mrb[104].mxu0 }
0x2cad   :  { %v3510_v30 = vadd.f32 %v3509_v17, %v3463_v25  ;;  %v4446_v31 = vpop.f32.mrb[105].mxu0  ;;  %v31_v25 = vstv %s5737_s25 }
0x2cae   :  { %v3512_v54 = vpop.f32.mrb[106].mxu0  ;;  %32 = vst [vmem:[#allocation2] sm:$0x1] %v31_v25 }
0x2caf   :  { %v3515_v32 = vadd.f32 %v5430_v28, %v3510_v30  ;;  %v4447_v33 = vpop.f32.mrb[107].mxu0 }
0x2cb1   :  { %4694 = vtanh.f32 %v3515_v32  ;;  %v3955_v45 = vmul.f32 -1.442695, %v3515_v32 }
0x2cb2   :  { %4696 = vpow2.f32 %v3959_v34 }
0x2cb5   :  { %v3963_v30 = vld [vmem:[#allocation2] ss:$0 sm:$0xff] }
0x2cbb   :  { %v4695_v2 = vpop.eup %4694 }
0x2cbc   :  { %3525 = vrot.lane.b32.xlu0 %v4695_v2, %s5781_s27  ;;  %v4697_v37 = vpop.eup %4696 }
0x2cbd   :  { %v3630_v38 = vadd.f32 1.0, %v4697_v37 }
0x2cbf   :  { %4698 = vrcp.f32 %v3630_v38 }
0x2cc0   :  { %4700 = vpow2.f32 %v3955_v45 }
0x2cc9   :  { %v4699_v39 = vpop.eup %4698 }
0x2cca   :  { %v4701_v47 = vpop.eup %4700  ;;  %v3634_v51 = vmul.f32 %v4699_v39, %v5643_v7 }
0x2ccb   :  { %v3519_v48 = vadd.f32 1.0, %v4701_v47 }
0x2ccd   :  { %4702 = vrcp.f32 %v3519_v48 }
0x2cd7   :  { %v4703_v28 = vpop.eup %4702 }
0x2cd8   :  { %v3523_v60 = vmul.f32 %v4703_v28, %v5648_v9 }
0x2cf0   :  { %v3637_v40 = vpop.permute.xlu1 %3636 }
0x2cf1   :  { %v3639_v41 = vmul.f32 %v4699_v39, %v3637_v40 }
0x2cf3   :  { %3641 = vrot.lane.b32.xlu1 %v3639_v41, %s4725_s20 }
0x2d2e   :  { %v3526_v49 = vpop.permute.xlu0 %3525 }
0x2d2f   :  { %v3528_v50 = vmul.f32 %v4703_v28, %v3526_v49 }
0x2d31   :  { %3530 = vrot.lane.b32.xlu0 %v3528_v50, %s4725_s20 }
0x2d65   :  { %v3642_v55 = vpop.permute.xlu1 %3641 }
0x2d66   :  { %v3644_v58 = vadd.f32 %v3642_v55, %v3634_v51 }
0x2d68   :  { %4704 = vtanh.f32 %v3644_v58 }
0x2d72   :  { %v4705_v59 = vpop.eup %4704 }
0x2d73   :  { %3647 = vrot.lane.b32.xlu1 %v4705_v59, %s4726_s21 }
0x2da3   :  { %v3531_v62 = vpop.permute.xlu0 %3530 }
0x2da4   :  { %v3533_v63 = vadd.f32 %v3531_v62, %v3523_v60 }
0x2da6   :  { %4706 = vtanh.f32 %v3533_v63 }
0x2db0   :  { %v4707_v0 = vpop.eup %4706 }
0x2db1   :  { %3536 = vrot.lane.b32.xlu0 %v4707_v0, %s4726_s21 }
0x2de5   :  { %v3648_v35 = vpop.permute.xlu1 %3647 }
0x2de6   :  { %v3650_v36 = vmul.f32 %v4699_v39, %v3648_v35 }
0x2de8   :  { %v3651_v1 = vpack.c.bf16 %v3650_v36, %v3650_v36 }
0x2dea   :  { %3700 = vrot.lane.b32.xlu1 %v3651_v1, %s5783_s26 }
0x2e23   :  { %v3537_v3 = vpop.permute.xlu0 %3536 }
0x2e24   :  { %v3539_v4 = vmul.f32 %v4703_v28, %v3537_v3 }
0x2e26   :  { %v3652_v5 = vpack.c.bf16 %v3539_v4, %v3539_v4 }
0x2e28   :  { %3654 = vrot.lane.b32.xlu0 %v3652_v5, %s5783_s26 }
0x2e5c   :  { %v3701_v44 = vpop.permute.xlu1 %3700 }
0x2e9a   :  { %v3655_v42 = vpop.permute.xlu0 %3654 }
0x2e9b   :  { %4463 = vmatmul.mubr.msk.bf16.vlgmr.msra.gmra.mrb[108].mxu0 %vm203_vm2, %v3655_v42 }
0x2e9c   :  { %4467 = vmatpush3.bf16.msra.mxu0 %v5404_v19  ;;  %4468 = vmatprep.mubr.msk.bf16.mxu0 %vm4718_vm1, %v4717_v14 }
0x2ea3   :  { %4469 = vmatmul.mubr.msk.bf16.vlgmr.msra.gmra.mrb[112].mxu0 %vm203_vm2, %v3701_v44 }
0x2f6e   :  { %v3693_v6 = vpop.f32.mrb[108].mxu0 }
0x2f6f   :  { %v4464_v7 = vpop.f32.mrb[109].mxu0 }
0x2f70   :  { %v3696_v46 = vpop.f32.mrb[110].mxu0 }
0x2f71   :  { %v4465_v52 = vpop.f32.mrb[111].mxu0 }
0x2f76   :  { %v3739_v8 = vpop.f32.mrb[112].mxu0 }
0x2f77   :  { %v3740_v9 = vadd.f32 %v3739_v8, %v3693_v6  ;;  %v4470_v57 = vpop.f32.mrb[113].mxu0 }
0x2f78   :  { %v3742_v10 = vpop.f32.mrb[114].mxu0 }
0x2f79   :  { %v3745_v56 = vadd.f32 %v4716_v11, %v3740_v9  ;;  %v4471_v19 = vpop.f32.mrb[115].mxu0 }
0x2f7b   :  { %4708 = vtanh.f32 %v3745_v56  ;;  %v3962_v14 = vmul.f32 -1.442695, %v3745_v56 }
0x2f7d   :  { %4710 = vpow2.f32 %v3962_v14 }
0x2f85   :  { %v4709_v12 = vpop.eup %4708 }
0x2f86   :  { %3755 = vrot.lane.b32.xlu0 %v4709_v12, %s5781_s27 }
0x2f87   :  { %v4711_v13 = vpop.eup %4710 }
0x2f88   :  { %v3749_v15 = vadd.f32 1.0, %v4711_v13 }
0x2f8a   :  { %4712 = vrcp.f32 %v3749_v15 }
0x2f94   :  { %v4713_v16 = vpop.eup %4712 }
0x2f95   :  { %v3753_v61 = vmul.f32 %v4713_v16, %v3533_v63 }
0x2ff8   :  { %v3756_v43 = vpop.permute.xlu0 %3755 }
0x2ff9   :  { %v3758_v18 = vmul.f32 %v4713_v16, %v3756_v43 }
0x2ffb   :  { %3760 = vrot.lane.b32.xlu1 %v3758_v18, %s4725_s20 }
0x306d   :  { %v3761_v53 = vpop.permute.xlu1 %3760 }
0x306e   :  { %v3763_v20 = vadd.f32 %v3761_v53, %v3753_v61 }
0x3070   :  { %4714 = vtanh.f32 %v3763_v20 }
0x307a   :  { %v4715_v24 = vpop.eup %4714 }
0x307b   :  { %3766 = vrot.lane.b32.xlu0 %v4715_v24, %s4726_s21 }
0x30ed   :  { %v3767_v26 = vpop.permute.xlu0 %3766 }
0x30ee   :  { %v3769_v27 = vmul.f32 %v4713_v16, %v3767_v26 }
0x30f0   :  { %v3772_v29 = vpack.c.bf16 %v3769_v27, %v3769_v27 }
0x30f2   :  { %3782 = vrot.lane.b32.xlu1 %v3772_v29, %s5783_s26 }
0x3164   :  { %v3783_v17 = vpop.permute.xlu1 %3782 }
0x3165   :  { %4475 = vmatmul.mubr.msk.bf16.vlgmr.msra.gmra.mrb[88].mxu1 %vm203_vm2, %v3783_v17 }
0x3238   :  { %v3821_v31 = vpop.f32.mrb[88].mxu1 }
0x3239   :  { %v3822_v54 = vadd.f32 %v3963_v30, %v3821_v31  ;;  %v4476_v32 = vpop.f32.mrb[89].mxu1 }
0x323a   :  { %v3824_v33 = vpop.f32.mrb[90].mxu1 }
0x323b   :  { %3828 = vst.msk [vmem:[%s5786_s8] sm:$0x3] %vm3827_vm9, %v3822_v54  ;;  %v4477_v2 = vpop.f32.mrb[91].mxu1 }

</bundles_post_ra>
